<compile_context>
chip_gen: v5e
topology: v5e:2x2
jax: 0.10.0
libtpu: 0.0.40
codegen_flags: <defaults>
</compile_context>

<pallas_src>
import functools

import jax
import jax.numpy as jnp
from jax.experimental import pallas as pl
from jax.experimental.pallas import tpu as pltpu


# ---------------------------------------------------------------------------
# Stage 1: bottleneck + tap-packed "same" convs + fused maxpool/1x1 branch,
#          plus per-channel sum / sum-of-squares for training-mode BatchNorm.
# ---------------------------------------------------------------------------
def _stage1_kernel(x_ref, wb_ref, bb_ref, wbig_ref, bbr_ref,
                   pre_ref, sum_ref, sumsq_ref,
                   ypad_ref, xpad_ref, stack_ref,
                   *, NB, C_in, L, B_blk, KMAX, CP):
    pmax = KMAX // 2
    i = pl.program_id(1)                       # inner (batch-step) grid index

    # Zero the per-group BN stat accumulators at the first inner step.
    @pl.when(i == 0)
    def _():
        sum_ref[...] = jnp.zeros_like(sum_ref)
        sumsq_ref[...] = jnp.zeros_like(sumsq_ref)

    # Constant halo regions rewritten every step (negligible cost) so nothing
    # depends on scratch persistence or grid ordering.
    if pmax > 0:
        zhalo = jnp.zeros((B_blk * NB, pmax), ypad_ref.dtype)
        ypad_ref[:, 0:pmax] = zhalo
        ypad_ref[:, pmax + L:2 * pmax + L] = zhalo
    ninf = jnp.full((B_blk * C_in, 1), -jnp.inf, xpad_ref.dtype)
    xpad_ref[:, 0:1] = ninf
    xpad_ref[:, L + 1:L + 2] = ninf
    if CP > C_in:   # zero the padding rows of the maxpool block in the stack
        stack_ref[KMAX * NB + C_in:KMAX * NB + CP, :] = jnp.zeros(
            (CP - C_in, B_blk * L), stack_ref.dtype)

    # Bottleneck 1x1 conv per sample (tiny contraction -> keep f32 operands).
    for b in range(B_blk):
        xb = x_ref[b]                                              # (C_in, L) f32
        yb = jnp.dot(wb_ref[...], xb,
                     preferred_element_type=jnp.float32) + bb_ref[...]
        ypad_ref[b * NB:(b + 1) * NB, pmax:pmax + L] = yb.astype(ypad_ref.dtype)
        xpad_ref[b * C_in:(b + 1) * C_in, 1:1 + L] = xb

    # im2col: load the padded bottleneck ONCE, then build the tap-packed stack
    # from value slices (no per-tap unaligned VMEM reloads).
    yp = ypad_ref[...]                         # (B_blk*NB, L + 2*pmax) bf16
    for t in range(KMAX):
        for b in range(B_blk):
            stack_ref[t * NB:(t + 1) * NB, b * L:(b + 1) * L] = \
                yp[b * NB:(b + 1) * NB, t:t + L]

    # MaxPool1d(3, stride=1, pad=1) rows appended to the stack so the 1x1
    # maxpool-branch conv is part of the same matmul.
    xp = xpad_ref[...]
    mp = jnp.maximum(jnp.maximum(xp[:, 0:L], xp[:, 1:1 + L]), xp[:, 2:2 + L])
    for b in range(B_blk):
        stack_ref[KMAX * NB:KMAX * NB + C_in, b * L:(b + 1) * L] = \
            mp[b * C_in:(b + 1) * C_in, :].astype(stack_ref.dtype)

    # One MXU matmul for all 4 branches / 128 output channels (bf16 operands,
    # f32 accumulation).
    conv = jnp.dot(wbig_ref[...], stack_ref[...],
                   preferred_element_type=jnp.float32) + bbr_ref[...]

    # Per-channel BN statistics, accumulated in f32.
    sum_ref[0] += jnp.sum(conv, axis=1, keepdims=True)
    sumsq_ref[0] += jnp.sum(conv * conv, axis=1, keepdims=True)

    # Lane-dense bf16 writeback of the pre-BN activations.
    pre_ref[0] = conv.astype(pre_ref.dtype)


# ---------------------------------------------------------------------------
# Stage 2: folded BatchNorm (scale/shift precomputed in glue) + ReLU, and
#          de-blocking of the lane-dense slab back to (N, 4*NB, L).
# ---------------------------------------------------------------------------
def _bn_relu_kernel(pre_ref, scale_ref, shift_ref, out_ref, *, B_blk, L):
    z = jnp.maximum(
        pre_ref[0].astype(jnp.float32) * scale_ref[...] + shift_ref[...], 0.0)
    for b in range(B_blk):
        out_ref[b] = z[:, b * L:(b + 1) * L]


def inception_forward(x, params):
    N, C_in, L = x.shape
    NB = params['wb'].shape[0]                  # nb_filters (= bottleneck width)
    kss = [int(w.shape[-1]) for w in params['w_convs']]
    KMAX = max(kss)
    pmax = KMAX // 2
    CP = ((C_in + 15) // 16) * 16               # maxpool rows, bf16 sublane tile
    KTOT = KMAX * NB + CP                       # fused contraction length

    wb = params['wb']
    bb = params['bb'].reshape(NB, 1)

    # Tap-packed, branch-fused conv weight (bf16): row block b = branch b's
    # output channels; column block t holds the weights applied to the window
    # ypad[:, t:t+L] (zero where branch b's kernel does not cover tap t).  The
    # last CP columns carry the maxpool-branch 1x1 weights (zeros elsewhere).
    blocks = []
    for w, K in zip(params['w_convs'], kss):
        P = K // 2
        wr = jnp.transpose(w, (0, 2, 1)).reshape(NB, K * NB)   # [o, k*NB+i] = w[o,i,k]
        left = (pmax - P) * NB
        right = KMAX * NB - left - K * NB
        blocks.append(jnp.pad(wr, ((0, 0), (left, right))))
    wconv = jnp.concatenate(blocks, axis=0)                         # (3*NB, KMAX*NB)
    top = jnp.pad(wconv, ((0, 0), (0, CP)))                         # (3*NB, KTOT)
    bot = jnp.pad(params['wmp'], ((0, 0), (KMAX * NB, CP - C_in)))  # (NB,   KTOT)
    wbig = jnp.concatenate([top, bot], axis=0).astype(jnp.bfloat16)  # (4*NB, KTOT)
    bbr = jnp.concatenate(
        [b.reshape(NB, 1) for b in params['b_convs']]
        + [params['bmp'].reshape(NB, 1)], axis=0)                    # (4*NB, 1)

    # Samples per grid step: lane-dense blocks for small L (largest divisor of
    # N with B_blk*L <~ 512).  For large L, B_blk=1.
    target = max(1, 512 // max(L, 1))
    B_blk = 1
    for d in range(1, N + 1):
        if N % d == 0 and d <= target:
            B_blk = d
    S = N // B_blk
    # Split the steps over an outer "parallel" axis with per-group BN stat
    # accumulators so both TensorCores are used on v7x (G=1 otherwise).
    G = 2 if (S % 2 == 0 and S >= 2) else 1
    inner = S // G

    def const(shape):
        return pl.BlockSpec(shape, lambda g, i: (0,) * len(shape))

    stage1 = functools.partial(_stage1_kernel, NB=NB, C_in=C_in, L=L,
                               B_blk=B_blk, KMAX=KMAX, CP=CP)

    # TODO(synk): add an L-tiling grid axis (with a 2*pmax halo) for very long
    # sequences so per-step VMEM stays under v7x's 64 MiB.
    pre, chsum, chsumsq = pl.pallas_call(
        stage1,
        out_shape=(jax.ShapeDtypeStruct((S, 4 * NB, B_blk * L), jnp.bfloat16),
                   jax.ShapeDtypeStruct((G, 4 * NB, 1), jnp.float32),
                   jax.ShapeDtypeStruct((G, 4 * NB, 1), jnp.float32)),
        grid_spec=pltpu.PrefetchScalarGridSpec(
            num_scalar_prefetch=0,
            grid=(G, inner),
            in_specs=[
                pl.BlockSpec((B_blk, C_in, L), lambda g, i: (g * inner + i, 0, 0)),
                const((NB, C_in)), const((NB, 1)),            # bottleneck 1x1
                const((4 * NB, KTOT)), const((4 * NB, 1)),    # fused conv weights
            ],
            out_specs=(
                pl.BlockSpec((1, 4 * NB, B_blk * L),
                             lambda g, i: (g * inner + i, 0, 0)),
                pl.BlockSpec((1, 4 * NB, 1), lambda g, i: (g, 0, 0)),
                pl.BlockSpec((1, 4 * NB, 1), lambda g, i: (g, 0, 0)),
            ),
            scratch_shapes=[
                pltpu.VMEM((B_blk * NB, L + 2 * pmax), jnp.bfloat16),  # padded bottleneck
                pltpu.VMEM((B_blk * C_in, L + 2), jnp.float32),        # padded input (maxpool)
                pltpu.VMEM((KTOT, B_blk * L), jnp.bfloat16),           # tap-packed im2col stack
            ],
        ),
        compiler_params=pltpu.CompilerParams(
            dimension_semantics=("parallel", "arbitrary"),
            vmem_limit_bytes=64 * 1024 * 1024),
    )(x, wb, bb, wbig, bbr)

    # Glue: training-mode BN batch statistics folded into per-channel scale/shift.
    count = float(N * L)
    s1 = jnp.sum(chsum, axis=0)                     # (4*NB, 1)
    s2 = jnp.sum(chsumsq, axis=0)
    mean = s1 / count
    var = jnp.maximum(s2 / count - mean * mean, 0.0)  # guard E[x^2]-E[x]^2 cancellation
    scale = params['gamma'].reshape(4 * NB, 1) * jax.lax.rsqrt(var + 1e-5)
    shift = params['beta'].reshape(4 * NB, 1) - mean * scale

    stage2 = functools.partial(_bn_relu_kernel, B_blk=B_blk, L=L)
    out = pl.pallas_call(
        stage2,
        out_shape=jax.ShapeDtypeStruct((N, 4 * NB, L), jnp.float32),
        grid_spec=pltpu.PrefetchScalarGridSpec(
            num_scalar_prefetch=0,
            grid=(S,),
            in_specs=[
                pl.BlockSpec((1, 4 * NB, B_blk * L), lambda s: (s, 0, 0)),
                pl.BlockSpec((4 * NB, 1), lambda s: (0, 0)),
                pl.BlockSpec((4 * NB, 1), lambda s: (0, 0)),
            ],
            out_specs=pl.BlockSpec((B_blk, 4 * NB, L), lambda s: (s, 0, 0)),
        ),
        compiler_params=pltpu.CompilerParams(
            dimension_semantics=("parallel",),
            vmem_limit_bytes=64 * 1024 * 1024),
    )(pre, scale, shift)
    return out


# ---------------------------------------------------------------------------
# Pure-JAX f32 reference (correctness check only).  The kernel uses bf16 MXU
# operands and a bf16 pre-BN intermediate, so tolerance is ~1e-2 class.
# ---------------------------------------------------------------------------
def reference_forward(x, p):
    def conv1d(inp, w, b, pad):
        out = jax.lax.conv_general_dilated(
            inp, w, window_strides=(1,), padding=[(pad, pad)],
            dimension_numbers=('NCH', 'OIH', 'NCH'))
        return out + b[None, :, None]

    y = conv1d(x, p['wb'][:, :, None], p['bb'], 0)
    outs = [conv1d(y, w, b, w.shape[-1] // 2)
            for w, b in zip(p['w_convs'], p['b_convs'])]
    mp = jax.lax.reduce_window(x, -jnp.inf, jax.lax.max,
                               (1, 1, 3), (1, 1, 1),
                               [(0, 0), (0, 0), (1, 1)])
    outs.append(conv1d(mp, p['wmp'][:, :, None], p['bmp'], 0))
    pre = jnp.concatenate(outs, axis=1)
    mean = pre.mean(axis=(0, 2), keepdims=True)
    var = ((pre - mean) ** 2).mean(axis=(0, 2), keepdims=True)
    g = p['gamma'][None, :, None]
    be = p['beta'][None, :, None]
    return jnp.maximum((pre - mean) * jax.lax.rsqrt(var + 1e-5) * g + be, 0.0)


if __name__ == "__main__":
    # Inception(c_in=4, bottleneck=32, ks=40, nb_filters=32)
    N, C_in, L = 2, 4, 16
    NB = 32
    kss = [39, 19, 9]          # [ks // 2**i for i in range(3)], forced odd

    key = jax.random.PRNGKey(0)
    ks_all = jax.random.split(key, 13)
    x = jax.random.normal(ks_all[0], (N, C_in, L), jnp.float32)

    params = {
        'wb': jax.random.normal(ks_all[1], (NB, C_in), jnp.float32) * 0.2,
        'bb': jax.random.normal(ks_all[2], (NB,), jnp.float32) * 0.1,
        'w_convs': [jax.random.normal(ks_all[3 + i], (NB, NB, K), jnp.float32) * 0.05
                    for i, K in enumerate(kss)],
        'b_convs': [jax.random.normal(ks_all[6 + i], (NB,), jnp.float32) * 0.05
                    for i in range(3)],
        'wmp': jax.random.normal(ks_all[9], (NB, C_in), jnp.float32) * 0.2,
        'bmp': jax.random.normal(ks_all[10], (NB,), jnp.float32) * 0.1,
        'gamma': 1.0 + 0.1 * jax.random.normal(ks_all[11], (4 * NB,), jnp.float32),
        'beta': 0.1 * jax.random.normal(ks_all[12], (4 * NB,), jnp.float32),
    }

    out = jax.block_until_ready(inception_forward(x, params))
    ref = jax.block_until_ready(reference_forward(x, params))
    if not jnp.allclose(out, ref, atol=3e-2, rtol=3e-2):
        err = float(jnp.max(jnp.abs(out - ref)))
        raise AssertionError(
            f"Pallas Inception kernel does not match JAX reference (max err {err:.4e})")

    print("KERNEL_OK")
</pallas_src>

<mosaic_0001>
module attributes {stable_mosaic.version = 11 : i64} {
  func.func @_stage1_kernel(%arg0: i32, %arg1: i32, %arg2: memref<2x4x16xf32, #tpu.memory_space<vmem>>, %arg3: memref<32x4xf32, #tpu.memory_space<vmem>>, %arg4: memref<32x1xf32, #tpu.memory_space<vmem>>, %arg5: memref<128x1264xbf16, #tpu.memory_space<vmem>>, %arg6: memref<128x1xf32, #tpu.memory_space<vmem>>, %arg7: memref<1x128x32xbf16, #tpu.memory_space<vmem>>, %arg8: memref<1x128x1xf32, #tpu.memory_space<vmem>>, %arg9: memref<1x128x1xf32, #tpu.memory_space<vmem>>, %arg10: memref<64x54xbf16, #tpu.memory_space<vmem>>, %arg11: memref<8x18xf32, #tpu.memory_space<vmem>>, %arg12: memref<1264x32xbf16, #tpu.memory_space<vmem>>) attributes {dimension_semantics = [#tpu.dimension_semantics<parallel>, #tpu.dimension_semantics<arbitrary>], iteration_bounds = array<i64: 1, 1>, scalar_prefetch = 0 : i64, scratch_operands = 3 : i64, tpu.core_type = #tpu.core_type<tc>, window_params = [{transform_indices = @transform_0, window_bounds = array<i64: 2, 4, 16>}, {pipeline_mode = #tpu.pipeline_mode<synchronous>, transform_indices = @transform_1, window_bounds = array<i64: 32, 4>}, {pipeline_mode = #tpu.pipeline_mode<synchronous>, transform_indices = @transform_2, window_bounds = array<i64: 32, 1>}, {pipeline_mode = #tpu.pipeline_mode<synchronous>, transform_indices = @transform_3, window_bounds = array<i64: 128, 1264>}, {pipeline_mode = #tpu.pipeline_mode<synchronous>, transform_indices = @transform_4, window_bounds = array<i64: 128, 1>}, {transform_indices = @transform_5, window_bounds = array<i64: 1, 128, 32>}, {transform_indices = @transform_6, window_bounds = array<i64: 1, 128, 1>}, {transform_indices = @transform_7, window_bounds = array<i64: 1, 128, 1>}]} {
    %c0_i32 = arith.constant 0 : i32
    %0 = arith.cmpi eq, %arg1, %c0_i32 : i32
    %1 = arith.extui %0 : i1 to i32
    %c0_i32_0 = arith.constant 0 : i32
    %2 = arith.cmpi ne, %1, %c0_i32_0 : i32
    scf.if %2 {
      %cst_178 = arith.constant 0.000000e+00 : f32
      %227 = vector.broadcast %cst_178 : f32 to vector<1x128x1xf32>
      %c0_179 = arith.constant 0 : index
      %c0_180 = arith.constant 0 : index
      %c0_181 = arith.constant 0 : index
      %228 = vector.load %arg8[%c0_179, %c0_180, %c0_181] : memref<1x128x1xf32, #tpu.memory_space<vmem>>, vector<1x128x1xf32>
      tpu.vector_store %arg8[%c0_179, %c0_180, %c0_181], %227 {strides = array<i32>} : memref<1x128x1xf32, #tpu.memory_space<vmem>>, vector<1x128x1xf32>,
      %cst_182 = arith.constant 0.000000e+00 : f32
      %229 = vector.broadcast %cst_182 : f32 to vector<1x128x1xf32>
      %c0_183 = arith.constant 0 : index
      %c0_184 = arith.constant 0 : index
      %c0_185 = arith.constant 0 : index
      %230 = vector.load %arg9[%c0_183, %c0_184, %c0_185] : memref<1x128x1xf32, #tpu.memory_space<vmem>>, vector<1x128x1xf32>
      tpu.vector_store %arg9[%c0_183, %c0_184, %c0_185], %229 {strides = array<i32>} : memref<1x128x1xf32, #tpu.memory_space<vmem>>, vector<1x128x1xf32>,
    } else {
    }
    %cst = arith.constant 0.000000e+00 : bf16
    %3 = vector.broadcast %cst : bf16 to vector<64x19xbf16>
    %c0 = arith.constant 0 : index
    %c0_1 = arith.constant 0 : index
    %4 = vector.load %arg10[%c0, %c0_1] : memref<64x54xbf16, #tpu.memory_space<vmem>>, vector<64x19xbf16>
    tpu.vector_store %arg10[%c0, %c0_1], %3 {strides = array<i32>} : memref<64x54xbf16, #tpu.memory_space<vmem>>, vector<64x19xbf16>,
    %c0_2 = arith.constant 0 : index
    %c35 = arith.constant 35 : index
    %5 = vector.load %arg10[%c0_2, %c35] : memref<64x54xbf16, #tpu.memory_space<vmem>>, vector<64x19xbf16>
    tpu.vector_store %arg10[%c0_2, %c35], %3 {strides = array<i32>} : memref<64x54xbf16, #tpu.memory_space<vmem>>, vector<64x19xbf16>,
    %cst_3 = arith.constant 0xFF800000 : f32
    %6 = vector.broadcast %cst_3 : f32 to vector<8x1xf32>
    %c0_4 = arith.constant 0 : index
    %c0_5 = arith.constant 0 : index
    %7 = vector.load %arg11[%c0_4, %c0_5] : memref<8x18xf32, #tpu.memory_space<vmem>>, vector<8x1xf32>
    tpu.vector_store %arg11[%c0_4, %c0_5], %6 {strides = array<i32>} : memref<8x18xf32, #tpu.memory_space<vmem>>, vector<8x1xf32>,
    %c0_6 = arith.constant 0 : index
    %c17 = arith.constant 17 : index
    %8 = vector.load %arg11[%c0_6, %c17] : memref<8x18xf32, #tpu.memory_space<vmem>>, vector<8x1xf32>
    tpu.vector_store %arg11[%c0_6, %c17], %6 {strides = array<i32>} : memref<8x18xf32, #tpu.memory_space<vmem>>, vector<8x1xf32>,
    %cst_7 = arith.constant 0.000000e+00 : bf16
    %9 = vector.broadcast %cst_7 : bf16 to vector<12x32xbf16>
    %c1252 = arith.constant 1252 : index
    %c0_8 = arith.constant 0 : index
    %10 = vector.load %arg12[%c1252, %c0_8] : memref<1264x32xbf16, #tpu.memory_space<vmem>>, vector<12x32xbf16>
    tpu.vector_store %arg12[%c1252, %c0_8], %9 {strides = array<i32>} : memref<1264x32xbf16, #tpu.memory_space<vmem>>, vector<12x32xbf16>,
    %c0_9 = arith.constant 0 : index
    %c0_10 = arith.constant 0 : index
    %c0_11 = arith.constant 0 : index
    %11 = vector.load %arg2[%c0_9, %c0_10, %c0_11] : memref<2x4x16xf32, #tpu.memory_space<vmem>>, vector<1x4x16xf32>
    %12 = vector.shape_cast %11 : vector<1x4x16xf32> to vector<4x16xf32>
    %c0_12 = arith.constant 0 : index
    %c0_13 = arith.constant 0 : index
    %13 = vector.load %arg3[%c0_12, %c0_13] : memref<32x4xf32, #tpu.memory_space<vmem>>, vector<32x4xf32>
    %cst_14 = arith.constant dense<0.000000e+00> : vector<32x16xf32>
    %14 = tpu.matmul %13, %12, %cst_14 {dimension_numbers = #tpu.dot_dimension_numbers<[1], [0], [0], [1], [0, 0, 1, 1], [], []>} : vector<32x4xf32>, vector<4x16xf32>, vector<32x16xf32> -> vector<32x16xf32>
    %c0_15 = arith.constant 0 : index
    %c0_16 = arith.constant 0 : index
    %15 = vector.load %arg4[%c0_15, %c0_16] : memref<32x1xf32, #tpu.memory_space<vmem>>, vector<32x1xf32>
    %16 = vector.broadcast %15 : vector<32x1xf32> to vector<32x16xf32>
    %17 = arith.addf %14, %16 : vector<32x16xf32>
    %18 = arith.truncf %17 : vector<32x16xf32> to vector<32x16xbf16>
    %c0_17 = arith.constant 0 : index
    %c19 = arith.constant 19 : index
    %19 = vector.load %arg10[%c0_17, %c19] : memref<64x54xbf16, #tpu.memory_space<vmem>>, vector<32x16xbf16>
    tpu.vector_store %arg10[%c0_17, %c19], %18 {strides = array<i32>} : memref<64x54xbf16, #tpu.memory_space<vmem>>, vector<32x16xbf16>,
    %c0_18 = arith.constant 0 : index
    %c1 = arith.constant 1 : index
    %20 = vector.load %arg11[%c0_18, %c1] : memref<8x18xf32, #tpu.memory_space<vmem>>, vector<4x16xf32>
    tpu.vector_store %arg11[%c0_18, %c1], %12 {strides = array<i32>} : memref<8x18xf32, #tpu.memory_space<vmem>>, vector<4x16xf32>,
    %c1_19 = arith.constant 1 : index
    %c0_20 = arith.constant 0 : index
    %c0_21 = arith.constant 0 : index
    %21 = vector.load %arg2[%c1_19, %c0_20, %c0_21] : memref<2x4x16xf32, #tpu.memory_space<vmem>>, vector<1x4x16xf32>
    %22 = vector.shape_cast %21 : vector<1x4x16xf32> to vector<4x16xf32>
    %c0_22 = arith.constant 0 : index
    %c0_23 = arith.constant 0 : index
    %23 = vector.load %arg3[%c0_22, %c0_23] : memref<32x4xf32, #tpu.memory_space<vmem>>, vector<32x4xf32>
    %cst_24 = arith.constant dense<0.000000e+00> : vector<32x16xf32>
    %24 = tpu.matmul %23, %22, %cst_24 {dimension_numbers = #tpu.dot_dimension_numbers<[1], [0], [0], [1], [0, 0, 1, 1], [], []>} : vector<32x4xf32>, vector<4x16xf32>, vector<32x16xf32> -> vector<32x16xf32>
    %c0_25 = arith.constant 0 : index
    %c0_26 = arith.constant 0 : index
    %25 = vector.load %arg4[%c0_25, %c0_26] : memref<32x1xf32, #tpu.memory_space<vmem>>, vector<32x1xf32>
    %26 = vector.broadcast %25 : vector<32x1xf32> to vector<32x16xf32>
    %27 = arith.addf %24, %26 : vector<32x16xf32>
    %28 = arith.truncf %27 : vector<32x16xf32> to vector<32x16xbf16>
    %c32 = arith.constant 32 : index
    %c19_27 = arith.constant 19 : index
    %29 = vector.load %arg10[%c32, %c19_27] : memref<64x54xbf16, #tpu.memory_space<vmem>>, vector<32x16xbf16>
    tpu.vector_store %arg10[%c32, %c19_27], %28 {strides = array<i32>} : memref<64x54xbf16, #tpu.memory_space<vmem>>, vector<32x16xbf16>,
    %c4 = arith.constant 4 : index
    %c1_28 = arith.constant 1 : index
    %30 = vector.load %arg11[%c4, %c1_28] : memref<8x18xf32, #tpu.memory_space<vmem>>, vector<4x16xf32>
    tpu.vector_store %arg11[%c4, %c1_28], %22 {strides = array<i32>} : memref<8x18xf32, #tpu.memory_space<vmem>>, vector<4x16xf32>,
    %c0_29 = arith.constant 0 : index
    %c0_30 = arith.constant 0 : index
    %31 = vector.load %arg10[%c0_29, %c0_30] : memref<64x54xbf16, #tpu.memory_space<vmem>>, vector<64x54xbf16>
    %32 = vector.extract_strided_slice %31 {offsets = [0, 0], sizes = [32, 16], strides = [1, 1]} : vector<64x54xbf16> to vector<32x16xbf16>
    %c0_31 = arith.constant 0 : index
    %c0_32 = arith.constant 0 : index
    %33 = vector.load %arg12[%c0_31, %c0_32] : memref<1264x32xbf16, #tpu.memory_space<vmem>>, vector<32x16xbf16>
    tpu.vector_store %arg12[%c0_31, %c0_32], %32 {strides = array<i32>} : memref<1264x32xbf16, #tpu.memory_space<vmem>>, vector<32x16xbf16>,
    %34 = vector.extract_strided_slice %31 {offsets = [32, 0], sizes = [32, 16], strides = [1, 1]} : vector<64x54xbf16> to vector<32x16xbf16>
    %c0_33 = arith.constant 0 : index
    %c16 = arith.constant 16 : index
    %35 = vector.load %arg12[%c0_33, %c16] : memref<1264x32xbf16, #tpu.memory_space<vmem>>, vector<32x16xbf16>
    tpu.vector_store %arg12[%c0_33, %c16], %34 {strides = array<i32>} : memref<1264x32xbf16, #tpu.memory_space<vmem>>, vector<32x16xbf16>,
    %36 = vector.extract_strided_slice %31 {offsets = [0, 1], sizes = [32, 16], strides = [1, 1]} : vector<64x54xbf16> to vector<32x16xbf16>
    %c32_34 = arith.constant 32 : index
    %c0_35 = arith.constant 0 : index
    %37 = vector.load %arg12[%c32_34, %c0_35] : memref<1264x32xbf16, #tpu.memory_space<vmem>>, vector<32x16xbf16>
    tpu.vector_store %arg12[%c32_34, %c0_35], %36 {strides = array<i32>} : memref<1264x32xbf16, #tpu.memory_space<vmem>>, vector<32x16xbf16>,
    %38 = vector.extract_strided_slice %31 {offsets = [32, 1], sizes = [32, 16], strides = [1, 1]} : vector<64x54xbf16> to vector<32x16xbf16>
    %c32_36 = arith.constant 32 : index
    %c16_37 = arith.constant 16 : index
    %39 = vector.load %arg12[%c32_36, %c16_37] : memref<1264x32xbf16, #tpu.memory_space<vmem>>, vector<32x16xbf16>
    tpu.vector_store %arg12[%c32_36, %c16_37], %38 {strides = array<i32>} : memref<1264x32xbf16, #tpu.memory_space<vmem>>, vector<32x16xbf16>,
    %40 = vector.extract_strided_slice %31 {offsets = [0, 2], sizes = [32, 16], strides = [1, 1]} : vector<64x54xbf16> to vector<32x16xbf16>
    %c64 = arith.constant 64 : index
    %c0_38 = arith.constant 0 : index
    %41 = vector.load %arg12[%c64, %c0_38] : memref<1264x32xbf16, #tpu.memory_space<vmem>>, vector<32x16xbf16>
    tpu.vector_store %arg12[%c64, %c0_38], %40 {strides = array<i32>} : memref<1264x32xbf16, #tpu.memory_space<vmem>>, vector<32x16xbf16>,
    %42 = vector.extract_strided_slice %31 {offsets = [32, 2], sizes = [32, 16], strides = [1, 1]} : vector<64x54xbf16> to vector<32x16xbf16>
    %c64_39 = arith.constant 64 : index
    %c16_40 = arith.constant 16 : index
    %43 = vector.load %arg12[%c64_39, %c16_40] : memref<1264x32xbf16, #tpu.memory_space<vmem>>, vector<32x16xbf16>
    tpu.vector_store %arg12[%c64_39, %c16_40], %42 {strides = array<i32>} : memref<1264x32xbf16, #tpu.memory_space<vmem>>, vector<32x16xbf16>,
    %44 = vector.extract_strided_slice %31 {offsets = [0, 3], sizes = [32, 16], strides = [1, 1]} : vector<64x54xbf16> to vector<32x16xbf16>
    %c96 = arith.constant 96 : index
    %c0_41 = arith.constant 0 : index
    %45 = vector.load %arg12[%c96, %c0_41] : memref<1264x32xbf16, #tpu.memory_space<vmem>>, vector<32x16xbf16>
    tpu.vector_store %arg12[%c96, %c0_41], %44 {strides = array<i32>} : memref<1264x32xbf16, #tpu.memory_space<vmem>>, vector<32x16xbf16>,
    %46 = vector.extract_strided_slice %31 {offsets = [32, 3], sizes = [32, 16], strides = [1, 1]} : vector<64x54xbf16> to vector<32x16xbf16>
    %c96_42 = arith.constant 96 : index
    %c16_43 = arith.constant 16 : index
    %47 = vector.load %arg12[%c96_42, %c16_43] : memref<1264x32xbf16, #tpu.memory_space<vmem>>, vector<32x16xbf16>
    tpu.vector_store %arg12[%c96_42, %c16_43], %46 {strides = array<i32>} : memref<1264x32xbf16, #tpu.memory_space<vmem>>, vector<32x16xbf16>,
    %48 = vector.extract_strided_slice %31 {offsets = [0, 4], sizes = [32, 16], strides = [1, 1]} : vector<64x54xbf16> to vector<32x16xbf16>
    %c128 = arith.constant 128 : index
    %c0_44 = arith.constant 0 : index
    %49 = vector.load %arg12[%c128, %c0_44] : memref<1264x32xbf16, #tpu.memory_space<vmem>>, vector<32x16xbf16>
    tpu.vector_store %arg12[%c128, %c0_44], %48 {strides = array<i32>} : memref<1264x32xbf16, #tpu.memory_space<vmem>>, vector<32x16xbf16>,
    %50 = vector.extract_strided_slice %31 {offsets = [32, 4], sizes = [32, 16], strides = [1, 1]} : vector<64x54xbf16> to vector<32x16xbf16>
    %c128_45 = arith.constant 128 : index
    %c16_46 = arith.constant 16 : index
    %51 = vector.load %arg12[%c128_45, %c16_46] : memref<1264x32xbf16, #tpu.memory_space<vmem>>, vector<32x16xbf16>
    tpu.vector_store %arg12[%c128_45, %c16_46], %50 {strides = array<i32>} : memref<1264x32xbf16, #tpu.memory_space<vmem>>, vector<32x16xbf16>,
    %52 = vector.extract_strided_slice %31 {offsets = [0, 5], sizes = [32, 16], strides = [1, 1]} : vector<64x54xbf16> to vector<32x16xbf16>
    %c160 = arith.constant 160 : index
    %c0_47 = arith.constant 0 : index
    %53 = vector.load %arg12[%c160, %c0_47] : memref<1264x32xbf16, #tpu.memory_space<vmem>>, vector<32x16xbf16>
    tpu.vector_store %arg12[%c160, %c0_47], %52 {strides = array<i32>} : memref<1264x32xbf16, #tpu.memory_space<vmem>>, vector<32x16xbf16>,
    %54 = vector.extract_strided_slice %31 {offsets = [32, 5], sizes = [32, 16], strides = [1, 1]} : vector<64x54xbf16> to vector<32x16xbf16>
    %c160_48 = arith.constant 160 : index
    %c16_49 = arith.constant 16 : index
    %55 = vector.load %arg12[%c160_48, %c16_49] : memref<1264x32xbf16, #tpu.memory_space<vmem>>, vector<32x16xbf16>
    tpu.vector_store %arg12[%c160_48, %c16_49], %54 {strides = array<i32>} : memref<1264x32xbf16, #tpu.memory_space<vmem>>, vector<32x16xbf16>,
    %56 = vector.extract_strided_slice %31 {offsets = [0, 6], sizes = [32, 16], strides = [1, 1]} : vector<64x54xbf16> to vector<32x16xbf16>
    %c192 = arith.constant 192 : index
    %c0_50 = arith.constant 0 : index
    %57 = vector.load %arg12[%c192, %c0_50] : memref<1264x32xbf16, #tpu.memory_space<vmem>>, vector<32x16xbf16>
    tpu.vector_store %arg12[%c192, %c0_50], %56 {strides = array<i32>} : memref<1264x32xbf16, #tpu.memory_space<vmem>>, vector<32x16xbf16>,
    %58 = vector.extract_strided_slice %31 {offsets = [32, 6], sizes = [32, 16], strides = [1, 1]} : vector<64x54xbf16> to vector<32x16xbf16>
    %c192_51 = arith.constant 192 : index
    %c16_52 = arith.constant 16 : index
    %59 = vector.load %arg12[%c192_51, %c16_52] : memref<1264x32xbf16, #tpu.memory_space<vmem>>, vector<32x16xbf16>
    tpu.vector_store %arg12[%c192_51, %c16_52], %58 {strides = array<i32>} : memref<1264x32xbf16, #tpu.memory_space<vmem>>, vector<32x16xbf16>,
    %60 = vector.extract_strided_slice %31 {offsets = [0, 7], sizes = [32, 16], strides = [1, 1]} : vector<64x54xbf16> to vector<32x16xbf16>
    %c224 = arith.constant 224 : index
    %c0_53 = arith.constant 0 : index
    %61 = vector.load %arg12[%c224, %c0_53] : memref<1264x32xbf16, #tpu.memory_space<vmem>>, vector<32x16xbf16>
    tpu.vector_store %arg12[%c224, %c0_53], %60 {strides = array<i32>} : memref<1264x32xbf16, #tpu.memory_space<vmem>>, vector<32x16xbf16>,
    %62 = vector.extract_strided_slice %31 {offsets = [32, 7], sizes = [32, 16], strides = [1, 1]} : vector<64x54xbf16> to vector<32x16xbf16>
    %c224_54 = arith.constant 224 : index
    %c16_55 = arith.constant 16 : index
    %63 = vector.load %arg12[%c224_54, %c16_55] : memref<1264x32xbf16, #tpu.memory_space<vmem>>, vector<32x16xbf16>
    tpu.vector_store %arg12[%c224_54, %c16_55], %62 {strides = array<i32>} : memref<1264x32xbf16, #tpu.memory_space<vmem>>, vector<32x16xbf16>,
    %64 = vector.extract_strided_slice %31 {offsets = [0, 8], sizes = [32, 16], strides = [1, 1]} : vector<64x54xbf16> to vector<32x16xbf16>
    %c256 = arith.constant 256 : index
    %c0_56 = arith.constant 0 : index
    %65 = vector.load %arg12[%c256, %c0_56] : memref<1264x32xbf16, #tpu.memory_space<vmem>>, vector<32x16xbf16>
    tpu.vector_store %arg12[%c256, %c0_56], %64 {strides = array<i32>} : memref<1264x32xbf16, #tpu.memory_space<vmem>>, vector<32x16xbf16>,
    %66 = vector.extract_strided_slice %31 {offsets = [32, 8], sizes = [32, 16], strides = [1, 1]} : vector<64x54xbf16> to vector<32x16xbf16>
    %c256_57 = arith.constant 256 : index
    %c16_58 = arith.constant 16 : index
    %67 = vector.load %arg12[%c256_57, %c16_58] : memref<1264x32xbf16, #tpu.memory_space<vmem>>, vector<32x16xbf16>
    tpu.vector_store %arg12[%c256_57, %c16_58], %66 {strides = array<i32>} : memref<1264x32xbf16, #tpu.memory_space<vmem>>, vector<32x16xbf16>,
    %68 = vector.extract_strided_slice %31 {offsets = [0, 9], sizes = [32, 16], strides = [1, 1]} : vector<64x54xbf16> to vector<32x16xbf16>
    %c288 = arith.constant 288 : index
    %c0_59 = arith.constant 0 : index
    %69 = vector.load %arg12[%c288, %c0_59] : memref<1264x32xbf16, #tpu.memory_space<vmem>>, vector<32x16xbf16>
    tpu.vector_store %arg12[%c288, %c0_59], %68 {strides = array<i32>} : memref<1264x32xbf16, #tpu.memory_space<vmem>>, vector<32x16xbf16>,
    %70 = vector.extract_strided_slice %31 {offsets = [32, 9], sizes = [32, 16], strides = [1, 1]} : vector<64x54xbf16> to vector<32x16xbf16>
    %c288_60 = arith.constant 288 : index
    %c16_61 = arith.constant 16 : index
    %71 = vector.load %arg12[%c288_60, %c16_61] : memref<1264x32xbf16, #tpu.memory_space<vmem>>, vector<32x16xbf16>
    tpu.vector_store %arg12[%c288_60, %c16_61], %70 {strides = array<i32>} : memref<1264x32xbf16, #tpu.memory_space<vmem>>, vector<32x16xbf16>,
    %72 = vector.extract_strided_slice %31 {offsets = [0, 10], sizes = [32, 16], strides = [1, 1]} : vector<64x54xbf16> to vector<32x16xbf16>
    %c320 = arith.constant 320 : index
    %c0_62 = arith.constant 0 : index
    %73 = vector.load %arg12[%c320, %c0_62] : memref<1264x32xbf16, #tpu.memory_space<vmem>>, vector<32x16xbf16>
    tpu.vector_store %arg12[%c320, %c0_62], %72 {strides = array<i32>} : memref<1264x32xbf16, #tpu.memory_space<vmem>>, vector<32x16xbf16>,
    %74 = vector.extract_strided_slice %31 {offsets = [32, 10], sizes = [32, 16], strides = [1, 1]} : vector<64x54xbf16> to vector<32x16xbf16>
    %c320_63 = arith.constant 320 : index
    %c16_64 = arith.constant 16 : index
    %75 = vector.load %arg12[%c320_63, %c16_64] : memref<1264x32xbf16, #tpu.memory_space<vmem>>, vector<32x16xbf16>
    tpu.vector_store %arg12[%c320_63, %c16_64], %74 {strides = array<i32>} : memref<1264x32xbf16, #tpu.memory_space<vmem>>, vector<32x16xbf16>,
    %76 = vector.extract_strided_slice %31 {offsets = [0, 11], sizes = [32, 16], strides = [1, 1]} : vector<64x54xbf16> to vector<32x16xbf16>
    %c352 = arith.constant 352 : index
    %c0_65 = arith.constant 0 : index
    %77 = vector.load %arg12[%c352, %c0_65] : memref<1264x32xbf16, #tpu.memory_space<vmem>>, vector<32x16xbf16>
    tpu.vector_store %arg12[%c352, %c0_65], %76 {strides = array<i32>} : memref<1264x32xbf16, #tpu.memory_space<vmem>>, vector<32x16xbf16>,
    %78 = vector.extract_strided_slice %31 {offsets = [32, 11], sizes = [32, 16], strides = [1, 1]} : vector<64x54xbf16> to vector<32x16xbf16>
    %c352_66 = arith.constant 352 : index
    %c16_67 = arith.constant 16 : index
    %79 = vector.load %arg12[%c352_66, %c16_67] : memref<1264x32xbf16, #tpu.memory_space<vmem>>, vector<32x16xbf16>
    tpu.vector_store %arg12[%c352_66, %c16_67], %78 {strides = array<i32>} : memref<1264x32xbf16, #tpu.memory_space<vmem>>, vector<32x16xbf16>,
    %80 = vector.extract_strided_slice %31 {offsets = [0, 12], sizes = [32, 16], strides = [1, 1]} : vector<64x54xbf16> to vector<32x16xbf16>
    %c384 = arith.constant 384 : index
    %c0_68 = arith.constant 0 : index
    %81 = vector.load %arg12[%c384, %c0_68] : memref<1264x32xbf16, #tpu.memory_space<vmem>>, vector<32x16xbf16>
    tpu.vector_store %arg12[%c384, %c0_68], %80 {strides = array<i32>} : memref<1264x32xbf16, #tpu.memory_space<vmem>>, vector<32x16xbf16>,
    %82 = vector.extract_strided_slice %31 {offsets = [32, 12], sizes = [32, 16], strides = [1, 1]} : vector<64x54xbf16> to vector<32x16xbf16>
    %c384_69 = arith.constant 384 : index
    %c16_70 = arith.constant 16 : index
    %83 = vector.load %arg12[%c384_69, %c16_70] : memref<1264x32xbf16, #tpu.memory_space<vmem>>, vector<32x16xbf16>
    tpu.vector_store %arg12[%c384_69, %c16_70], %82 {strides = array<i32>} : memref<1264x32xbf16, #tpu.memory_space<vmem>>, vector<32x16xbf16>,
    %84 = vector.extract_strided_slice %31 {offsets = [0, 13], sizes = [32, 16], strides = [1, 1]} : vector<64x54xbf16> to vector<32x16xbf16>
    %c416 = arith.constant 416 : index
    %c0_71 = arith.constant 0 : index
    %85 = vector.load %arg12[%c416, %c0_71] : memref<1264x32xbf16, #tpu.memory_space<vmem>>, vector<32x16xbf16>
    tpu.vector_store %arg12[%c416, %c0_71], %84 {strides = array<i32>} : memref<1264x32xbf16, #tpu.memory_space<vmem>>, vector<32x16xbf16>,
    %86 = vector.extract_strided_slice %31 {offsets = [32, 13], sizes = [32, 16], strides = [1, 1]} : vector<64x54xbf16> to vector<32x16xbf16>
    %c416_72 = arith.constant 416 : index
    %c16_73 = arith.constant 16 : index
    %87 = vector.load %arg12[%c416_72, %c16_73] : memref<1264x32xbf16, #tpu.memory_space<vmem>>, vector<32x16xbf16>
    tpu.vector_store %arg12[%c416_72, %c16_73], %86 {strides = array<i32>} : memref<1264x32xbf16, #tpu.memory_space<vmem>>, vector<32x16xbf16>,
    %88 = vector.extract_strided_slice %31 {offsets = [0, 14], sizes = [32, 16], strides = [1, 1]} : vector<64x54xbf16> to vector<32x16xbf16>
    %c448 = arith.constant 448 : index
    %c0_74 = arith.constant 0 : index
    %89 = vector.load %arg12[%c448, %c0_74] : memref<1264x32xbf16, #tpu.memory_space<vmem>>, vector<32x16xbf16>
    tpu.vector_store %arg12[%c448, %c0_74], %88 {strides = array<i32>} : memref<1264x32xbf16, #tpu.memory_space<vmem>>, vector<32x16xbf16>,
    %90 = vector.extract_strided_slice %31 {offsets = [32, 14], sizes = [32, 16], strides = [1, 1]} : vector<64x54xbf16> to vector<32x16xbf16>
    %c448_75 = arith.constant 448 : index
    %c16_76 = arith.constant 16 : index
    %91 = vector.load %arg12[%c448_75, %c16_76] : memref<1264x32xbf16, #tpu.memory_space<vmem>>, vector<32x16xbf16>
    tpu.vector_store %arg12[%c448_75, %c16_76], %90 {strides = array<i32>} : memref<1264x32xbf16, #tpu.memory_space<vmem>>, vector<32x16xbf16>,
    %92 = vector.extract_strided_slice %31 {offsets = [0, 15], sizes = [32, 16], strides = [1, 1]} : vector<64x54xbf16> to vector<32x16xbf16>
    %c480 = arith.constant 480 : index
    %c0_77 = arith.constant 0 : index
    %93 = vector.load %arg12[%c480, %c0_77] : memref<1264x32xbf16, #tpu.memory_space<vmem>>, vector<32x16xbf16>
    tpu.vector_store %arg12[%c480, %c0_77], %92 {strides = array<i32>} : memref<1264x32xbf16, #tpu.memory_space<vmem>>, vector<32x16xbf16>,
    %94 = vector.extract_strided_slice %31 {offsets = [32, 15], sizes = [32, 16], strides = [1, 1]} : vector<64x54xbf16> to vector<32x16xbf16>
    %c480_78 = arith.constant 480 : index
    %c16_79 = arith.constant 16 : index
    %95 = vector.load %arg12[%c480_78, %c16_79] : memref<1264x32xbf16, #tpu.memory_space<vmem>>, vector<32x16xbf16>
    tpu.vector_store %arg12[%c480_78, %c16_79], %94 {strides = array<i32>} : memref<1264x32xbf16, #tpu.memory_space<vmem>>, vector<32x16xbf16>,
    %96 = vector.extract_strided_slice %31 {offsets = [0, 16], sizes = [32, 16], strides = [1, 1]} : vector<64x54xbf16> to vector<32x16xbf16>
    %c512 = arith.constant 512 : index
    %c0_80 = arith.constant 0 : index
    %97 = vector.load %arg12[%c512, %c0_80] : memref<1264x32xbf16, #tpu.memory_space<vmem>>, vector<32x16xbf16>
    tpu.vector_store %arg12[%c512, %c0_80], %96 {strides = array<i32>} : memref<1264x32xbf16, #tpu.memory_space<vmem>>, vector<32x16xbf16>,
    %98 = vector.extract_strided_slice %31 {offsets = [32, 16], sizes = [32, 16], strides = [1, 1]} : vector<64x54xbf16> to vector<32x16xbf16>
    %c512_81 = arith.constant 512 : index
    %c16_82 = arith.constant 16 : index
    %99 = vector.load %arg12[%c512_81, %c16_82] : memref<1264x32xbf16, #tpu.memory_space<vmem>>, vector<32x16xbf16>
    tpu.vector_store %arg12[%c512_81, %c16_82], %98 {strides = array<i32>} : memref<1264x32xbf16, #tpu.memory_space<vmem>>, vector<32x16xbf16>,
    %100 = vector.extract_strided_slice %31 {offsets = [0, 17], sizes = [32, 16], strides = [1, 1]} : vector<64x54xbf16> to vector<32x16xbf16>
    %c544 = arith.constant 544 : index
    %c0_83 = arith.constant 0 : index
    %101 = vector.load %arg12[%c544, %c0_83] : memref<1264x32xbf16, #tpu.memory_space<vmem>>, vector<32x16xbf16>
    tpu.vector_store %arg12[%c544, %c0_83], %100 {strides = array<i32>} : memref<1264x32xbf16, #tpu.memory_space<vmem>>, vector<32x16xbf16>,
    %102 = vector.extract_strided_slice %31 {offsets = [32, 17], sizes = [32, 16], strides = [1, 1]} : vector<64x54xbf16> to vector<32x16xbf16>
    %c544_84 = arith.constant 544 : index
    %c16_85 = arith.constant 16 : index
    %103 = vector.load %arg12[%c544_84, %c16_85] : memref<1264x32xbf16, #tpu.memory_space<vmem>>, vector<32x16xbf16>
    tpu.vector_store %arg12[%c544_84, %c16_85], %102 {strides = array<i32>} : memref<1264x32xbf16, #tpu.memory_space<vmem>>, vector<32x16xbf16>,
    %104 = vector.extract_strided_slice %31 {offsets = [0, 18], sizes = [32, 16], strides = [1, 1]} : vector<64x54xbf16> to vector<32x16xbf16>
    %c576 = arith.constant 576 : index
    %c0_86 = arith.constant 0 : index
    %105 = vector.load %arg12[%c576, %c0_86] : memref<1264x32xbf16, #tpu.memory_space<vmem>>, vector<32x16xbf16>
    tpu.vector_store %arg12[%c576, %c0_86], %104 {strides = array<i32>} : memref<1264x32xbf16, #tpu.memory_space<vmem>>, vector<32x16xbf16>,
    %106 = vector.extract_strided_slice %31 {offsets = [32, 18], sizes = [32, 16], strides = [1, 1]} : vector<64x54xbf16> to vector<32x16xbf16>
    %c576_87 = arith.constant 576 : index
    %c16_88 = arith.constant 16 : index
    %107 = vector.load %arg12[%c576_87, %c16_88] : memref<1264x32xbf16, #tpu.memory_space<vmem>>, vector<32x16xbf16>
    tpu.vector_store %arg12[%c576_87, %c16_88], %106 {strides = array<i32>} : memref<1264x32xbf16, #tpu.memory_space<vmem>>, vector<32x16xbf16>,
    %108 = vector.extract_strided_slice %31 {offsets = [0, 19], sizes = [32, 16], strides = [1, 1]} : vector<64x54xbf16> to vector<32x16xbf16>
    %c608 = arith.constant 608 : index
    %c0_89 = arith.constant 0 : index
    %109 = vector.load %arg12[%c608, %c0_89] : memref<1264x32xbf16, #tpu.memory_space<vmem>>, vector<32x16xbf16>
    tpu.vector_store %arg12[%c608, %c0_89], %108 {strides = array<i32>} : memref<1264x32xbf16, #tpu.memory_space<vmem>>, vector<32x16xbf16>,
    %110 = vector.extract_strided_slice %31 {offsets = [32, 19], sizes = [32, 16], strides = [1, 1]} : vector<64x54xbf16> to vector<32x16xbf16>
    %c608_90 = arith.constant 608 : index
    %c16_91 = arith.constant 16 : index
    %111 = vector.load %arg12[%c608_90, %c16_91] : memref<1264x32xbf16, #tpu.memory_space<vmem>>, vector<32x16xbf16>
    tpu.vector_store %arg12[%c608_90, %c16_91], %110 {strides = array<i32>} : memref<1264x32xbf16, #tpu.memory_space<vmem>>, vector<32x16xbf16>,
    %112 = vector.extract_strided_slice %31 {offsets = [0, 20], sizes = [32, 16], strides = [1, 1]} : vector<64x54xbf16> to vector<32x16xbf16>
    %c640 = arith.constant 640 : index
    %c0_92 = arith.constant 0 : index
    %113 = vector.load %arg12[%c640, %c0_92] : memref<1264x32xbf16, #tpu.memory_space<vmem>>, vector<32x16xbf16>
    tpu.vector_store %arg12[%c640, %c0_92], %112 {strides = array<i32>} : memref<1264x32xbf16, #tpu.memory_space<vmem>>, vector<32x16xbf16>,
    %114 = vector.extract_strided_slice %31 {offsets = [32, 20], sizes = [32, 16], strides = [1, 1]} : vector<64x54xbf16> to vector<32x16xbf16>
    %c640_93 = arith.constant 640 : index
    %c16_94 = arith.constant 16 : index
    %115 = vector.load %arg12[%c640_93, %c16_94] : memref<1264x32xbf16, #tpu.memory_space<vmem>>, vector<32x16xbf16>
    tpu.vector_store %arg12[%c640_93, %c16_94], %114 {strides = array<i32>} : memref<1264x32xbf16, #tpu.memory_space<vmem>>, vector<32x16xbf16>,
    %116 = vector.extract_strided_slice %31 {offsets = [0, 21], sizes = [32, 16], strides = [1, 1]} : vector<64x54xbf16> to vector<32x16xbf16>
    %c672 = arith.constant 672 : index
    %c0_95 = arith.constant 0 : index
    %117 = vector.load %arg12[%c672, %c0_95] : memref<1264x32xbf16, #tpu.memory_space<vmem>>, vector<32x16xbf16>
    tpu.vector_store %arg12[%c672, %c0_95], %116 {strides = array<i32>} : memref<1264x32xbf16, #tpu.memory_space<vmem>>, vector<32x16xbf16>,
    %118 = vector.extract_strided_slice %31 {offsets = [32, 21], sizes = [32, 16], strides = [1, 1]} : vector<64x54xbf16> to vector<32x16xbf16>
    %c672_96 = arith.constant 672 : index
    %c16_97 = arith.constant 16 : index
    %119 = vector.load %arg12[%c672_96, %c16_97] : memref<1264x32xbf16, #tpu.memory_space<vmem>>, vector<32x16xbf16>
    tpu.vector_store %arg12[%c672_96, %c16_97], %118 {strides = array<i32>} : memref<1264x32xbf16, #tpu.memory_space<vmem>>, vector<32x16xbf16>,
    %120 = vector.extract_strided_slice %31 {offsets = [0, 22], sizes = [32, 16], strides = [1, 1]} : vector<64x54xbf16> to vector<32x16xbf16>
    %c704 = arith.constant 704 : index
    %c0_98 = arith.constant 0 : index
    %121 = vector.load %arg12[%c704, %c0_98] : memref<1264x32xbf16, #tpu.memory_space<vmem>>, vector<32x16xbf16>
    tpu.vector_store %arg12[%c704, %c0_98], %120 {strides = array<i32>} : memref<1264x32xbf16, #tpu.memory_space<vmem>>, vector<32x16xbf16>,
    %122 = vector.extract_strided_slice %31 {offsets = [32, 22], sizes = [32, 16], strides = [1, 1]} : vector<64x54xbf16> to vector<32x16xbf16>
    %c704_99 = arith.constant 704 : index
    %c16_100 = arith.constant 16 : index
    %123 = vector.load %arg12[%c704_99, %c16_100] : memref<1264x32xbf16, #tpu.memory_space<vmem>>, vector<32x16xbf16>
    tpu.vector_store %arg12[%c704_99, %c16_100], %122 {strides = array<i32>} : memref<1264x32xbf16, #tpu.memory_space<vmem>>, vector<32x16xbf16>,
    %124 = vector.extract_strided_slice %31 {offsets = [0, 23], sizes = [32, 16], strides = [1, 1]} : vector<64x54xbf16> to vector<32x16xbf16>
    %c736 = arith.constant 736 : index
    %c0_101 = arith.constant 0 : index
    %125 = vector.load %arg12[%c736, %c0_101] : memref<1264x32xbf16, #tpu.memory_space<vmem>>, vector<32x16xbf16>
    tpu.vector_store %arg12[%c736, %c0_101], %124 {strides = array<i32>} : memref<1264x32xbf16, #tpu.memory_space<vmem>>, vector<32x16xbf16>,
    %126 = vector.extract_strided_slice %31 {offsets = [32, 23], sizes = [32, 16], strides = [1, 1]} : vector<64x54xbf16> to vector<32x16xbf16>
    %c736_102 = arith.constant 736 : index
    %c16_103 = arith.constant 16 : index
    %127 = vector.load %arg12[%c736_102, %c16_103] : memref<1264x32xbf16, #tpu.memory_space<vmem>>, vector<32x16xbf16>
    tpu.vector_store %arg12[%c736_102, %c16_103], %126 {strides = array<i32>} : memref<1264x32xbf16, #tpu.memory_space<vmem>>, vector<32x16xbf16>,
    %128 = vector.extract_strided_slice %31 {offsets = [0, 24], sizes = [32, 16], strides = [1, 1]} : vector<64x54xbf16> to vector<32x16xbf16>
    %c768 = arith.constant 768 : index
    %c0_104 = arith.constant 0 : index
    %129 = vector.load %arg12[%c768, %c0_104] : memref<1264x32xbf16, #tpu.memory_space<vmem>>, vector<32x16xbf16>
    tpu.vector_store %arg12[%c768, %c0_104], %128 {strides = array<i32>} : memref<1264x32xbf16, #tpu.memory_space<vmem>>, vector<32x16xbf16>,
    %130 = vector.extract_strided_slice %31 {offsets = [32, 24], sizes = [32, 16], strides = [1, 1]} : vector<64x54xbf16> to vector<32x16xbf16>
    %c768_105 = arith.constant 768 : index
    %c16_106 = arith.constant 16 : index
    %131 = vector.load %arg12[%c768_105, %c16_106] : memref<1264x32xbf16, #tpu.memory_space<vmem>>, vector<32x16xbf16>
    tpu.vector_store %arg12[%c768_105, %c16_106], %130 {strides = array<i32>} : memref<1264x32xbf16, #tpu.memory_space<vmem>>, vector<32x16xbf16>,
    %132 = vector.extract_strided_slice %31 {offsets = [0, 25], sizes = [32, 16], strides = [1, 1]} : vector<64x54xbf16> to vector<32x16xbf16>
    %c800 = arith.constant 800 : index
    %c0_107 = arith.constant 0 : index
    %133 = vector.load %arg12[%c800, %c0_107] : memref<1264x32xbf16, #tpu.memory_space<vmem>>, vector<32x16xbf16>
    tpu.vector_store %arg12[%c800, %c0_107], %132 {strides = array<i32>} : memref<1264x32xbf16, #tpu.memory_space<vmem>>, vector<32x16xbf16>,
    %134 = vector.extract_strided_slice %31 {offsets = [32, 25], sizes = [32, 16], strides = [1, 1]} : vector<64x54xbf16> to vector<32x16xbf16>
    %c800_108 = arith.constant 800 : index
    %c16_109 = arith.constant 16 : index
    %135 = vector.load %arg12[%c800_108, %c16_109] : memref<1264x32xbf16, #tpu.memory_space<vmem>>, vector<32x16xbf16>
    tpu.vector_store %arg12[%c800_108, %c16_109], %134 {strides = array<i32>} : memref<1264x32xbf16, #tpu.memory_space<vmem>>, vector<32x16xbf16>,
    %136 = vector.extract_strided_slice %31 {offsets = [0, 26], sizes = [32, 16], strides = [1, 1]} : vector<64x54xbf16> to vector<32x16xbf16>
    %c832 = arith.constant 832 : index
    %c0_110 = arith.constant 0 : index
    %137 = vector.load %arg12[%c832, %c0_110] : memref<1264x32xbf16, #tpu.memory_space<vmem>>, vector<32x16xbf16>
    tpu.vector_store %arg12[%c832, %c0_110], %136 {strides = array<i32>} : memref<1264x32xbf16, #tpu.memory_space<vmem>>, vector<32x16xbf16>,
    %138 = vector.extract_strided_slice %31 {offsets = [32, 26], sizes = [32, 16], strides = [1, 1]} : vector<64x54xbf16> to vector<32x16xbf16>
    %c832_111 = arith.constant 832 : index
    %c16_112 = arith.constant 16 : index
    %139 = vector.load %arg12[%c832_111, %c16_112] : memref<1264x32xbf16, #tpu.memory_space<vmem>>, vector<32x16xbf16>
    tpu.vector_store %arg12[%c832_111, %c16_112], %138 {strides = array<i32>} : memref<1264x32xbf16, #tpu.memory_space<vmem>>, vector<32x16xbf16>,
    %140 = vector.extract_strided_slice %31 {offsets = [0, 27], sizes = [32, 16], strides = [1, 1]} : vector<64x54xbf16> to vector<32x16xbf16>
    %c864 = arith.constant 864 : index
    %c0_113 = arith.constant 0 : index
    %141 = vector.load %arg12[%c864, %c0_113] : memref<1264x32xbf16, #tpu.memory_space<vmem>>, vector<32x16xbf16>
    tpu.vector_store %arg12[%c864, %c0_113], %140 {strides = array<i32>} : memref<1264x32xbf16, #tpu.memory_space<vmem>>, vector<32x16xbf16>,
    %142 = vector.extract_strided_slice %31 {offsets = [32, 27], sizes = [32, 16], strides = [1, 1]} : vector<64x54xbf16> to vector<32x16xbf16>
    %c864_114 = arith.constant 864 : index
    %c16_115 = arith.constant 16 : index
    %143 = vector.load %arg12[%c864_114, %c16_115] : memref<1264x32xbf16, #tpu.memory_space<vmem>>, vector<32x16xbf16>
    tpu.vector_store %arg12[%c864_114, %c16_115], %142 {strides = array<i32>} : memref<1264x32xbf16, #tpu.memory_space<vmem>>, vector<32x16xbf16>,
    %144 = vector.extract_strided_slice %31 {offsets = [0, 28], sizes = [32, 16], strides = [1, 1]} : vector<64x54xbf16> to vector<32x16xbf16>
    %c896 = arith.constant 896 : index
    %c0_116 = arith.constant 0 : index
    %145 = vector.load %arg12[%c896, %c0_116] : memref<1264x32xbf16, #tpu.memory_space<vmem>>, vector<32x16xbf16>
    tpu.vector_store %arg12[%c896, %c0_116], %144 {strides = array<i32>} : memref<1264x32xbf16, #tpu.memory_space<vmem>>, vector<32x16xbf16>,
    %146 = vector.extract_strided_slice %31 {offsets = [32, 28], sizes = [32, 16], strides = [1, 1]} : vector<64x54xbf16> to vector<32x16xbf16>
    %c896_117 = arith.constant 896 : index
    %c16_118 = arith.constant 16 : index
    %147 = vector.load %arg12[%c896_117, %c16_118] : memref<1264x32xbf16, #tpu.memory_space<vmem>>, vector<32x16xbf16>
    tpu.vector_store %arg12[%c896_117, %c16_118], %146 {strides = array<i32>} : memref<1264x32xbf16, #tpu.memory_space<vmem>>, vector<32x16xbf16>,
    %148 = vector.extract_strided_slice %31 {offsets = [0, 29], sizes = [32, 16], strides = [1, 1]} : vector<64x54xbf16> to vector<32x16xbf16>
    %c928 = arith.constant 928 : index
    %c0_119 = arith.constant 0 : index
    %149 = vector.load %arg12[%c928, %c0_119] : memref<1264x32xbf16, #tpu.memory_space<vmem>>, vector<32x16xbf16>
    tpu.vector_store %arg12[%c928, %c0_119], %148 {strides = array<i32>} : memref<1264x32xbf16, #tpu.memory_space<vmem>>, vector<32x16xbf16>,
    %150 = vector.extract_strided_slice %31 {offsets = [32, 29], sizes = [32, 16], strides = [1, 1]} : vector<64x54xbf16> to vector<32x16xbf16>
    %c928_120 = arith.constant 928 : index
    %c16_121 = arith.constant 16 : index
    %151 = vector.load %arg12[%c928_120, %c16_121] : memref<1264x32xbf16, #tpu.memory_space<vmem>>, vector<32x16xbf16>
    tpu.vector_store %arg12[%c928_120, %c16_121], %150 {strides = array<i32>} : memref<1264x32xbf16, #tpu.memory_space<vmem>>, vector<32x16xbf16>,
    %152 = vector.extract_strided_slice %31 {offsets = [0, 30], sizes = [32, 16], strides = [1, 1]} : vector<64x54xbf16> to vector<32x16xbf16>
    %c960 = arith.constant 960 : index
    %c0_122 = arith.constant 0 : index
    %153 = vector.load %arg12[%c960, %c0_122] : memref<1264x32xbf16, #tpu.memory_space<vmem>>, vector<32x16xbf16>
    tpu.vector_store %arg12[%c960, %c0_122], %152 {strides = array<i32>} : memref<1264x32xbf16, #tpu.memory_space<vmem>>, vector<32x16xbf16>,
    %154 = vector.extract_strided_slice %31 {offsets = [32, 30], sizes = [32, 16], strides = [1, 1]} : vector<64x54xbf16> to vector<32x16xbf16>
    %c960_123 = arith.constant 960 : index
    %c16_124 = arith.constant 16 : index
    %155 = vector.load %arg12[%c960_123, %c16_124] : memref<1264x32xbf16, #tpu.memory_space<vmem>>, vector<32x16xbf16>
    tpu.vector_store %arg12[%c960_123, %c16_124], %154 {strides = array<i32>} : memref<1264x32xbf16, #tpu.memory_space<vmem>>, vector<32x16xbf16>,
    %156 = vector.extract_strided_slice %31 {offsets = [0, 31], sizes = [32, 16], strides = [1, 1]} : vector<64x54xbf16> to vector<32x16xbf16>
    %c992 = arith.constant 992 : index
    %c0_125 = arith.constant 0 : index
    %157 = vector.load %arg12[%c992, %c0_125] : memref<1264x32xbf16, #tpu.memory_space<vmem>>, vector<32x16xbf16>
    tpu.vector_store %arg12[%c992, %c0_125], %156 {strides = array<i32>} : memref<1264x32xbf16, #tpu.memory_space<vmem>>, vector<32x16xbf16>,
    %158 = vector.extract_strided_slice %31 {offsets = [32, 31], sizes = [32, 16], strides = [1, 1]} : vector<64x54xbf16> to vector<32x16xbf16>
    %c992_126 = arith.constant 992 : index
    %c16_127 = arith.constant 16 : index
    %159 = vector.load %arg12[%c992_126, %c16_127] : memref<1264x32xbf16, #tpu.memory_space<vmem>>, vector<32x16xbf16>
    tpu.vector_store %arg12[%c992_126, %c16_127], %158 {strides = array<i32>} : memref<1264x32xbf16, #tpu.memory_space<vmem>>, vector<32x16xbf16>,
    %160 = vector.extract_strided_slice %31 {offsets = [0, 32], sizes = [32, 16], strides = [1, 1]} : vector<64x54xbf16> to vector<32x16xbf16>
    %c1024 = arith.constant 1024 : index
    %c0_128 = arith.constant 0 : index
    %161 = vector.load %arg12[%c1024, %c0_128] : memref<1264x32xbf16, #tpu.memory_space<vmem>>, vector<32x16xbf16>
    tpu.vector_store %arg12[%c1024, %c0_128], %160 {strides = array<i32>} : memref<1264x32xbf16, #tpu.memory_space<vmem>>, vector<32x16xbf16>,
    %162 = vector.extract_strided_slice %31 {offsets = [32, 32], sizes = [32, 16], strides = [1, 1]} : vector<64x54xbf16> to vector<32x16xbf16>
    %c1024_129 = arith.constant 1024 : index
    %c16_130 = arith.constant 16 : index
    %163 = vector.load %arg12[%c1024_129, %c16_130] : memref<1264x32xbf16, #tpu.memory_space<vmem>>, vector<32x16xbf16>
    tpu.vector_store %arg12[%c1024_129, %c16_130], %162 {strides = array<i32>} : memref<1264x32xbf16, #tpu.memory_space<vmem>>, vector<32x16xbf16>,
    %164 = vector.extract_strided_slice %31 {offsets = [0, 33], sizes = [32, 16], strides = [1, 1]} : vector<64x54xbf16> to vector<32x16xbf16>
    %c1056 = arith.constant 1056 : index
    %c0_131 = arith.constant 0 : index
    %165 = vector.load %arg12[%c1056, %c0_131] : memref<1264x32xbf16, #tpu.memory_space<vmem>>, vector<32x16xbf16>
    tpu.vector_store %arg12[%c1056, %c0_131], %164 {strides = array<i32>} : memref<1264x32xbf16, #tpu.memory_space<vmem>>, vector<32x16xbf16>,
    %166 = vector.extract_strided_slice %31 {offsets = [32, 33], sizes = [32, 16], strides = [1, 1]} : vector<64x54xbf16> to vector<32x16xbf16>
    %c1056_132 = arith.constant 1056 : index
    %c16_133 = arith.constant 16 : index
    %167 = vector.load %arg12[%c1056_132, %c16_133] : memref<1264x32xbf16, #tpu.memory_space<vmem>>, vector<32x16xbf16>
    tpu.vector_store %arg12[%c1056_132, %c16_133], %166 {strides = array<i32>} : memref<1264x32xbf16, #tpu.memory_space<vmem>>, vector<32x16xbf16>,
    %168 = vector.extract_strided_slice %31 {offsets = [0, 34], sizes = [32, 16], strides = [1, 1]} : vector<64x54xbf16> to vector<32x16xbf16>
    %c1088 = arith.constant 1088 : index
    %c0_134 = arith.constant 0 : index
    %169 = vector.load %arg12[%c1088, %c0_134] : memref<1264x32xbf16, #tpu.memory_space<vmem>>, vector<32x16xbf16>
    tpu.vector_store %arg12[%c1088, %c0_134], %168 {strides = array<i32>} : memref<1264x32xbf16, #tpu.memory_space<vmem>>, vector<32x16xbf16>,
    %170 = vector.extract_strided_slice %31 {offsets = [32, 34], sizes = [32, 16], strides = [1, 1]} : vector<64x54xbf16> to vector<32x16xbf16>
    %c1088_135 = arith.constant 1088 : index
    %c16_136 = arith.constant 16 : index
    %171 = vector.load %arg12[%c1088_135, %c16_136] : memref<1264x32xbf16, #tpu.memory_space<vmem>>, vector<32x16xbf16>
    tpu.vector_store %arg12[%c1088_135, %c16_136], %170 {strides = array<i32>} : memref<1264x32xbf16, #tpu.memory_space<vmem>>, vector<32x16xbf16>,
    %172 = vector.extract_strided_slice %31 {offsets = [0, 35], sizes = [32, 16], strides = [1, 1]} : vector<64x54xbf16> to vector<32x16xbf16>
    %c1120 = arith.constant 1120 : index
    %c0_137 = arith.constant 0 : index
    %173 = vector.load %arg12[%c1120, %c0_137] : memref<1264x32xbf16, #tpu.memory_space<vmem>>, vector<32x16xbf16>
    tpu.vector_store %arg12[%c1120, %c0_137], %172 {strides = array<i32>} : memref<1264x32xbf16, #tpu.memory_space<vmem>>, vector<32x16xbf16>,
    %174 = vector.extract_strided_slice %31 {offsets = [32, 35], sizes = [32, 16], strides = [1, 1]} : vector<64x54xbf16> to vector<32x16xbf16>
    %c1120_138 = arith.constant 1120 : index
    %c16_139 = arith.constant 16 : index
    %175 = vector.load %arg12[%c1120_138, %c16_139] : memref<1264x32xbf16, #tpu.memory_space<vmem>>, vector<32x16xbf16>
    tpu.vector_store %arg12[%c1120_138, %c16_139], %174 {strides = array<i32>} : memref<1264x32xbf16, #tpu.memory_space<vmem>>, vector<32x16xbf16>,
    %176 = vector.extract_strided_slice %31 {offsets = [0, 36], sizes = [32, 16], strides = [1, 1]} : vector<64x54xbf16> to vector<32x16xbf16>
    %c1152 = arith.constant 1152 : index
    %c0_140 = arith.constant 0 : index
    %177 = vector.load %arg12[%c1152, %c0_140] : memref<1264x32xbf16, #tpu.memory_space<vmem>>, vector<32x16xbf16>
    tpu.vector_store %arg12[%c1152, %c0_140], %176 {strides = array<i32>} : memref<1264x32xbf16, #tpu.memory_space<vmem>>, vector<32x16xbf16>,
    %178 = vector.extract_strided_slice %31 {offsets = [32, 36], sizes = [32, 16], strides = [1, 1]} : vector<64x54xbf16> to vector<32x16xbf16>
    %c1152_141 = arith.constant 1152 : index
    %c16_142 = arith.constant 16 : index
    %179 = vector.load %arg12[%c1152_141, %c16_142] : memref<1264x32xbf16, #tpu.memory_space<vmem>>, vector<32x16xbf16>
    tpu.vector_store %arg12[%c1152_141, %c16_142], %178 {strides = array<i32>} : memref<1264x32xbf16, #tpu.memory_space<vmem>>, vector<32x16xbf16>,
    %180 = vector.extract_strided_slice %31 {offsets = [0, 37], sizes = [32, 16], strides = [1, 1]} : vector<64x54xbf16> to vector<32x16xbf16>
    %c1184 = arith.constant 1184 : index
    %c0_143 = arith.constant 0 : index
    %181 = vector.load %arg12[%c1184, %c0_143] : memref<1264x32xbf16, #tpu.memory_space<vmem>>, vector<32x16xbf16>
    tpu.vector_store %arg12[%c1184, %c0_143], %180 {strides = array<i32>} : memref<1264x32xbf16, #tpu.memory_space<vmem>>, vector<32x16xbf16>,
    %182 = vector.extract_strided_slice %31 {offsets = [32, 37], sizes = [32, 16], strides = [1, 1]} : vector<64x54xbf16> to vector<32x16xbf16>
    %c1184_144 = arith.constant 1184 : index
    %c16_145 = arith.constant 16 : index
    %183 = vector.load %arg12[%c1184_144, %c16_145] : memref<1264x32xbf16, #tpu.memory_space<vmem>>, vector<32x16xbf16>
    tpu.vector_store %arg12[%c1184_144, %c16_145], %182 {strides = array<i32>} : memref<1264x32xbf16, #tpu.memory_space<vmem>>, vector<32x16xbf16>,
    %184 = vector.extract_strided_slice %31 {offsets = [0, 38], sizes = [32, 16], strides = [1, 1]} : vector<64x54xbf16> to vector<32x16xbf16>
    %c1216 = arith.constant 1216 : index
    %c0_146 = arith.constant 0 : index
    %185 = vector.load %arg12[%c1216, %c0_146] : memref<1264x32xbf16, #tpu.memory_space<vmem>>, vector<32x16xbf16>
    tpu.vector_store %arg12[%c1216, %c0_146], %184 {strides = array<i32>} : memref<1264x32xbf16, #tpu.memory_space<vmem>>, vector<32x16xbf16>,
    %186 = vector.extract_strided_slice %31 {offsets = [32, 38], sizes = [32, 16], strides = [1, 1]} : vector<64x54xbf16> to vector<32x16xbf16>
    %c1216_147 = arith.constant 1216 : index
    %c16_148 = arith.constant 16 : index
    %187 = vector.load %arg12[%c1216_147, %c16_148] : memref<1264x32xbf16, #tpu.memory_space<vmem>>, vector<32x16xbf16>
    tpu.vector_store %arg12[%c1216_147, %c16_148], %186 {strides = array<i32>} : memref<1264x32xbf16, #tpu.memory_space<vmem>>, vector<32x16xbf16>,
    %c0_149 = arith.constant 0 : index
    %c0_150 = arith.constant 0 : index
    %188 = vector.load %arg11[%c0_149, %c0_150] : memref<8x18xf32, #tpu.memory_space<vmem>>, vector<8x18xf32>
    %189 = vector.extract_strided_slice %188 {offsets = [0, 0], sizes = [8, 16], strides = [1, 1]} : vector<8x18xf32> to vector<8x16xf32>
    %190 = vector.extract_strided_slice %188 {offsets = [0, 1], sizes = [8, 16], strides = [1, 1]} : vector<8x18xf32> to vector<8x16xf32>
    %191 = arith.maximumf %189, %190 : vector<8x16xf32>
    %192 = vector.extract_strided_slice %188 {offsets = [0, 2], sizes = [8, 16], strides = [1, 1]} : vector<8x18xf32> to vector<8x16xf32>
    %193 = arith.maximumf %191, %192 : vector<8x16xf32>
    %194 = vector.extract_strided_slice %193 {offsets = [0, 0], sizes = [4, 16], strides = [1, 1]} : vector<8x16xf32> to vector<4x16xf32>
    %195 = arith.truncf %194 : vector<4x16xf32> to vector<4x16xbf16>
    %c1248 = arith.constant 1248 : index
    %c0_151 = arith.constant 0 : index
    %196 = vector.load %arg12[%c1248, %c0_151] : memref<1264x32xbf16, #tpu.memory_space<vmem>>, vector<4x16xbf16>
    tpu.vector_store %arg12[%c1248, %c0_151], %195 {strides = array<i32>} : memref<1264x32xbf16, #tpu.memory_space<vmem>>, vector<4x16xbf16>,
    %197 = vector.extract_strided_slice %193 {offsets = [4, 0], sizes = [4, 16], strides = [1, 1]} : vector<8x16xf32> to vector<4x16xf32>
    %198 = arith.truncf %197 : vector<4x16xf32> to vector<4x16xbf16>
    %c1248_152 = arith.constant 1248 : index
    %c16_153 = arith.constant 16 : index
    %199 = vector.load %arg12[%c1248_152, %c16_153] : memref<1264x32xbf16, #tpu.memory_space<vmem>>, vector<4x16xbf16>
    tpu.vector_store %arg12[%c1248_152, %c16_153], %198 {strides = array<i32>} : memref<1264x32xbf16, #tpu.memory_space<vmem>>, vector<4x16xbf16>,
    %c0_154 = arith.constant 0 : index
    %c0_155 = arith.constant 0 : index
    %200 = vector.load %arg5[%c0_154, %c0_155] : memref<128x1264xbf16, #tpu.memory_space<vmem>>, vector<128x1264xbf16>
    %c0_156 = arith.constant 0 : index
    %c0_157 = arith.constant 0 : index
    %201 = vector.load %arg12[%c0_156, %c0_157] : memref<1264x32xbf16, #tpu.memory_space<vmem>>, vector<1264x32xbf16>
    %cst_158 = arith.constant dense<0.000000e+00> : vector<128x32xf32>
    %202 = tpu.matmul %200, %201, %cst_158 {dimension_numbers = #tpu.dot_dimension_numbers<[1], [0], [0], [1], [0, 0, 1, 1], [], []>} : vector<128x1264xbf16>, vector<1264x32xbf16>, vector<128x32xf32> -> vector<128x32xf32>
    %c0_159 = arith.constant 0 : index
    %c0_160 = arith.constant 0 : index
    %203 = vector.load %arg6[%c0_159, %c0_160] : memref<128x1xf32, #tpu.memory_space<vmem>>, vector<128x1xf32>
    %204 = vector.broadcast %203 : vector<128x1xf32> to vector<128x32xf32>
    %205 = arith.addf %202, %204 : vector<128x32xf32>
    %c0_161 = arith.constant 0 : index
    %c0_162 = arith.constant 0 : index
    %c0_163 = arith.constant 0 : index
    %206 = vector.load %arg8[%c0_161, %c0_162, %c0_163] : memref<1x128x1xf32, #tpu.memory_space<vmem>>, vector<1x128x1xf32>
    %207 = vector.shape_cast %206 : vector<1x128x1xf32> to vector<128x1xf32>
    %cst_164 = arith.constant dense<0.000000e+00> : vector<128xf32>
    %208 = vector.multi_reduction <add>, %205, %cst_164 [1] : vector<128x32xf32> to vector<128xf32>
    %209 = vector.shape_cast %208 : vector<128xf32> to vector<128x1xf32>
    %210 = arith.addf %207, %209 : vector<128x1xf32>
    %c0_165 = arith.constant 0 : index
    %c0_166 = arith.constant 0 : index
    %c0_167 = arith.constant 0 : index
    %211 = vector.load %arg8[%c0_165, %c0_166, %c0_167] : memref<1x128x1xf32, #tpu.memory_space<vmem>>, vector<1x128x1xf32>
    %212 = vector.shape_cast %211 : vector<1x128x1xf32> to vector<128x1xf32>
    %213 = vector.shape_cast %210 : vector<128x1xf32> to vector<1x128x1xf32>
    tpu.vector_store %arg8[%c0_165, %c0_166, %c0_167], %213 {strides = array<i32>} : memref<1x128x1xf32, #tpu.memory_space<vmem>>, vector<1x128x1xf32>,
    %c0_168 = arith.constant 0 : index
    %c0_169 = arith.constant 0 : index
    %c0_170 = arith.constant 0 : index
    %214 = vector.load %arg9[%c0_168, %c0_169, %c0_170] : memref<1x128x1xf32, #tpu.memory_space<vmem>>, vector<1x128x1xf32>
    %215 = vector.shape_cast %214 : vector<1x128x1xf32> to vector<128x1xf32>
    %216 = arith.mulf %205, %205 : vector<128x32xf32>
    %cst_171 = arith.constant dense<0.000000e+00> : vector<128xf32>
    %217 = vector.multi_reduction <add>, %216, %cst_171 [1] : vector<128x32xf32> to vector<128xf32>
    %218 = vector.shape_cast %217 : vector<128xf32> to vector<128x1xf32>
    %219 = arith.addf %215, %218 : vector<128x1xf32>
    %c0_172 = arith.constant 0 : index
    %c0_173 = arith.constant 0 : index
    %c0_174 = arith.constant 0 : index
    %220 = vector.load %arg9[%c0_172, %c0_173, %c0_174] : memref<1x128x1xf32, #tpu.memory_space<vmem>>, vector<1x128x1xf32>
    %221 = vector.shape_cast %220 : vector<1x128x1xf32> to vector<128x1xf32>
    %222 = vector.shape_cast %219 : vector<128x1xf32> to vector<1x128x1xf32>
    tpu.vector_store %arg9[%c0_172, %c0_173, %c0_174], %222 {strides = array<i32>} : memref<1x128x1xf32, #tpu.memory_space<vmem>>, vector<1x128x1xf32>,
    %223 = arith.truncf %205 : vector<128x32xf32> to vector<128x32xbf16>
    %c0_175 = arith.constant 0 : index
    %c0_176 = arith.constant 0 : index
    %c0_177 = arith.constant 0 : index
    %224 = vector.load %arg7[%c0_175, %c0_176, %c0_177] : memref<1x128x32xbf16, #tpu.memory_space<vmem>>, vector<1x128x32xbf16>
    %225 = vector.shape_cast %224 : vector<1x128x32xbf16> to vector<128x32xbf16>
    %226 = vector.shape_cast %223 : vector<128x32xbf16> to vector<1x128x32xbf16>
    tpu.vector_store %arg7[%c0_175, %c0_176, %c0_177], %226 {strides = array<i32>} : memref<1x128x32xbf16, #tpu.memory_space<vmem>>, vector<1x128x32xbf16>,
    return
  }
  func.func @transform_0(%arg0: i32, %arg1: i32) -> (i32, i32, i32) {
    %c1_i32 = arith.constant 1 : i32
    %0 = arith.muli %arg0, %c1_i32 : i32
    %1 = arith.addi %0, %arg1 : i32
    %c0_i32 = arith.constant 0 : i32
    %c0_i32_0 = arith.constant 0 : i32
    %c0_i32_1 = arith.constant 0 : i32
    return %1, %c0_i32, %c0_i32_0 : i32, i32, i32
  }
  func.func @transform_1(%arg0: i32, %arg1: i32) -> (i32, i32) {
    %c0_i32 = arith.constant 0 : i32
    %c0_i32_0 = arith.constant 0 : i32
    %c0_i32_1 = arith.constant 0 : i32
    return %c0_i32, %c0_i32_0 : i32, i32
  }
  func.func @transform_2(%arg0: i32, %arg1: i32) -> (i32, i32) {
    %c0_i32 = arith.constant 0 : i32
    %c0_i32_0 = arith.constant 0 : i32
    %c0_i32_1 = arith.constant 0 : i32
    return %c0_i32, %c0_i32_0 : i32, i32
  }
  func.func @transform_3(%arg0: i32, %arg1: i32) -> (i32, i32) {
    %c0_i32 = arith.constant 0 : i32
    %c0_i32_0 = arith.constant 0 : i32
    %c0_i32_1 = arith.constant 0 : i32
    return %c0_i32, %c0_i32_0 : i32, i32
  }
  func.func @transform_4(%arg0: i32, %arg1: i32) -> (i32, i32) {
    %c0_i32 = arith.constant 0 : i32
    %c0_i32_0 = arith.constant 0 : i32
    %c0_i32_1 = arith.constant 0 : i32
    return %c0_i32, %c0_i32_0 : i32, i32
  }
  func.func @transform_5(%arg0: i32, %arg1: i32) -> (i32, i32, i32) {
    %c1_i32 = arith.constant 1 : i32
    %0 = arith.muli %arg0, %c1_i32 : i32
    %1 = arith.addi %0, %arg1 : i32
    %c0_i32 = arith.constant 0 : i32
    %c0_i32_0 = arith.constant 0 : i32
    %c0_i32_1 = arith.constant 0 : i32
    return %1, %c0_i32, %c0_i32_0 : i32, i32, i32
  }
  func.func @transform_6(%arg0: i32, %arg1: i32) -> (i32, i32, i32) {
    %c0_i32 = arith.constant 0 : i32
    %c0_i32_0 = arith.constant 0 : i32
    %c0_i32_1 = arith.constant 0 : i32
    return %arg0, %c0_i32, %c0_i32_0 : i32, i32, i32
  }
  func.func @transform_7(%arg0: i32, %arg1: i32) -> (i32, i32, i32) {
    %c0_i32 = arith.constant 0 : i32
    %c0_i32_0 = arith.constant 0 : i32
    %c0_i32_1 = arith.constant 0 : i32
    return %arg0, %c0_i32, %c0_i32_0 : i32, i32, i32
  }
}

</mosaic_0001>

<bundles_post_ra>
// kernel: tpu_custom_call.1
= control target key start
LH: loop header
LB: loop body
LE: loop exit
PB: predicated region body
PF: predicated region fallthrough
CT: control target
= control target key end

     0   :  { %vm164_vm0 = vcmask 1043456   ;;  %vm151_vm1 = vcmask 31744   ;;  %v7023_v0 = vmov 0   ;;  %s4481_s11 = smov 1   ;;  %vm63_vm2 = vcmask 7168   ;;  %s4485_s21 = smov 16   ;;  %s7015_s2 = inlined_call_operand.vmem [shape: f32[32,1], index: 2, kind: input, shape index: {}]   ;;  %s7016_s0 = inlined_call_operand.vmem [shape: f32[2,4,16], index: 0, kind: input, shape index: {}]   ;;  %s7017_s1 = inlined_call_operand.vmem [shape: f32[32,4], index: 1, kind: input, shape index: {}]   ;;  %s7018_s3 = inlined_call_operand.vmem [shape: bf16[128,1264], index: 3, kind: input, shape index: {}]   ;;  %s7019_s4 = inlined_call_operand.vmem [shape: f32[128,1], index: 4, kind: input, shape index: {}]   ;;  %s7020_s5 = inlined_call_operand.vmem [shape: bf16[1,128,32], index: 5, kind: output, shape index: {0}]   ;;  %s7021_s6 = inlined_call_operand.vmem [shape: f32[1,128,1], index: 6, kind: output, shape index: {1}]   ;;  %s7022_s7 = inlined_call_operand.vmem [shape: f32[1,128,1], index: 7, kind: output, shape index: {2}]  }
   0x1   :  { %4476 = vset.pattern.permute.xlu0 %v7023_v0  ;;  %v127_v1 = vld [vmem:[%s7015_s2] sm:$0xff]  ;;  %4477 = vset.pattern.permute.xlu1 %v7023_v0  ;;  %v129_v5 = vld [vmem:[%s7015_s2 + $0x10] sm:$0xff]  ;;  %v128_v6 = vld [vmem:[%s7015_s2 + $0x8] sm:$0xff]  ;;  %vm116_vm3 = vcmask 146568   ;;  %v4483_v22 = vmov -inf   ;;  %vm225_vm4 = vcmask 134152  }
   0x2   :  { %v122_v2 = vld [vmem:[%s7016_s0] sm:$0xf]  ;;  %v3592_v3 = vld [vmem:[%s7016_s0 + $0x4] sm:$0xf]  ;;  %133 = vperm.xlu0 %4476, %v127_v1   ;;  %143 = vperm.xlu1 %4477, %v129_v5   ;;  %v124_v7 = vld [vmem:[%s7017_s1 + $0x8] sm:$0xff]  ;;  %115 = vst.msk [vmem:[#allocation3] sm:$0xff] %vm63_vm2, %v4483_v22 }
   0x3   :  { %3587 = vmatpush.msk.msra.mxu0 %vm164_vm0, %v122_v2  ;;  %v123_v4 = vld [vmem:[%s7017_s1] sm:$0xff]  ;;  %3593 = vmatpush.msk.msra.mxu1 %vm164_vm0, %v3592_v3  ;;  %v236_v8 = vld [vmem:[%s7015_s2 + $0x18] sm:$0xff]  ;;  %v125_v9 = vld [vmem:[%s7017_s1 + $0x10] sm:$0xff]  ;;  %s4482_s2 = smov 19   ;;  %vm96_vm5 = vcmask 150528   ;;  %117 = vst.msk [vmem:[#allocation3] sm:$0xff] %vm116_vm3, %v4483_v22 }
   0x4   :  { %3588 = vmatmul.msk.f32.vlgmr.msra.gmra.mxu0 %vm151_vm1, %v123_v4  ;;  %3594 = vmatmul.msk.f32.vlgmr.msra.gmra.mxu1 %vm151_vm1, %v123_v4  ;;  %v126_v10 = vld [vmem:[%s7017_s1 + $0x18] sm:$0xff]  ;;  %vm105_vm6 = vcmask 437528   ;;  %97 = vst.msk [vmem:[#allocation2] sm:$0xf] %vm96_vm5, %v7023_v0  ;;  %vm217_vm7 = vcmask 281752   ;;  %vm337_vm8 = vcmask 125952  }
   0x5   :  { %222 = vrot.lane.b32.xlu2 %v122_v2, %s4481_s11  ;;  %106 = vst.msk [vmem:[#allocation2] sm:$0xf] %vm105_vm6, %v7023_v0  ;;  %s4484_s1 = smov 127   ;;  %s4486_s22 = smov 15   ;;  %vm358_vm9 = vcmask 257152   ;;  %vm1582_vm10 = vcmask 123904  }
   0x6   :  { %4478 = vset.pattern.permute.xlu2 %v7023_v0  ;;  %98 = vst.msk [vmem:[#allocation2 + $0x4] sm:$0xf] %vm96_vm5, %v7023_v0  ;;  %s4487_s23 = smov 14   ;;  %s4488_s24 = smov 125   ;;  %vm118_vm11 = vcmask 257026   ;;  %vm120_vm12 = vcmask 257024  }
   0x7   :  { %99 = vst.msk [vmem:[#allocation2 + $0x8] sm:$0xf] %vm96_vm5, %v7023_v0  ;;  %s4489_s25 = smov 126   ;;  %s4490_s26 = smov 124   ;;  %vm1590_vm13 = vcmask 255104   ;;  %vm2792_vm14 = vcmask 916480  }
   0x8   :  { %100 = vst.msk [vmem:[#allocation2 + $0xc] sm:$0xf] %vm96_vm5, %v7023_v0  ;;  %s4491_s27 = smov 12   ;;  %s4492_s28 = smov 13   ;;  %vm3323_vm15 = vcmask 261120  }
   0x9   :  { %101 = vst.msk [vmem:[#allocation2 + $0x10] sm:$0xf] %vm96_vm5, %v7023_v0  ;;  %s4493_s29 = smov 11   ;;  %s4494_s30 = smov 122  }
   0xa   :  { %138 = vperm.xlu0 %4476, %v128_v6   ;;  %148 = vperm.xlu1 %4477, %v236_v8   ;;  %102 = vst.msk [vmem:[#allocation2 + $0x14] sm:$0xf] %vm96_vm5, %v7023_v0  ;;  %s4495_s8 = smov 123   ;;  %s4496_s9 = smov 121  }
   0xb   :  { %103 = vst.msk [vmem:[#allocation2 + $0x18] sm:$0xf] %vm96_vm5, %v7023_v0  ;;  %s4497_s10 = smov 9   ;;  %s4498_s0 = smov 10  }
   0xc   :  { %3589 = vmatmul.msk.f32.gmra.mxu0 %vm151_vm1, %v124_v7  ;;  %3595 = vmatmul.msk.f32.gmra.mxu1 %vm151_vm1, %v124_v7  ;;  %104 = vst.msk [vmem:[#allocation2 + $0x1c] sm:$0xf] %vm96_vm5, %v7023_v0  ;;  %s4499_s12 = smov 8   ;;  %s4500_s13 = smov 119  }
   0xd   :  { %249 = vperm.xlu2 %4478, %v129_v5   ;;  %107 = vst.msk [vmem:[#allocation2 + $0x4] sm:$0xf] %vm105_vm6, %v7023_v0  ;;  %s4501_s14 = smov 120   ;;  %s4502_s15 = smov 118  }
   0xe   :  { %108 = vst.msk [vmem:[#allocation2 + $0x8] sm:$0xf] %vm105_vm6, %v7023_v0  ;;  %s4503_s16 = smov 6   ;;  %s4504_s17 = smov 7  }
   0xf   :  { %109 = vst.msk [vmem:[#allocation2 + $0xc] sm:$0xf] %vm105_vm6, %v7023_v0  ;;  %s4505_s18 = smov 5   ;;  %s4506_s19 = smov 117  }
  0x10   :  { %110 = vst.msk [vmem:[#allocation2 + $0x10] sm:$0xf] %vm105_vm6, %v7023_v0  ;;  %s4507_s20 = smov 116  }
  0x11   :  { %111 = vst.msk [vmem:[#allocation2 + $0x14] sm:$0xf] %vm105_vm6, %v7023_v0 }
  0x12   :  { %239 = vperm.xlu0 %4476, %v127_v1   ;;  %244 = vperm.xlu1 %4477, %v128_v6   ;;  %112 = vst.msk [vmem:[#allocation2 + $0x18] sm:$0xf] %vm105_vm6, %v7023_v0 }
  0x13   :  { %113 = vst.msk [vmem:[#allocation2 + $0x1c] sm:$0xf] %vm105_vm6, %v7023_v0 }
  0x14   :  { %3590 = vmatmul.msk.f32.gmra.mxu0 %vm151_vm1, %v125_v9  ;;  %3596 = vmatmul.msk.f32.gmra.mxu1 %vm151_vm1, %v125_v9 }
  0x15   :  { %325 = vrot.lane.b32.xlu2 %v3592_v3, %s4481_s11 }
  0x1a   :  { %254 = vperm.xlu0 %4476, %v236_v8  }
  0x1c   :  { %3591 = vmatmul.msk.f32.gmra.mxu0 %vm151_vm1, %v126_v10  ;;  %3597 = vmatmul.msk.f32.gmra.mxu1 %vm151_vm1, %v126_v10 }
  0x5f   :  { %v223_v21 = vpop.permute.xlu2 %222 }
  0x60   :  { %226 = vst.msk [vmem:[#allocation3] sm:$0xf] %vm225_vm4, %v223_v21 }
  0x67   :  { %v250_v30 = vpop.permute.xlu2 %249 }
  0x6f   :  { %v326_v37 = vpop.permute.xlu2 %325 }
  0x70   :  { %328 = vst.msk [vmem:[#allocation3 + $0x4] sm:$0xf] %vm225_vm4, %v326_v37 }
  0x74   :  { %v134_v11 = vpop.permute.xlu0 %133  ;;  %v144_v12 = vpop.permute.xlu1 %143 }
  0x7c   :  { %v139_v13 = vpop.permute.xlu0 %138  ;;  %v149_v17 = vpop.permute.xlu1 %148 }
  0x81   :  { %v185_v14 = vpop.f32.mrf.mxu0  ;;  %v289_v16 = vpop.f32.mrf.mxu1 }
  0x82   :  { %v186_v15 = vadd.f32 %v185_v14, %v134_v11 }
  0x84   :  { %v197_v18 = vpack.c.bf16 %v186_v15, %v186_v15  ;;  %v240_v19 = vpop.permute.xlu0 %239  ;;  %v245_v27 = vpop.permute.xlu1 %244 }
  0x85   :  { %v290_v20 = vadd.f32 %v289_v16, %v240_v19 }
  0x86   :  { %205 = vrot.lane.b32.xlu2 %v197_v18, %s4482_s2 }
  0x87   :  { %v301_v23 = vpack.c.bf16 %v290_v20, %v290_v20 }
  0x89   :  { %v188_v24 = vpop.f32.mrf.mxu0  ;;  %v292_v26 = vpop.f32.mrf.mxu1  ;;  %309 = vrot.lane.b32.xlu1 %v301_v23, %s4482_s2 }
  0x8a   :  { %v189_v25 = vadd.f32 %v188_v24, %v139_v13  ;;  %v293_v29 = vadd.f32 %v292_v26, %v245_v27 }
  0x8c   :  { %v198_v28 = vpack.c.bf16 %v189_v25, %v189_v25  ;;  %v302_v33 = vpack.c.bf16 %v293_v29, %v293_v29  ;;  %v255_v43 = vpop.permute.xlu0 %254 }
  0x8e   :  { %207 = vrot.lane.b32.xlu2 %v198_v28, %s4482_s2 }
  0x91   :  { %v191_v31 = vpop.f32.mrf.mxu0  ;;  %v295_v34 = vpop.f32.mrf.mxu1 }
  0x92   :  { %v192_v32 = vadd.f32 %v191_v31, %v144_v12  ;;  %v296_v36 = vadd.f32 %v295_v34, %v250_v30 }
  0x94   :  { %v199_v35 = vpack.c.bf16 %v192_v32, %v192_v32  ;;  %v303_v40 = vpack.c.bf16 %v296_v36, %v296_v36 }
  0x96   :  { %209 = vrot.lane.b32.xlu0 %v199_v35, %s4482_s2  ;;  %311 = vrot.lane.b32.xlu2 %v302_v33, %s4482_s2 }
  0x99   :  { %v194_v38 = vpop.f32.mrf.mxu0  ;;  %v298_v42 = vpop.f32.mrf.mxu1 }
  0x9a   :  { %v195_v39 = vadd.f32 %v194_v38, %v149_v17  ;;  %v299_v44 = vadd.f32 %v298_v42, %v255_v43 }
  0x9c   :  { %v200_v41 = vpack.c.bf16 %v195_v39, %v195_v39  ;;  %v304_v45 = vpack.c.bf16 %v299_v44, %v299_v44 }
  0x9e   :  { %211 = vrot.lane.b32.xlu1 %v200_v41, %s4482_s2  ;;  %313 = vrot.lane.b32.xlu0 %v303_v40, %s4482_s2 }
  0xa6   :  { %315 = vrot.lane.b32.xlu1 %v304_v45, %s4482_s2  ;;  %s4508_s2 = smov 4  }
  0xe0   :  { %v206_v46 = vpop.permute.xlu2 %205 }
  0xe1   :  { %218 = vst.msk [vmem:[#allocation2] sm:$0xf] %vm217_vm7, %v206_v46 }
  0xe8   :  { %v4665_v47 = vld [vmem:[#allocation2] sm:$0xf]  ;;  %v208_v48 = vpop.permute.xlu2 %207 }
  0xe9   :  { %219 = vst.msk [vmem:[#allocation2 + $0x4] sm:$0xf] %vm217_vm7, %v208_v48  ;;  %367 = vrot.lane.b32.xlu1 %v4665_v47, %s4484_s1 }
  0xea   :  { %338 = vst.msk [vmem:[#allocation4] sm:$0xf] %vm337_vm8, %v4665_v47 }
  0xf0   :  { %v4672_v49 = vld [vmem:[#allocation2 + $0x4] sm:$0xf]  ;;  %v312_v52 = vpop.permute.xlu2 %311 }
  0xf1   :  { %339 = vst.msk [vmem:[#allocation4 + $0x4] sm:$0xf] %vm337_vm8, %v4672_v49 }
  0xf2   :  { %322 = vst.msk [vmem:[#allocation2 + $0x14] sm:$0xf] %vm217_vm7, %v312_v52 }
  0xf9   :  { %v4733_v58 = vld [vmem:[#allocation2 + $0x14] sm:$0xf] }
  0xfb   :  { %v310_v50 = vpop.permute.xlu1 %309 }
  0xfc   :  { %321 = vst.msk [vmem:[#allocation2 + $0x10] sm:$0xf] %vm217_vm7, %v310_v50 }
 0x103   :  { %v4677_v51 = vld [vmem:[#allocation2 + $0x10] sm:$0xf] }
 0x104   :  { %346 = vrot.lane.b32.xlu0 %v4677_v51, %s4485_s21  ;;  %383 = vrot.lane.b32.xlu2 %v4677_v51, %s4486_s22 }
 0x105   :  { %415 = vrot.lane.b32.xlu1 %v4677_v51, %s4487_s23 }
 0x108   :  { %v210_v56 = vpop.permute.xlu0 %209 }
 0x109   :  { %220 = vst.msk [vmem:[#allocation2 + $0x8] sm:$0xf] %vm217_vm7, %v210_v56 }
 0x10c   :  { %431 = vrot.lane.b32.xlu2 %v4665_v47, %s4488_s24  ;;  %399 = vrot.lane.b32.xlu0 %v4665_v47, %s4489_s25 }
 0x10d   :  { %463 = vrot.lane.b32.xlu1 %v4665_v47, %s4490_s26 }
 0x110   :  { %v212_v53 = vpop.permute.xlu1 %211  ;;  %v4717_v57 = vld [vmem:[#allocation2 + $0x8] sm:$0xf]  ;;  %v314_v59 = vpop.permute.xlu0 %313 }
 0x111   :  { %221 = vst.msk [vmem:[#allocation2 + $0xc] sm:$0xf] %vm217_vm7, %v212_v53 }
 0x112   :  { %340 = vst.msk [vmem:[#allocation4 + $0x8] sm:$0xf] %vm337_vm8, %v4717_v57 }
 0x113   :  { %323 = vst.msk [vmem:[#allocation2 + $0x18] sm:$0xf] %vm217_vm7, %v314_v59 }
 0x114   :  { %479 = vrot.lane.b32.xlu2 %v4677_v51, %s4491_s27  ;;  %447 = vrot.lane.b32.xlu0 %v4677_v51, %s4492_s28 }
 0x115   :  { %511 = vrot.lane.b32.xlu1 %v4677_v51, %s4493_s29 }
 0x118   :  { %v4699_v54 = vld [vmem:[#allocation2 + $0xc] sm:$0xf]  ;;  %v316_v55 = vpop.permute.xlu1 %315 }
 0x119   :  { %324 = vst.msk [vmem:[#allocation2 + $0x1c] sm:$0xf] %vm217_vm7, %v316_v55 }
 0x11a   :  { %341 = vst.msk [vmem:[#allocation4 + $0xc] sm:$0xf] %vm337_vm8, %v4699_v54  ;;  %v4789_v4 = vld [vmem:[#allocation2 + $0x18] sm:$0xf] }
 0x11c   :  { %527 = vrot.lane.b32.xlu2 %v4665_v47, %s4494_s30  ;;  %495 = vrot.lane.b32.xlu0 %v4665_v47, %s4495_s8 }
 0x11d   :  { %559 = vrot.lane.b32.xlu1 %v4665_v47, %s4496_s9 }
 0x120   :  { %v4854_v26 = vld [vmem:[#allocation2 + $0x1c] sm:$0xf] }
 0x124   :  { %575 = vrot.lane.b32.xlu2 %v4677_v51, %s4497_s10  ;;  %543 = vrot.lane.b32.xlu0 %v4677_v51, %s4498_s0 }
 0x125   :  { %607 = vrot.lane.b32.xlu1 %v4677_v51, %s4499_s12 }
 0x12c   :  { %623 = vrot.lane.b32.xlu2 %v4665_v47, %s4500_s13  ;;  %591 = vrot.lane.b32.xlu0 %v4665_v47, %s4501_s14 }
 0x12d   :  { %655 = vrot.lane.b32.xlu1 %v4665_v47, %s4502_s15 }
 0x134   :  { %671 = vrot.lane.b32.xlu2 %v4677_v51, %s4503_s16  ;;  %639 = vrot.lane.b32.xlu0 %v4677_v51, %s4504_s17 }
 0x135   :  { %703 = vrot.lane.b32.xlu1 %v4677_v51, %s4505_s18 }
 0x13c   :  { %687 = vrot.lane.b32.xlu0 %v4665_v47, %s4506_s19  ;;  %369 = vrot.lane.b32.xlu2 %v4672_v49, %s4484_s1 }
 0x13d   :  { %348 = vrot.lane.b32.xlu1 %v4733_v58, %s4485_s21 }
 0x144   :  { %417 = vrot.lane.b32.xlu2 %v4733_v58, %s4487_s23  ;;  %385 = vrot.lane.b32.xlu0 %v4733_v58, %s4486_s22 }
 0x145   :  { %401 = vrot.lane.b32.xlu1 %v4672_v49, %s4489_s25 }
 0x14c   :  { %465 = vrot.lane.b32.xlu2 %v4672_v49, %s4490_s26  ;;  %433 = vrot.lane.b32.xlu0 %v4672_v49, %s4488_s24 }
 0x14d   :  { %449 = vrot.lane.b32.xlu1 %v4733_v58, %s4492_s28 }
 0x154   :  { %513 = vrot.lane.b32.xlu2 %v4733_v58, %s4493_s29  ;;  %481 = vrot.lane.b32.xlu0 %v4733_v58, %s4491_s27 }
 0x155   :  { %497 = vrot.lane.b32.xlu1 %v4672_v49, %s4495_s8 }
 0x15b   :  { %v368_v60 = vpop.permute.xlu1 %367 }
 0x15c   :  { %379 = vst.msk [vmem:[#allocation4 + $0x10] sm:$0xf] %vm337_vm8, %v368_v60  ;;  %561 = vrot.lane.b32.xlu2 %v4672_v49, %s4496_s9  ;;  %529 = vrot.lane.b32.xlu0 %v4672_v49, %s4494_s30 }
 0x15d   :  { %545 = vrot.lane.b32.xlu1 %v4733_v58, %s4498_s0 }
 0x15e   :  { %v384_v61 = vpop.permute.xlu2 %383 }
 0x15f   :  { %395 = vst.msk [vmem:[#allocation4 + $0x10] sm:$0xf] %vm358_vm9, %v384_v61 }
 0x164   :  { %609 = vrot.lane.b32.xlu2 %v4733_v58, %s4499_s12  ;;  %577 = vrot.lane.b32.xlu0 %v4733_v58, %s4497_s10 }
 0x165   :  { %593 = vrot.lane.b32.xlu1 %v4672_v49, %s4501_s14 }
 0x166   :  { %v432_v62 = vpop.permute.xlu2 %431 }
 0x167   :  { %443 = vst.msk [vmem:[#allocation4 + $0x30] sm:$0xf] %vm337_vm8, %v432_v62 }
 0x16c   :  { %657 = vrot.lane.b32.xlu2 %v4672_v49, %s4502_s15  ;;  %625 = vrot.lane.b32.xlu0 %v4672_v49, %s4500_s13 }
 0x16d   :  { %641 = vrot.lane.b32.xlu1 %v4733_v58, %s4504_s17 }
 0x16e   :  { %v480_v63 = vpop.permute.xlu2 %479 }
 0x174   :  { %705 = vrot.lane.b32.xlu2 %v4733_v58, %s4505_s18  ;;  %673 = vrot.lane.b32.xlu0 %v4733_v58, %s4503_s16 }
 0x175   :  { %689 = vrot.lane.b32.xlu1 %v4672_v49, %s4506_s19 }
 0x176   :  { %v347_v1 = vpop.permute.xlu0 %346  ;;  %v528_v2 = vpop.permute.xlu2 %527 }
 0x177   :  { %359 = vst.msk [vmem:[#allocation4] sm:$0xf] %vm358_vm9, %v347_v1  ;;  %v416_v3 = vpop.permute.xlu1 %415 }
 0x178   :  { %539 = vst.msk [vmem:[#allocation4 + $0x60] sm:$0xf] %vm337_vm8, %v528_v2 }
 0x17c   :  { %350 = vrot.lane.b32.xlu2 %v4789_v4, %s4485_s21  ;;  %371 = vrot.lane.b32.xlu0 %v4717_v57, %s4484_s1 }
 0x17d   :  { %387 = vrot.lane.b32.xlu1 %v4789_v4, %s4486_s22 }
 0x17e   :  { %v400_v5 = vpop.permute.xlu0 %399  ;;  %v576_v6 = vpop.permute.xlu2 %575 }
 0x17f   :  { %411 = vst.msk [vmem:[#allocation4 + $0x20] sm:$0xf] %vm337_vm8, %v400_v5  ;;  %v464_v7 = vpop.permute.xlu1 %463 }
 0x180   :  { %427 = vst.msk [vmem:[#allocation4 + $0x20] sm:$0xf] %vm358_vm9, %v416_v3 }
 0x181   :  { %475 = vst.msk [vmem:[#allocation4 + $0x40] sm:$0xf] %vm337_vm8, %v464_v7 }
 0x182   :  { %491 = vst.msk [vmem:[#allocation4 + $0x40] sm:$0xf] %vm358_vm9, %v480_v63 }
 0x184   :  { %403 = vrot.lane.b32.xlu2 %v4717_v57, %s4489_s25  ;;  %419 = vrot.lane.b32.xlu0 %v4789_v4, %s4487_s23 }
 0x185   :  { %435 = vrot.lane.b32.xlu1 %v4717_v57, %s4488_s24 }
 0x186   :  { %v448_v8 = vpop.permute.xlu0 %447  ;;  %v624_v9 = vpop.permute.xlu2 %623 }
 0x187   :  { %459 = vst.msk [vmem:[#allocation4 + $0x30] sm:$0xf] %vm358_vm9, %v448_v8  ;;  %v512_v10 = vpop.permute.xlu1 %511 }
 0x188   :  { %635 = vst.msk [vmem:[#allocation4 + $0x90] sm:$0xf] %vm337_vm8, %v624_v9 }
 0x18c   :  { %451 = vrot.lane.b32.xlu2 %v4789_v4, %s4492_s28  ;;  %467 = vrot.lane.b32.xlu0 %v4717_v57, %s4490_s26 }
 0x18d   :  { %483 = vrot.lane.b32.xlu1 %v4789_v4, %s4491_s27 }
 0x18e   :  { %v496_v11 = vpop.permute.xlu0 %495  ;;  %v672_v12 = vpop.permute.xlu2 %671 }
 0x18f   :  { %507 = vst.msk [vmem:[#allocation4 + $0x50] sm:$0xf] %vm337_vm8, %v496_v11  ;;  %v560_v13 = vpop.permute.xlu1 %559 }
 0x190   :  { %523 = vst.msk [vmem:[#allocation4 + $0x50] sm:$0xf] %vm358_vm9, %v512_v10 }
 0x191   :  { %571 = vst.msk [vmem:[#allocation4 + $0x70] sm:$0xf] %vm337_vm8, %v560_v13 }
 0x192   :  { %587 = vst.msk [vmem:[#allocation4 + $0x70] sm:$0xf] %vm358_vm9, %v576_v6 }
 0x194   :  { %499 = vrot.lane.b32.xlu2 %v4717_v57, %s4495_s8  ;;  %515 = vrot.lane.b32.xlu0 %v4789_v4, %s4493_s29 }
 0x195   :  { %531 = vrot.lane.b32.xlu1 %v4717_v57, %s4494_s30 }
 0x196   :  { %v544_v14 = vpop.permute.xlu0 %543  ;;  %v370_v15 = vpop.permute.xlu2 %369 }
 0x197   :  { %555 = vst.msk [vmem:[#allocation4 + $0x60] sm:$0xf] %vm358_vm9, %v544_v14  ;;  %v608_v16 = vpop.permute.xlu1 %607 }
 0x198   :  { %380 = vst.msk [vmem:[#allocation4 + $0x14] sm:$0xf] %vm337_vm8, %v370_v15 }
 0x19c   :  { %547 = vrot.lane.b32.xlu2 %v4789_v4, %s4498_s0  ;;  %563 = vrot.lane.b32.xlu0 %v4717_v57, %s4496_s9 }
 0x19d   :  { %579 = vrot.lane.b32.xlu1 %v4789_v4, %s4497_s10 }
 0x19e   :  { %v592_v17 = vpop.permute.xlu0 %591  ;;  %v418_v18 = vpop.permute.xlu2 %417 }
 0x19f   :  { %603 = vst.msk [vmem:[#allocation4 + $0x80] sm:$0xf] %vm337_vm8, %v592_v17  ;;  %v656_v19 = vpop.permute.xlu1 %655 }
 0x1a0   :  { %619 = vst.msk [vmem:[#allocation4 + $0x80] sm:$0xf] %vm358_vm9, %v608_v16 }
 0x1a1   :  { %667 = vst.msk [vmem:[#allocation4 + $0xa0] sm:$0xf] %vm337_vm8, %v656_v19 }
 0x1a2   :  { %683 = vst.msk [vmem:[#allocation4 + $0xa0] sm:$0xf] %vm358_vm9, %v672_v12 }
 0x1a4   :  { %595 = vrot.lane.b32.xlu2 %v4717_v57, %s4501_s14  ;;  %611 = vrot.lane.b32.xlu0 %v4789_v4, %s4499_s12 }
 0x1a5   :  { %627 = vrot.lane.b32.xlu1 %v4717_v57, %s4500_s13 }
 0x1a6   :  { %v640_v20 = vpop.permute.xlu0 %639  ;;  %v466_v21 = vpop.permute.xlu2 %465 }
 0x1a7   :  { %651 = vst.msk [vmem:[#allocation4 + $0x90] sm:$0xf] %vm358_vm9, %v640_v20  ;;  %v704_v22 = vpop.permute.xlu1 %703 }
 0x1a8   :  { %476 = vst.msk [vmem:[#allocation4 + $0x44] sm:$0xf] %vm337_vm8, %v466_v21 }
 0x1ac   :  { %643 = vrot.lane.b32.xlu2 %v4789_v4, %s4504_s17  ;;  %659 = vrot.lane.b32.xlu0 %v4717_v57, %s4502_s15 }
 0x1ad   :  { %675 = vrot.lane.b32.xlu1 %v4789_v4, %s4503_s16 }
 0x1ae   :  { %v688_v23 = vpop.permute.xlu0 %687  ;;  %v514_v24 = vpop.permute.xlu2 %513 }
 0x1af   :  { %699 = vst.msk [vmem:[#allocation4 + $0xb0] sm:$0xf] %vm337_vm8, %v688_v23  ;;  %v349_v25 = vpop.permute.xlu1 %348 }
 0x1b0   :  { %715 = vst.msk [vmem:[#allocation4 + $0xb0] sm:$0xf] %vm358_vm9, %v704_v22 }
 0x1b1   :  { %360 = vst.msk [vmem:[#allocation4 + $0x4] sm:$0xf] %vm358_vm9, %v349_v25 }
 0x1b4   :  { %691 = vrot.lane.b32.xlu2 %v4717_v57, %s4506_s19  ;;  %352 = vrot.lane.b32.xlu0 %v4854_v26, %s4485_s21 }
 0x1b5   :  { %373 = vrot.lane.b32.xlu1 %v4699_v54, %s4484_s1 }
 0x1b6   :  { %v386_v27 = vpop.permute.xlu0 %385  ;;  %v562_v28 = vpop.permute.xlu2 %561 }
 0x1b7   :  { %396 = vst.msk [vmem:[#allocation4 + $0x14] sm:$0xf] %vm358_vm9, %v386_v27  ;;  %v402_v29 = vpop.permute.xlu1 %401 }
 0x1b8   :  { %412 = vst.msk [vmem:[#allocation4 + $0x24] sm:$0xf] %vm337_vm8, %v402_v29 }
 0x1b9   :  { %428 = vst.msk [vmem:[#allocation4 + $0x24] sm:$0xf] %vm358_vm9, %v418_v18 }
 0x1ba   :  { %572 = vst.msk [vmem:[#allocation4 + $0x74] sm:$0xf] %vm337_vm8, %v562_v28 }
 0x1bc   :  { %389 = vrot.lane.b32.xlu2 %v4854_v26, %s4486_s22  ;;  %405 = vrot.lane.b32.xlu0 %v4699_v54, %s4489_s25  ;;  %s4509_s22 = smov 115  }
 0x1bd   :  { %421 = vrot.lane.b32.xlu1 %v4854_v26, %s4487_s23  ;;  %s4510_s23 = smov 3  }
 0x1be   :  { %v434_v30 = vpop.permute.xlu0 %433  ;;  %v610_v31 = vpop.permute.xlu2 %609 }
 0x1bf   :  { %444 = vst.msk [vmem:[#allocation4 + $0x34] sm:$0xf] %vm337_vm8, %v434_v30  ;;  %v450_v32 = vpop.permute.xlu1 %449 }
 0x1c0   :  { %460 = vst.msk [vmem:[#allocation4 + $0x34] sm:$0xf] %vm358_vm9, %v450_v32  ;;  %v4327_v32 = vld [vmem:[#allocation4 + $0x20] sm:$0xff] }
 0x1c4   :  { %437 = vrot.lane.b32.xlu2 %v4699_v54, %s4488_s24  ;;  %453 = vrot.lane.b32.xlu0 %v4854_v26, %s4492_s28  ;;  %s4512_s28 = smov 2  }
 0x1c5   :  { %469 = vrot.lane.b32.xlu1 %v4699_v54, %s4490_s26 }
 0x1c6   :  { %v482_v33 = vpop.permute.xlu0 %481  ;;  %v658_v34 = vpop.permute.xlu2 %657 }
 0x1c7   :  { %492 = vst.msk [vmem:[#allocation4 + $0x44] sm:$0xf] %vm358_vm9, %v482_v33  ;;  %v498_v35 = vpop.permute.xlu1 %497  ;;  %v4329_v27 = vld [vmem:[#allocation4 + $0x30] sm:$0xff] }
 0x1c8   :  { %508 = vst.msk [vmem:[#allocation4 + $0x54] sm:$0xf] %vm337_vm8, %v498_v35 }
 0x1c9   :  { %524 = vst.msk [vmem:[#allocation4 + $0x54] sm:$0xf] %vm358_vm9, %v514_v24 }
 0x1ca   :  { %668 = vst.msk [vmem:[#allocation4 + $0xa4] sm:$0xf] %vm337_vm8, %v658_v34 }
 0x1cc   :  { %485 = vrot.lane.b32.xlu2 %v4854_v26, %s4491_s27  ;;  %501 = vrot.lane.b32.xlu0 %v4699_v54, %s4495_s8  ;;  %s4511_s27 = smov 114  }
 0x1cd   :  { %517 = vrot.lane.b32.xlu1 %v4854_v26, %s4493_s29  ;;  %s4513_s29 = smov 113  }
 0x1ce   :  { %v530_v36 = vpop.permute.xlu0 %529  ;;  %v706_v37 = vpop.permute.xlu2 %705 }
 0x1cf   :  { %540 = vst.msk [vmem:[#allocation4 + $0x64] sm:$0xf] %vm337_vm8, %v530_v36  ;;  %v546_v38 = vpop.permute.xlu1 %545 }
 0x1d0   :  { %556 = vst.msk [vmem:[#allocation4 + $0x64] sm:$0xf] %vm358_vm9, %v546_v38  ;;  %v4325_v38 = vld [vmem:[#allocation4 + $0x10] sm:$0xff] }
 0x1d4   :  { %533 = vrot.lane.b32.xlu2 %v4699_v54, %s4494_s30  ;;  %549 = vrot.lane.b32.xlu0 %v4854_v26, %s4498_s0  ;;  %s4516_s0 = smov 110  }
 0x1d5   :  { %565 = vrot.lane.b32.xlu1 %v4699_v54, %s4496_s9 }
 0x1d6   :  { %v578_v39 = vpop.permute.xlu0 %577  ;;  %v351_v40 = vpop.permute.xlu2 %350 }
 0x1d7   :  { %588 = vst.msk [vmem:[#allocation4 + $0x74] sm:$0xf] %vm358_vm9, %v578_v39  ;;  %v594_v41 = vpop.permute.xlu1 %593 }
 0x1d8   :  { %604 = vst.msk [vmem:[#allocation4 + $0x84] sm:$0xf] %vm337_vm8, %v594_v41 }
 0x1d9   :  { %620 = vst.msk [vmem:[#allocation4 + $0x84] sm:$0xf] %vm358_vm9, %v610_v31 }
 0x1da   :  { %361 = vst.msk [vmem:[#allocation4 + $0x8] sm:$0xf] %vm358_vm9, %v351_v40 }
 0x1dc   :  { %581 = vrot.lane.b32.xlu2 %v4854_v26, %s4497_s10  ;;  %597 = vrot.lane.b32.xlu0 %v4699_v54, %s4501_s14  ;;  %s4514_s10 = smov 112  }
 0x1dd   :  { %613 = vrot.lane.b32.xlu1 %v4854_v26, %s4499_s12  ;;  %s4517_s12 = smov 109  }
 0x1de   :  { %v626_v42 = vpop.permute.xlu0 %625  ;;  %v404_v43 = vpop.permute.xlu2 %403  ;;  %v4337_v39 = vld [vmem:[#allocation4 + $0x70] sm:$0xff] }
 0x1df   :  { %636 = vst.msk [vmem:[#allocation4 + $0x94] sm:$0xf] %vm337_vm8, %v626_v42  ;;  %v642_v44 = vpop.permute.xlu1 %641 }
 0x1e0   :  { %652 = vst.msk [vmem:[#allocation4 + $0x94] sm:$0xf] %vm358_vm9, %v642_v44 }
 0x1e1   :  { %413 = vst.msk [vmem:[#allocation4 + $0x28] sm:$0xf] %vm337_vm8, %v404_v43 }
 0x1e4   :  { %629 = vrot.lane.b32.xlu2 %v4699_v54, %s4500_s13  ;;  %645 = vrot.lane.b32.xlu0 %v4854_v26, %s4504_s17 }
 0x1e5   :  { %661 = vrot.lane.b32.xlu1 %v4699_v54, %s4502_s15 }
 0x1e6   :  { %v674_v45 = vpop.permute.xlu0 %673  ;;  %v452_v46 = vpop.permute.xlu2 %451 }
 0x1e7   :  { %684 = vst.msk [vmem:[#allocation4 + $0xa4] sm:$0xf] %vm358_vm9, %v674_v45  ;;  %v690_v48 = vpop.permute.xlu1 %689  ;;  %v4323_v45 = vld [vmem:[#allocation4] sm:$0xff] }
 0x1e8   :  { %700 = vst.msk [vmem:[#allocation4 + $0xb4] sm:$0xf] %vm337_vm8, %v690_v48 }
 0x1e9   :  { %716 = vst.msk [vmem:[#allocation4 + $0xb4] sm:$0xf] %vm358_vm9, %v706_v37 }
 0x1ec   :  { %677 = vrot.lane.b32.xlu2 %v4854_v26, %s4503_s16  ;;  %693 = vrot.lane.b32.xlu0 %v4699_v54, %s4506_s19  ;;  %s4518_s16 = smov 108  }
 0x1ed   :  { %709 = vrot.lane.b32.xlu1 %v4854_v26, %s4505_s18 }
 0x1ee   :  { %v372_v50 = vpop.permute.xlu0 %371  ;;  %v500_v52 = vpop.permute.xlu2 %499 }
 0x1ef   :  { %381 = vst.msk [vmem:[#allocation4 + $0x18] sm:$0xf] %vm337_vm8, %v372_v50  ;;  %v388_v53 = vpop.permute.xlu1 %387 }
 0x1f0   :  { %397 = vst.msk [vmem:[#allocation4 + $0x18] sm:$0xf] %vm358_vm9, %v388_v53 }
 0x1f1   :  { %509 = vst.msk [vmem:[#allocation4 + $0x58] sm:$0xf] %vm337_vm8, %v500_v52 }
 0x1f4   :  { %719 = vrot.lane.b32.xlu2 %v4665_v47, %s4507_s20  ;;  %707 = vrot.lane.b32.xlu0 %v4789_v4, %s4505_s18  ;;  %s4527_s18 = smov 99  }
 0x1f5   :  { %723 = vrot.lane.b32.xlu1 %v4717_v57, %s4507_s20 }
 0x1f6   :  { %v420_v55 = vpop.permute.xlu0 %419  ;;  %v548_v56 = vpop.permute.xlu2 %547 }
 0x1f7   :  { %429 = vst.msk [vmem:[#allocation4 + $0x28] sm:$0xf] %vm358_vm9, %v420_v55  ;;  %v436_v59 = vpop.permute.xlu1 %435  ;;  %v4333_v55 = vld [vmem:[#allocation4 + $0x50] sm:$0xff] }
 0x1f8   :  { %445 = vst.msk [vmem:[#allocation4 + $0x38] sm:$0xf] %vm337_vm8, %v436_v59 }
 0x1f9   :  { %461 = vst.msk [vmem:[#allocation4 + $0x38] sm:$0xf] %vm358_vm9, %v452_v46  ;;  %v4335_v46 = vld [vmem:[#allocation4 + $0x60] sm:$0xff] }
 0x1fc   :  { %725 = vrot.lane.b32.xlu2 %v4699_v54, %s4507_s20  ;;  %721 = vrot.lane.b32.xlu0 %v4672_v49, %s4507_s20 }
 0x1fd   :  { %737 = vrot.lane.b32.xlu1 %v4733_v58, %s4508_s2 }
 0x1fe   :  { %v468_v60 = vpop.permute.xlu0 %467  ;;  %v596_v61 = vpop.permute.xlu2 %595 }
 0x1ff   :  { %477 = vst.msk [vmem:[#allocation4 + $0x48] sm:$0xf] %vm337_vm8, %v468_v60  ;;  %v484_v62 = vpop.permute.xlu1 %483 }
 0x200   :  { %493 = vst.msk [vmem:[#allocation4 + $0x48] sm:$0xf] %vm358_vm9, %v484_v62  ;;  %v4331_v62 = vld [vmem:[#allocation4 + $0x40] sm:$0xff] }
 0x201   :  { %605 = vst.msk [vmem:[#allocation4 + $0x88] sm:$0xf] %vm337_vm8, %v596_v61 }
 0x204   :  { %739 = vrot.lane.b32.xlu2 %v4789_v4, %s4508_s2  ;;  %735 = vrot.lane.b32.xlu0 %v4677_v51, %s4508_s2 }
 0x205   :  { %751 = vrot.lane.b32.xlu1 %v4665_v47, %s4509_s22 }
 0x206   :  { %v516_v63 = vpop.permute.xlu0 %515  ;;  %v644_v1 = vpop.permute.xlu2 %643 }
 0x207   :  { %525 = vst.msk [vmem:[#allocation4 + $0x58] sm:$0xf] %vm358_vm9, %v516_v63  ;;  %v532_v2 = vpop.permute.xlu1 %531 }
 0x208   :  { %541 = vst.msk [vmem:[#allocation4 + $0x68] sm:$0xf] %vm337_vm8, %v532_v2 }
 0x209   :  { %557 = vst.msk [vmem:[#allocation4 + $0x68] sm:$0xf] %vm358_vm9, %v548_v56 }
 0x20c   :  { %753 = vrot.lane.b32.xlu2 %v4672_v49, %s4509_s22  ;;  %741 = vrot.lane.b32.xlu0 %v4854_v26, %s4508_s2 }
 0x20d   :  { %757 = vrot.lane.b32.xlu1 %v4699_v54, %s4509_s22 }
 0x20e   :  { %v564_v3 = vpop.permute.xlu0 %563  ;;  %v692_v5 = vpop.permute.xlu2 %691 }
 0x20f   :  { %573 = vst.msk [vmem:[#allocation4 + $0x78] sm:$0xf] %vm337_vm8, %v564_v3  ;;  %v580_v6 = vpop.permute.xlu1 %579 }
 0x210   :  { %589 = vst.msk [vmem:[#allocation4 + $0x78] sm:$0xf] %vm358_vm9, %v580_v6 }
 0x211   :  { %701 = vst.msk [vmem:[#allocation4 + $0xb8] sm:$0xf] %vm337_vm8, %v692_v5  ;;  %v4345_v5 = vld [vmem:[#allocation4 + $0xb0] sm:$0xff] }
 0x214   :  { %767 = vrot.lane.b32.xlu2 %v4677_v51, %s4510_s23  ;;  %755 = vrot.lane.b32.xlu0 %v4717_v57, %s4509_s22 }
 0x215   :  { %771 = vrot.lane.b32.xlu1 %v4789_v4, %s4510_s23 }
 0x216   :  { %v612_v7 = vpop.permute.xlu0 %611  ;;  %v390_v8 = vpop.permute.xlu2 %389 }
 0x217   :  { %621 = vst.msk [vmem:[#allocation4 + $0x88] sm:$0xf] %vm358_vm9, %v612_v7  ;;  %v628_v9 = vpop.permute.xlu1 %627 }
 0x218   :  { %637 = vst.msk [vmem:[#allocation4 + $0x98] sm:$0xf] %vm337_vm8, %v628_v9 }
 0x219   :  { %653 = vst.msk [vmem:[#allocation4 + $0x98] sm:$0xf] %vm358_vm9, %v644_v1 }
 0x21c   :  { %773 = vrot.lane.b32.xlu2 %v4854_v26, %s4510_s23  ;;  %769 = vrot.lane.b32.xlu0 %v4733_v58, %s4510_s23  ;;  %s4524_s23 = smov 102  }
 0x21d   :  { %785 = vrot.lane.b32.xlu1 %v4672_v49, %s4511_s27 }
 0x21e   :  { %v660_v10 = vpop.permute.xlu0 %659  ;;  %v438_v11 = vpop.permute.xlu2 %437 }
 0x21f   :  { %669 = vst.msk [vmem:[#allocation4 + $0xa8] sm:$0xf] %vm337_vm8, %v660_v10  ;;  %v676_v12 = vpop.permute.xlu1 %675  ;;  %v4343_v10 = vld [vmem:[#allocation4 + $0xa0] sm:$0xff] }
 0x220   :  { %685 = vst.msk [vmem:[#allocation4 + $0xa8] sm:$0xf] %vm358_vm9, %v676_v12 }
 0x221   :  { %446 = vst.msk [vmem:[#allocation4 + $0x3c] sm:$0xf] %vm337_vm8, %v438_v11 }
 0x224   :  { %787 = vrot.lane.b32.xlu2 %v4717_v57, %s4511_s27  ;;  %783 = vrot.lane.b32.xlu0 %v4665_v47, %s4511_s27 }
 0x225   :  { %799 = vrot.lane.b32.xlu1 %v4677_v51, %s4512_s28 }
 0x226   :  { %v353_v13 = vpop.permute.xlu0 %352  ;;  %v486_v14 = vpop.permute.xlu2 %485 }
 0x227   :  { %362 = vst.msk [vmem:[#allocation4 + $0xc] sm:$0xf] %vm358_vm9, %v353_v13  ;;  %v374_v15 = vpop.permute.xlu1 %373 }
 0x228   :  { %382 = vst.msk [vmem:[#allocation4 + $0x1c] sm:$0xf] %vm337_vm8, %v374_v15  ;;  %v4341_v15 = vld [vmem:[#allocation4 + $0x90] sm:$0xff] }
 0x229   :  { %398 = vst.msk [vmem:[#allocation4 + $0x1c] sm:$0xf] %vm358_vm9, %v390_v8 }
 0x22c   :  { %801 = vrot.lane.b32.xlu2 %v4733_v58, %s4512_s28  ;;  %789 = vrot.lane.b32.xlu0 %v4699_v54, %s4511_s27 }
 0x22d   :  { %805 = vrot.lane.b32.xlu1 %v4854_v26, %s4512_s28 }
 0x22e   :  { %v406_v16 = vpop.permute.xlu0 %405  ;;  %v534_v17 = vpop.permute.xlu2 %533  ;;  %v4324_v43 = vld [vmem:[#allocation4 + $0x8] sm:$0xff] }
 0x22f   :  { %414 = vst.msk [vmem:[#allocation4 + $0x2c] sm:$0xf] %vm337_vm8, %v406_v16  ;;  %v422_v18 = vpop.permute.xlu1 %421 }
 0x230   :  { %430 = vst.msk [vmem:[#allocation4 + $0x2c] sm:$0xf] %vm358_vm9, %v422_v18  ;;  %v4326_v36 = vld [vmem:[#allocation4 + $0x18] sm:$0xff] }
 0x231   :  { %542 = vst.msk [vmem:[#allocation4 + $0x6c] sm:$0xf] %vm337_vm8, %v534_v17 }
 0x234   :  { %815 = vrot.lane.b32.xlu2 %v4665_v47, %s4513_s29  ;;  %803 = vrot.lane.b32.xlu0 %v4789_v4, %s4512_s28 }
 0x235   :  { %819 = vrot.lane.b32.xlu1 %v4717_v57, %s4513_s29 }
 0x236   :  { %v454_v19 = vpop.permute.xlu0 %453  ;;  %v582_v20 = vpop.permute.xlu2 %581 }
 0x237   :  { %462 = vst.msk [vmem:[#allocation4 + $0x3c] sm:$0xf] %vm358_vm9, %v454_v19  ;;  %v470_v21 = vpop.permute.xlu1 %469  ;;  %v4328_v31 = vld [vmem:[#allocation4 + $0x28] sm:$0xff] }
 0x238   :  { %478 = vst.msk [vmem:[#allocation4 + $0x4c] sm:$0xf] %vm337_vm8, %v470_v21 }
 0x239   :  { %494 = vst.msk [vmem:[#allocation4 + $0x4c] sm:$0xf] %vm358_vm9, %v486_v14 }
 0x23c   :  { %821 = vrot.lane.b32.xlu2 %v4699_v54, %s4513_s29  ;;  %817 = vrot.lane.b32.xlu0 %v4672_v49, %s4513_s29 }
 0x23d   :  { %833 = vrot.lane.b32.xlu1 %v4733_v58, %s4481_s11 }
 0x23e   :  { %v502_v22 = vpop.permute.xlu0 %501  ;;  %v630_v23 = vpop.permute.xlu2 %629  ;;  %v4330_v24 = vld [vmem:[#allocation4 + $0x38] sm:$0xff] }
 0x23f   :  { %510 = vst.msk [vmem:[#allocation4 + $0x5c] sm:$0xf] %vm337_vm8, %v502_v22  ;;  %v518_v25 = vpop.permute.xlu1 %517  ;;  %2817 = vmatpush.bf16.msrb.mxu0 %v4330_v24  ;;  %4402 = vmatpush.bf16.msra.mxu2 %v4330_v24 }
 0x240   :  { %526 = vst.msk [vmem:[#allocation4 + $0x5c] sm:$0xf] %vm358_vm9, %v518_v25  ;;  %v4332_v61 = vld [vmem:[#allocation4 + $0x48] sm:$0xff] }
 0x241   :  { %638 = vst.msk [vmem:[#allocation4 + $0x9c] sm:$0xf] %vm337_vm8, %v630_v23 }
 0x243   :  { %2818 = vmatpush.bf16.msrb.mxu0 %v4329_v27  ;;  %4403 = vmatpush.bf16.msra.mxu2 %v4329_v27 }
 0x244   :  { %835 = vrot.lane.b32.xlu2 %v4789_v4, %s4481_s11  ;;  %831 = vrot.lane.b32.xlu0 %v4677_v51, %s4481_s11 }
 0x245   :  { %847 = vrot.lane.b32.xlu1 %v4665_v47, %s4514_s10 }
 0x246   :  { %v550_v28 = vpop.permute.xlu0 %549  ;;  %v678_v29 = vpop.permute.xlu2 %677 }
 0x247   :  { %558 = vst.msk [vmem:[#allocation4 + $0x6c] sm:$0xf] %vm358_vm9, %v550_v28  ;;  %v566_v30 = vpop.permute.xlu1 %565  ;;  %2819 = vmatpush.bf16.msrb.mxu0 %v4328_v31  ;;  %4404 = vmatpush.bf16.msra.mxu2 %v4328_v31  ;;  %v4334_v53 = vld [vmem:[#allocation4 + $0x58] sm:$0xff] }
 0x248   :  { %574 = vst.msk [vmem:[#allocation4 + $0x7c] sm:$0xf] %vm337_vm8, %v566_v30 }
 0x249   :  { %590 = vst.msk [vmem:[#allocation4 + $0x7c] sm:$0xf] %vm358_vm9, %v582_v20  ;;  %v4339_v20 = vld [vmem:[#allocation4 + $0x80] sm:$0xff] }
 0x24b   :  { %2820 = vmatpush.bf16.msrb.mxu0 %v4327_v32  ;;  %4405 = vmatpush.bf16.msra.mxu2 %v4327_v32 }
 0x24c   :  { %849 = vrot.lane.b32.xlu2 %v4672_v49, %s4514_s10  ;;  %837 = vrot.lane.b32.xlu0 %v4854_v26, %s4481_s11  ;;  %s4515_s11 = smov 111  }
 0x24d   :  { %853 = vrot.lane.b32.xlu1 %v4699_v54, %s4514_s10 }
 0x24e   :  { %v598_v33 = vpop.permute.xlu0 %597  ;;  %v720_v34 = vpop.permute.xlu2 %719  ;;  %v4336_v44 = vld [vmem:[#allocation4 + $0x68] sm:$0xff] }
 0x24f   :  { %606 = vst.msk [vmem:[#allocation4 + $0x8c] sm:$0xf] %vm337_vm8, %v598_v33  ;;  %v614_v35 = vpop.permute.xlu1 %613  ;;  %2821 = vmatpush.bf16.msrb.mxu0 %v4326_v36  ;;  %4406 = vmatpush.bf16.msra.mxu2 %v4326_v36  ;;  %v5138_v36 = vld [vmem:[#allocation2 + $0x10] sm:$0xf] }
 0x250   :  { %622 = vst.msk [vmem:[#allocation4 + $0x8c] sm:$0xf] %vm358_vm9, %v614_v35  ;;  %v4338_v37 = vld [vmem:[#allocation4 + $0x78] sm:$0xff] }
 0x251   :  { %731 = vst.msk [vmem:[#allocation4 + $0xc0] sm:$0xf] %vm337_vm8, %v720_v34  ;;  %2866 = vmatpush.bf16.msrb.mxu1 %v4338_v37  ;;  %4410 = vmatpush.bf16.msra.mxu3 %v4338_v37 }
 0x253   :  { %2822 = vmatpush.bf16.msrb.mxu0 %v4325_v38  ;;  %4407 = vmatpush.bf16.msra.mxu2 %v4325_v38 }
 0x254   :  { %867 = vrot.lane.b32.xlu2 %v4665_v47, %s4515_s11  ;;  %851 = vrot.lane.b32.xlu0 %v4717_v57, %s4514_s10 }
 0x255   :  { %871 = vrot.lane.b32.xlu1 %v4717_v57, %s4515_s11  ;;  %2867 = vmatpush.bf16.msrb.mxu1 %v4337_v39 }
 0x256   :  { %v646_v40 = vpop.permute.xlu0 %645  ;;  %v726_v41 = vpop.permute.xlu2 %725  ;;  %4411 = vmatpush.bf16.msra.mxu3 %v4337_v39 }
 0x257   :  { %654 = vst.msk [vmem:[#allocation4 + $0x9c] sm:$0xf] %vm358_vm9, %v646_v40  ;;  %v662_v42 = vpop.permute.xlu1 %661  ;;  %2823 = vmatpush.bf16.msrb.mxu0 %v4324_v43  ;;  %4408 = vmatpush.bf16.msra.mxu2 %v4324_v43  ;;  %v4340_v19 = vld [vmem:[#allocation4 + $0x88] sm:$0xff] }
 0x258   :  { %670 = vst.msk [vmem:[#allocation4 + $0xac] sm:$0xf] %vm337_vm8, %v662_v42 }
 0x259   :  { %686 = vst.msk [vmem:[#allocation4 + $0xac] sm:$0xf] %vm358_vm9, %v678_v29  ;;  %2868 = vmatpush.bf16.msrb.mxu1 %v4336_v44 }
 0x25a   :  { %734 = vst.msk [vmem:[#allocation4 + $0xcc] sm:$0xf] %vm337_vm8, %v726_v41  ;;  %4412 = vmatpush.bf16.msra.mxu3 %v4336_v44 }
 0x25b   :  { %2824 = vmatpush.bf16.msrb.mxu0 %v4323_v45  ;;  %4409 = vmatpush.bf16.msra.mxu2 %v4323_v45 }
 0x25c   :  { %873 = vrot.lane.b32.xlu2 %v4699_v54, %s4515_s11  ;;  %869 = vrot.lane.b32.xlu0 %v4672_v49, %s4515_s11 }
 0x25d   :  { %885 = vrot.lane.b32.xlu1 %v4733_v58, %s4484_s1  ;;  %2869 = vmatpush.bf16.msrb.mxu1 %v4335_v46 }
 0x25e   :  { %v694_v48 = vpop.permute.xlu0 %693  ;;  %v740_v50 = vpop.permute.xlu2 %739  ;;  %4413 = vmatpush.bf16.msra.mxu3 %v4335_v46  ;;  %v4342_v14 = vld [vmem:[#allocation4 + $0x98] sm:$0xff] }
 0x25f   :  { %702 = vst.msk [vmem:[#allocation4 + $0xbc] sm:$0xf] %vm337_vm8, %v694_v48  ;;  %v710_v52 = vpop.permute.xlu1 %709 }
 0x260   :  { %718 = vst.msk [vmem:[#allocation4 + $0xbc] sm:$0xf] %vm358_vm9, %v710_v52  ;;  %v4344_v9 = vld [vmem:[#allocation4 + $0xa8] sm:$0xff] }
 0x261   :  { %2870 = vmatpush.bf16.msrb.mxu1 %v4334_v53 }
 0x262   :  { %4414 = vmatpush.bf16.msra.mxu3 %v4334_v53 }
 0x264   :  { %887 = vrot.lane.b32.xlu2 %v4789_v4, %s4484_s1  ;;  %883 = vrot.lane.b32.xlu0 %v4677_v51, %s4484_s1 }
 0x265   :  { %899 = vrot.lane.b32.xlu1 %v4665_v47, %s4516_s0  ;;  %2871 = vmatpush.bf16.msrb.mxu1 %v4333_v55 }
 0x266   :  { %v708_v56 = vpop.permute.xlu0 %707  ;;  %v754_v59 = vpop.permute.xlu2 %753  ;;  %4415 = vmatpush.bf16.msra.mxu3 %v4333_v55 }
 0x267   :  { %717 = vst.msk [vmem:[#allocation4 + $0xb8] sm:$0xf] %vm358_vm9, %v708_v56  ;;  %v724_v60 = vpop.permute.xlu1 %723 }
 0x268   :  { %733 = vst.msk [vmem:[#allocation4 + $0xc8] sm:$0xf] %vm337_vm8, %v724_v60 }
 0x269   :  { %749 = vst.msk [vmem:[#allocation4 + $0xc8] sm:$0xf] %vm358_vm9, %v740_v50  ;;  %2872 = vmatpush.bf16.msrb.mxu1 %v4332_v61 }
 0x26a   :  { %764 = vst.msk [vmem:[#allocation4 + $0xd4] sm:$0xf] %vm337_vm8, %v754_v59  ;;  %4416 = vmatpush.bf16.msra.mxu3 %v4332_v61 }
 0x26c   :  { %901 = vrot.lane.b32.xlu2 %v4672_v49, %s4516_s0  ;;  %889 = vrot.lane.b32.xlu0 %v4854_v26, %s4484_s1 }
 0x26d   :  { %905 = vrot.lane.b32.xlu1 %v4699_v54, %s4516_s0  ;;  %2873 = vmatpush.bf16.msrb.mxu1 %v4331_v62 }
 0x26e   :  { %v722_v63 = vpop.permute.xlu0 %721  ;;  %v768_v1 = vpop.permute.xlu2 %767  ;;  %v4346_v2 = vld [vmem:[#allocation4 + $0xb8] sm:$0xff]  ;;  %4417 = vmatpush.bf16.msra.mxu3 %v4331_v62 }
 0x26f   :  { %732 = vst.msk [vmem:[#allocation4 + $0xc4] sm:$0xf] %vm337_vm8, %v722_v63  ;;  %v738_v3 = vpop.permute.xlu1 %737  ;;  %2915 = vmatpush.bf16.msra.mxu0 %v4346_v2 }
 0x270   :  { %748 = vst.msk [vmem:[#allocation4 + $0xc4] sm:$0xf] %vm358_vm9, %v738_v3 }
 0x273   :  { %2916 = vmatpush.bf16.msra.mxu0 %v4345_v5 }
 0x274   :  { %915 = vrot.lane.b32.xlu2 %v4677_v51, %s4489_s25  ;;  %903 = vrot.lane.b32.xlu0 %v4717_v57, %s4516_s0 }
 0x275   :  { %919 = vrot.lane.b32.xlu1 %v4789_v4, %s4489_s25 }
 0x276   :  { %v736_v6 = vpop.permute.xlu0 %735  ;;  %v774_v7 = vpop.permute.xlu2 %773 }
 0x277   :  { %747 = vst.msk [vmem:[#allocation4 + $0xc0] sm:$0xf] %vm358_vm9, %v736_v6  ;;  %v752_v8 = vpop.permute.xlu1 %751  ;;  %2917 = vmatpush.bf16.msra.mxu0 %v4344_v9 }
 0x278   :  { %763 = vst.msk [vmem:[#allocation4 + $0xd0] sm:$0xf] %vm337_vm8, %v752_v8 }
 0x279   :  { %779 = vst.msk [vmem:[#allocation4 + $0xd0] sm:$0xf] %vm358_vm9, %v768_v1 }
 0x27b   :  { %2918 = vmatpush.bf16.msra.mxu0 %v4343_v10 }
 0x27c   :  { %921 = vrot.lane.b32.xlu2 %v4854_v26, %s4489_s25  ;;  %917 = vrot.lane.b32.xlu0 %v4733_v58, %s4489_s25 }
 0x27d   :  { %933 = vrot.lane.b32.xlu1 %v4672_v49, %s4517_s12 }
 0x27e   :  { %v742_v11 = vpop.permute.xlu0 %741  ;;  %v788_v12 = vpop.permute.xlu2 %787  ;;  %v4347_v6 = vld [vmem:[#allocation4 + $0xc0] sm:$0xff] }
 0x27f   :  { %750 = vst.msk [vmem:[#allocation4 + $0xcc] sm:$0xf] %vm358_vm9, %v742_v11  ;;  %v758_v13 = vpop.permute.xlu1 %757  ;;  %2919 = vmatpush.bf16.msra.mxu0 %v4342_v14 }
 0x280   :  { %766 = vst.msk [vmem:[#allocation4 + $0xdc] sm:$0xf] %vm337_vm8, %v758_v13 }
 0x281   :  { %782 = vst.msk [vmem:[#allocation4 + $0xdc] sm:$0xf] %vm358_vm9, %v774_v7 }
 0x282   :  { %797 = vst.msk [vmem:[#allocation4 + $0xe8] sm:$0xf] %vm337_vm8, %v788_v12 }
 0x283   :  { %2920 = vmatpush.bf16.msra.mxu0 %v4341_v15 }
 0x284   :  { %935 = vrot.lane.b32.xlu2 %v4717_v57, %s4517_s12  ;;  %931 = vrot.lane.b32.xlu0 %v4665_v47, %s4517_s12 }
 0x285   :  { %947 = vrot.lane.b32.xlu1 %v4677_v51, %s4488_s24 }
 0x286   :  { %v756_v16 = vpop.permute.xlu0 %755  ;;  %v802_v17 = vpop.permute.xlu2 %801  ;;  %v4348_v5 = vld [vmem:[#allocation4 + $0xc8] sm:$0xff] }
 0x287   :  { %765 = vst.msk [vmem:[#allocation4 + $0xd8] sm:$0xf] %vm337_vm8, %v756_v16  ;;  %v772_v18 = vpop.permute.xlu1 %771  ;;  %2921 = vmatpush.bf16.msra.mxu0 %v4340_v19  ;;  %v3601_v19 = vld [vmem:[%s7018_s3] sm:$0xf] }
 0x288   :  { %781 = vst.msk [vmem:[#allocation4 + $0xd8] sm:$0xf] %vm358_vm9, %v772_v18 }
 0x28b   :  { %2922 = vmatpush.bf16.msra.mxu0 %v4339_v20  ;;  %v4248_v20 = vld [vmem:[%s7018_s3 + $0x24] sm:$0xf0] }
 0x28c   :  { %937 = vrot.lane.b32.xlu0 %v4699_v54, %s4517_s12  ;;  %949 = vrot.lane.b32.xlu2 %v4733_v58, %s4488_s24 }
 0x28d   :  { %953 = vrot.lane.b32.xlu1 %v4854_v26, %s4488_s24 }
 0x28e   :  { %v770_v21 = vpop.permute.xlu0 %769  ;;  %v816_v22 = vpop.permute.xlu2 %815 }
 0x28f   :  { %780 = vst.msk [vmem:[#allocation4 + $0xd4] sm:$0xf] %vm358_vm9, %v770_v21  ;;  %v786_v23 = vpop.permute.xlu1 %785  ;;  %v4350_v62 = vld [vmem:[#allocation4 + $0xd8] sm:$0xff] }
 0x290   :  { %796 = vst.msk [vmem:[#allocation4 + $0xe4] sm:$0xf] %vm337_vm8, %v786_v23  ;;  %v3602_v23 = vor.u32 %v4248_v20, %v3601_v19 }
 0x291   :  { %812 = vst.msk [vmem:[#allocation4 + $0xe4] sm:$0xf] %vm358_vm9, %v802_v17 }
 0x292   :  { %827 = vst.msk [vmem:[#allocation4 + $0xf0] sm:$0xf] %vm337_vm8, %v816_v22  ;;  %2825 = vmatmul.bf16.vlgmr.msrb.gmra.mxu0 %v3602_v23  ;;  %v3721_v23 = vld [vmem:[%s7018_s3 + $0xf0] sm:$0xf] }
 0x294   :  { %951 = vrot.lane.b32.xlu0 %v4789_v4, %s4488_s24  ;;  %963 = vrot.lane.b32.xlu2 %v4665_v47, %s4518_s16  ;;  %s4519_s24 = smov 107  }
 0x295   :  { %967 = vrot.lane.b32.xlu1 %v4717_v57, %s4518_s16 }
 0x296   :  { %v784_v24 = vpop.permute.xlu0 %783  ;;  %v822_v25 = vpop.permute.xlu2 %821  ;;  %v4349_v63 = vld [vmem:[#allocation4 + $0xd0] sm:$0xff] }
 0x297   :  { %795 = vst.msk [vmem:[#allocation4 + $0xe0] sm:$0xf] %vm337_vm8, %v784_v24  ;;  %v800_v27 = vpop.permute.xlu1 %799 }
 0x298   :  { %811 = vst.msk [vmem:[#allocation4 + $0xe0] sm:$0xf] %vm358_vm9, %v800_v27 }
 0x299   :  { %830 = vst.msk [vmem:[#allocation4 + $0xfc] sm:$0xf] %vm337_vm8, %v822_v25 }
 0x29c   :  { %965 = vrot.lane.b32.xlu0 %v4672_v49, %s4518_s16  ;;  %969 = vrot.lane.b32.xlu2 %v4699_v54, %s4518_s16 }
 0x29d   :  { %981 = vrot.lane.b32.xlu1 %v4733_v58, %s4490_s26 }
 0x29e   :  { %v790_v28 = vpop.permute.xlu0 %789  ;;  %v836_v29 = vpop.permute.xlu2 %835 }
 0x29f   :  { %798 = vst.msk [vmem:[#allocation4 + $0xec] sm:$0xf] %vm337_vm8, %v790_v28  ;;  %v806_v30 = vpop.permute.xlu1 %805  ;;  %v4351_v56 = vld [vmem:[#allocation4 + $0xe0] sm:$0xff] }
 0x2a0   :  { %814 = vst.msk [vmem:[#allocation4 + $0xec] sm:$0xf] %vm358_vm9, %v806_v30 }
 0x2a4   :  { %979 = vrot.lane.b32.xlu0 %v4677_v51, %s4490_s26  ;;  %983 = vrot.lane.b32.xlu2 %v4789_v4, %s4490_s26 }
 0x2a5   :  { %995 = vrot.lane.b32.xlu1 %v4665_v47, %s4519_s24 }
 0x2a6   :  { %v804_v31 = vpop.permute.xlu0 %803  ;;  %v850_v32 = vpop.permute.xlu2 %849 }
 0x2a7   :  { %813 = vst.msk [vmem:[#allocation4 + $0xe8] sm:$0xf] %vm358_vm9, %v804_v31  ;;  %v820_v33 = vpop.permute.xlu1 %819  ;;  %v3641_v31 = vld [vmem:[%s7018_s3 + $0x50] sm:$0xf] }
 0x2a8   :  { %829 = vst.msk [vmem:[#allocation4 + $0xf8] sm:$0xf] %vm337_vm8, %v820_v33 }
 0x2a9   :  { %845 = vst.msk [vmem:[#allocation4 + $0xf8] sm:$0xf] %vm358_vm9, %v836_v29 }
 0x2aa   :  { %860 = vst.msk [vmem:[#allocation4 + $0x104] sm:$0xf] %vm337_vm8, %v850_v32  ;;  %v4258_v32 = vld [vmem:[%s7018_s3 + $0x74] sm:$0xf0] }
 0x2ab   :  { %864 = vst.msk [vmem:[#allocation4 + $0x104] sm:$0xf] %vm358_vm9, %v4733_v58 }
 0x2ac   :  { %985 = vrot.lane.b32.xlu0 %v4854_v26, %s4490_s26  ;;  %997 = vrot.lane.b32.xlu2 %v4672_v49, %s4519_s24  ;;  %s4520_s26 = smov 106  }
 0x2ad   :  { %1001 = vrot.lane.b32.xlu1 %v4699_v54, %s4519_s24 }
 0x2ae   :  { %v818_v51 = vpop.permute.xlu0 %817  ;;  %v868_v34 = vpop.permute.xlu2 %867  ;;  %v4352_v55 = vld [vmem:[#allocation4 + $0xe8] sm:$0xff] }
 0x2af   :  { %828 = vst.msk [vmem:[#allocation4 + $0xf4] sm:$0xf] %vm337_vm8, %v818_v51  ;;  %v834_v35 = vpop.permute.xlu1 %833 }
 0x2b0   :  { %844 = vst.msk [vmem:[#allocation4 + $0xf4] sm:$0xf] %vm358_vm9, %v834_v35 }
 0x2b1   :  { %879 = vst.msk [vmem:[#allocation4 + $0x110] sm:$0xf] %vm337_vm8, %v868_v34  ;;  %v3642_v34 = vor.u32 %v4258_v32, %v3641_v31 }
 0x2b3   :  { %2830 = vmatmul.bf16.gmra.mxu0 %v3642_v34 }
 0x2b4   :  { %999 = vrot.lane.b32.xlu0 %v4717_v57, %s4519_s24  ;;  %1011 = vrot.lane.b32.xlu2 %v5138_v36, %s4495_s8 }
 0x2b5   :  { %1015 = vrot.lane.b32.xlu1 %v4789_v4, %s4495_s8 }
 0x2b6   :  { %v832_v37 = vpop.permute.xlu0 %831  ;;  %v874_v38 = vpop.permute.xlu2 %873 }
 0x2b7   :  { %843 = vst.msk [vmem:[#allocation4 + $0xf0] sm:$0xf] %vm358_vm9, %v832_v37  ;;  %v848_v39 = vpop.permute.xlu1 %847 }
 0x2b8   :  { %859 = vst.msk [vmem:[#allocation4 + $0x100] sm:$0xf] %vm337_vm8, %v848_v39 }
 0x2b9   :  { %863 = vst.msk [vmem:[#allocation4 + $0x100] sm:$0xf] %vm358_vm9, %v5138_v36 }
 0x2ba   :  { %882 = vst.msk [vmem:[#allocation4 + $0x11c] sm:$0xf] %vm337_vm8, %v874_v38 }
 0x2bc   :  { %1013 = vrot.lane.b32.xlu0 %v4733_v58, %s4495_s8  ;;  %1017 = vrot.lane.b32.xlu2 %v4854_v26, %s4495_s8  ;;  %s4521_s8 = smov 105  }
 0x2bd   :  { %1029 = vrot.lane.b32.xlu1 %v4672_v49, %s4520_s26 }
 0x2be   :  { %v838_v40 = vpop.permute.xlu0 %837  ;;  %v888_v41 = vpop.permute.xlu2 %887  ;;  %v4353_v48 = vld [vmem:[#allocation4 + $0xf0] sm:$0xff] }
 0x2bf   :  { %846 = vst.msk [vmem:[#allocation4 + $0xfc] sm:$0xf] %vm358_vm9, %v838_v40  ;;  %v854_v42 = vpop.permute.xlu1 %853 }
 0x2c0   :  { %862 = vst.msk [vmem:[#allocation4 + $0x10c] sm:$0xf] %vm337_vm8, %v854_v42 }
 0x2c1   :  { %866 = vst.msk [vmem:[#allocation4 + $0x10c] sm:$0xf] %vm358_vm9, %v4854_v26 }
 0x2c4   :  { %1027 = vrot.lane.b32.xlu0 %v4665_v47, %s4520_s26  ;;  %1031 = vrot.lane.b32.xlu2 %v4717_v57, %s4520_s26 }
 0x2c5   :  { %1043 = vrot.lane.b32.xlu1 %v5138_v36, %s4494_s30 }
 0x2c6   :  { %v852_v43 = vpop.permute.xlu0 %851  ;;  %v902_v44 = vpop.permute.xlu2 %901  ;;  %v4354_v45 = vld [vmem:[#allocation4 + $0xf8] sm:$0xff] }
 0x2c7   :  { %861 = vst.msk [vmem:[#allocation4 + $0x108] sm:$0xf] %vm337_vm8, %v852_v43  ;;  %v872_v46 = vpop.permute.xlu1 %871  ;;  %2964 = vmatpush.bf16.msra.mxu1 %v4354_v45  ;;  %v4268_v45 = vld [vmem:[%s7018_s3 + $0xc4] sm:$0xf0] }
 0x2c8   :  { %865 = vst.msk [vmem:[#allocation4 + $0x108] sm:$0xf] %vm358_vm9, %v4789_v4 }
 0x2c9   :  { %881 = vst.msk [vmem:[#allocation4 + $0x118] sm:$0xf] %vm337_vm8, %v872_v46 }
 0x2ca   :  { %897 = vst.msk [vmem:[#allocation4 + $0x118] sm:$0xf] %vm358_vm9, %v888_v41 }
 0x2cb   :  { %912 = vst.msk [vmem:[#allocation4 + $0x124] sm:$0xf] %vm337_vm8, %v902_v44  ;;  %2965 = vmatpush.bf16.msra.mxu1 %v4353_v48  ;;  %v3681_v44 = vld [vmem:[%s7018_s3 + $0xa0] sm:$0xf] }
 0x2cc   :  { %1033 = vrot.lane.b32.xlu0 %v4699_v54, %s4520_s26  ;;  %1045 = vrot.lane.b32.xlu2 %v4733_v58, %s4494_s30 }
 0x2cd   :  { %1049 = vrot.lane.b32.xlu1 %v4854_v26, %s4494_s30 }
 0x2ce   :  { %v870_v50 = vpop.permute.xlu0 %869  ;;  %v916_v52 = vpop.permute.xlu2 %915 }
 0x2cf   :  { %880 = vst.msk [vmem:[#allocation4 + $0x114] sm:$0xf] %vm337_vm8, %v870_v50  ;;  %v886_v53 = vpop.permute.xlu1 %885  ;;  %2966 = vmatpush.bf16.msra.mxu1 %v4352_v55  ;;  %v3682_v50 = vor.u32 %v4268_v45, %v3681_v44  ;;  %v4355_v55 = vld [vmem:[#allocation4 + $0x100] sm:$0xff]  ;;  %v5384_v44 = vld [vmem:[#allocation3] sm:$0xff] }
 0x2d0   :  { %896 = vst.msk [vmem:[#allocation4 + $0x114] sm:$0xf] %vm358_vm9, %v886_v53  ;;  %v4356_v53 = vld [vmem:[#allocation4 + $0x108] sm:$0xff]  ;;  %v4283_v45 = vld [vmem:[%s7018_s3 + $0x144] sm:$0xf] }
 0x2d1   :  { %2835 = vmatmul.bf16.gmra.mxu0 %v3682_v50 }
 0x2d3   :  { %2967 = vmatpush.bf16.msra.mxu1 %v4351_v56 }
 0x2d4   :  { %1047 = vrot.lane.b32.xlu0 %v4789_v4, %s4494_s30  ;;  %1059 = vrot.lane.b32.xlu2 %v4665_v47, %s4521_s8  ;;  %s4522_s30 = smov 104  }
 0x2d5   :  { %1063 = vrot.lane.b32.xlu1 %v4717_v57, %s4521_s8 }
 0x2d6   :  { %v884_v59 = vpop.permute.xlu0 %883  ;;  %v922_v60 = vpop.permute.xlu2 %921 }
 0x2d7   :  { %895 = vst.msk [vmem:[#allocation4 + $0x110] sm:$0xf] %vm358_vm9, %v884_v59  ;;  %v900_v61 = vpop.permute.xlu1 %899  ;;  %2968 = vmatpush.bf16.msra.mxu1 %v4350_v62  ;;  %v4249_v62 = vld [vmem:[%s7018_s3 + $0x2c] sm:$0xf0] }
 0x2d8   :  { %911 = vst.msk [vmem:[#allocation4 + $0x120] sm:$0xf] %vm337_vm8, %v900_v61  ;;  %v3609_v61 = vld [vmem:[%s7018_s3 + $0x8] sm:$0xf] }
 0x2d9   :  { %927 = vst.msk [vmem:[#allocation4 + $0x120] sm:$0xf] %vm358_vm9, %v916_v52 }
 0x2db   :  { %2969 = vmatpush.bf16.msra.mxu1 %v4349_v63 }
 0x2dc   :  { %1061 = vrot.lane.b32.xlu0 %v4672_v49, %s4521_s8  ;;  %1065 = vrot.lane.b32.xlu2 %v4699_v54, %s4521_s8  ;;  %s4534_s8 = smov 91  }
 0x2dd   :  { %1077 = vrot.lane.b32.xlu1 %v4733_v58, %s4496_s9 }
 0x2de   :  { %v890_v1 = vpop.permute.xlu0 %889  ;;  %v936_v2 = vpop.permute.xlu2 %935  ;;  %v4357_v43 = vld [vmem:[#allocation4 + $0x110] sm:$0xff] }
 0x2df   :  { %898 = vst.msk [vmem:[#allocation4 + $0x11c] sm:$0xf] %vm358_vm9, %v890_v1  ;;  %v906_v3 = vpop.permute.xlu1 %905  ;;  %2970 = vmatpush.bf16.msra.mxu1 %v4348_v5 }
 0x2e0   :  { %914 = vst.msk [vmem:[#allocation4 + $0x12c] sm:$0xf] %vm337_vm8, %v906_v3 }
 0x2e1   :  { %930 = vst.msk [vmem:[#allocation4 + $0x12c] sm:$0xf] %vm358_vm9, %v922_v60 }
 0x2e2   :  { %945 = vst.msk [vmem:[#allocation4 + $0x138] sm:$0xf] %vm337_vm8, %v936_v2  ;;  %v3610_v2 = vor.u32 %v4249_v62, %v3609_v61 }
 0x2e3   :  { %2971 = vmatpush.bf16.msra.mxu1 %v4347_v6 }
 0x2e4   :  { %1075 = vrot.lane.b32.xlu0 %v5138_v36, %s4496_s9  ;;  %1079 = vrot.lane.b32.xlu2 %v4789_v4, %s4496_s9 }
 0x2e5   :  { %1091 = vrot.lane.b32.xlu1 %v4665_v47, %s4522_s30  ;;  %2923 = vmatmul.bf16.vlgmr.msra.gmra.mxu0 %v3610_v2 }
 0x2e6   :  { %v904_v7 = vpop.permute.xlu0 %903  ;;  %v950_v8 = vpop.permute.xlu2 %949  ;;  %v4358_v42 = vld [vmem:[#allocation4 + $0x118] sm:$0xff] }
 0x2e7   :  { %913 = vst.msk [vmem:[#allocation4 + $0x128] sm:$0xf] %vm337_vm8, %v904_v7  ;;  %v920_v9 = vpop.permute.xlu1 %919 }
 0x2e8   :  { %929 = vst.msk [vmem:[#allocation4 + $0x128] sm:$0xf] %vm358_vm9, %v920_v9  ;;  %v4259_v9 = vld [vmem:[%s7018_s3 + $0x7c] sm:$0xf0] }
 0x2ec   :  { %1081 = vrot.lane.b32.xlu0 %v4854_v26, %s4496_s9  ;;  %1093 = vrot.lane.b32.xlu2 %v4672_v49, %s4522_s30  ;;  %s4523_s9 = smov 103  }
 0x2ed   :  { %1097 = vrot.lane.b32.xlu1 %v4699_v54, %s4522_s30 }
 0x2ee   :  { %v918_v10 = vpop.permute.xlu0 %917  ;;  %v964_v11 = vpop.permute.xlu2 %963 }
 0x2ef   :  { %928 = vst.msk [vmem:[#allocation4 + $0x124] sm:$0xf] %vm358_vm9, %v918_v10  ;;  %v934_v12 = vpop.permute.xlu1 %933  ;;  %v4360_v37 = vld [vmem:[#allocation4 + $0x128] sm:$0xff] }
 0x2f0   :  { %944 = vst.msk [vmem:[#allocation4 + $0x134] sm:$0xf] %vm337_vm8, %v934_v12 }
 0x2f1   :  { %960 = vst.msk [vmem:[#allocation4 + $0x134] sm:$0xf] %vm358_vm9, %v950_v8  ;;  %v3649_v8 = vld [vmem:[%s7018_s3 + $0x58] sm:$0xf] }
 0x2f2   :  { %975 = vst.msk [vmem:[#allocation4 + $0x140] sm:$0xf] %vm337_vm8, %v964_v11  ;;  %v3650_v12 = vor.u32 %v4259_v9, %v3649_v8  ;;  %v4298_v8 = vld [vmem:[%s7018_s3 + $0x1b4] sm:$0xf0] }
 0x2f4   :  { %1095 = vrot.lane.b32.xlu0 %v4717_v57, %s4522_s30  ;;  %1107 = vrot.lane.b32.xlu2 %v5138_v36, %s4501_s14  ;;  %s4526_s30 = smov 100  }
 0x2f5   :  { %1111 = vrot.lane.b32.xlu1 %v4789_v4, %s4501_s14  ;;  %2928 = vmatmul.bf16.gmra.mxu0 %v3650_v12  ;;  %v3803_v12 = vld [vmem:[%s7018_s3 + $0x1b8] sm:$0xf0] }
 0x2f6   :  { %v932_v13 = vpop.permute.xlu0 %931  ;;  %v970_v14 = vpop.permute.xlu2 %969  ;;  %v4359_v38 = vld [vmem:[#allocation4 + $0x120] sm:$0xff] }
 0x2f7   :  { %943 = vst.msk [vmem:[#allocation4 + $0x130] sm:$0xf] %vm337_vm8, %v932_v13  ;;  %v948_v15 = vpop.permute.xlu1 %947 }
 0x2f8   :  { %959 = vst.msk [vmem:[#allocation4 + $0x130] sm:$0xf] %vm358_vm9, %v948_v15 }
 0x2f9   :  { %978 = vst.msk [vmem:[#allocation4 + $0x14c] sm:$0xf] %vm337_vm8, %v970_v14 }
 0x2fc   :  { %1109 = vrot.lane.b32.xlu0 %v4733_v58, %s4501_s14  ;;  %1113 = vrot.lane.b32.xlu2 %v4854_v26, %s4501_s14 }
 0x2fd   :  { %1125 = vrot.lane.b32.xlu1 %v4672_v49, %s4523_s9 }
 0x2fe   :  { %v938_v16 = vpop.permute.xlu0 %937  ;;  %v984_v17 = vpop.permute.xlu2 %983 }
 0x2ff   :  { %946 = vst.msk [vmem:[#allocation4 + $0x13c] sm:$0xf] %vm337_vm8, %v938_v16  ;;  %v954_v18 = vpop.permute.xlu1 %953  ;;  %v4361_v30 = vld [vmem:[#allocation4 + $0x130] sm:$0xff] }
 0x300   :  { %962 = vst.msk [vmem:[#allocation4 + $0x13c] sm:$0xf] %vm358_vm9, %v954_v18  ;;  %v4269_v18 = vld [vmem:[%s7018_s3 + $0xcc] sm:$0xf0] }
 0x304   :  { %1123 = vrot.lane.b32.xlu0 %v4665_v47, %s4523_s9  ;;  %1127 = vrot.lane.b32.xlu2 %v4717_v57, %s4523_s9 }
 0x305   :  { %1139 = vrot.lane.b32.xlu1 %v5138_v36, %s4500_s13 }
 0x306   :  { %v952_v21 = vpop.permute.xlu0 %951  ;;  %v998_v22 = vpop.permute.xlu2 %997 }
 0x307   :  { %961 = vst.msk [vmem:[#allocation4 + $0x138] sm:$0xf] %vm358_vm9, %v952_v21  ;;  %v968_v24 = vpop.permute.xlu1 %967 }
 0x308   :  { %977 = vst.msk [vmem:[#allocation4 + $0x148] sm:$0xf] %vm337_vm8, %v968_v24  ;;  %v4278_v24 = vld [vmem:[%s7018_s3 + $0x114] sm:$0xf0] }
 0x309   :  { %993 = vst.msk [vmem:[#allocation4 + $0x148] sm:$0xf] %vm358_vm9, %v984_v17  ;;  %v3689_v17 = vld [vmem:[%s7018_s3 + $0xa8] sm:$0xf] }
 0x30a   :  { %1008 = vst.msk [vmem:[#allocation4 + $0x154] sm:$0xf] %vm337_vm8, %v998_v22  ;;  %v3690_v21 = vor.u32 %v4269_v18, %v3689_v17 }
 0x30c   :  { %1129 = vrot.lane.b32.xlu0 %v4699_v54, %s4523_s9  ;;  %1141 = vrot.lane.b32.xlu2 %v4733_v58, %s4500_s13  ;;  %s4531_s9 = smov 94  }
 0x30d   :  { %1145 = vrot.lane.b32.xlu1 %v4854_v26, %s4500_s13  ;;  %2933 = vmatmul.bf16.gmra.mxu0 %v3690_v21 }
 0x30e   :  { %v966_v25 = vpop.permute.xlu0 %965  ;;  %v1012_v27 = vpop.permute.xlu2 %1011  ;;  %v4362_v28 = vld [vmem:[#allocation4 + $0x138] sm:$0xff] }
 0x30f   :  { %976 = vst.msk [vmem:[#allocation4 + $0x144] sm:$0xf] %vm337_vm8, %v966_v25  ;;  %v982_v29 = vpop.permute.xlu1 %981  ;;  %3013 = vmatpush.bf16.msrb.mxu2 %v4362_v28  ;;  %v3722_v25 = vor.u32 %v4278_v24, %v3721_v23  ;;  %v3723_v28 = vld [vmem:[%s7018_s3 + $0x118] sm:$0xf0] }
 0x310   :  { %992 = vst.msk [vmem:[#allocation4 + $0x144] sm:$0xf] %vm358_vm9, %v982_v29 }
 0x311   :  { %2840 = vmatmul.bf16.vlgmr.msra.gmra.mxu2 %v3722_v25  ;;  %v4253_v25 = vld [vmem:[%s7018_s3 + $0x54] sm:$0xf] }
 0x313   :  { %3014 = vmatpush.bf16.msrb.mxu2 %v4361_v30 }
 0x314   :  { %1143 = vrot.lane.b32.xlu0 %v4789_v4, %s4500_s13  ;;  %1155 = vrot.lane.b32.xlu2 %v4665_v47, %s4524_s23  ;;  %s4525_s13 = smov 101  }
 0x315   :  { %1159 = vrot.lane.b32.xlu1 %v4717_v57, %s4524_s23 }
 0x316   :  { %v980_v33 = vpop.permute.xlu0 %979  ;;  %v1018_v51 = vpop.permute.xlu2 %1017 }
 0x317   :  { %991 = vst.msk [vmem:[#allocation4 + $0x140] sm:$0xf] %vm358_vm9, %v980_v33  ;;  %v996_v35 = vpop.permute.xlu1 %995  ;;  %3015 = vmatpush.bf16.msrb.mxu2 %v4360_v37  ;;  %v3729_v33 = vld [vmem:[%s7018_s3 + $0xf8] sm:$0xf] }
 0x318   :  { %1007 = vst.msk [vmem:[#allocation4 + $0x150] sm:$0xf] %vm337_vm8, %v996_v35 }
 0x319   :  { %1023 = vst.msk [vmem:[#allocation4 + $0x150] sm:$0xf] %vm358_vm9, %v1012_v27  ;;  %v4273_v27 = vld [vmem:[%s7018_s3 + $0xf4] sm:$0xf] }
 0x31a   :  { %v3726_v31 = vor.u32 %v4273_v27, %v3723_v28  ;;  %v3643_v27 = vld [vmem:[%s7018_s3 + $0x78] sm:$0xf0] }
 0x31b   :  { %3016 = vmatpush.bf16.msrb.mxu2 %v4359_v38  ;;  %v3646_v28 = vor.u32 %v4253_v25, %v3643_v27  ;;  %v3651_v25 = vld [vmem:[%s7018_s3 + $0x80] sm:$0xf0] }
 0x31c   :  { %1157 = vrot.lane.b32.xlu0 %v4672_v49, %s4524_s23  ;;  %1161 = vrot.lane.b32.xlu2 %v4699_v54, %s4524_s23 }
 0x31d   :  { %1173 = vrot.lane.b32.xlu1 %v4733_v58, %s4502_s15  ;;  %2889 = vmatmul.bf16.vlgmr.msra.gmra.mxu3 %v3726_v31 }
 0x31e   :  { %v986_v39 = vpop.permute.xlu0 %985  ;;  %v1032_v40 = vpop.permute.xlu2 %1031  ;;  %v4363_v18 = vld [vmem:[#allocation4 + $0x140] sm:$0xff] }
 0x31f   :  { %994 = vst.msk [vmem:[#allocation4 + $0x14c] sm:$0xf] %vm358_vm9, %v986_v39  ;;  %v1002_v41 = vpop.permute.xlu1 %1001  ;;  %3017 = vmatpush.bf16.msrb.mxu2 %v4358_v42 }
 0x320   :  { %1010 = vst.msk [vmem:[#allocation4 + $0x15c] sm:$0xf] %vm337_vm8, %v1002_v41  ;;  %v4288_v41 = vld [vmem:[%s7018_s3 + $0x164] sm:$0xf0] }
 0x321   :  { %1026 = vst.msk [vmem:[#allocation4 + $0x15c] sm:$0xf] %vm358_vm9, %v1018_v51  ;;  %v4279_v51 = vld [vmem:[%s7018_s3 + $0x11c] sm:$0xf0] }
 0x322   :  { %1041 = vst.msk [vmem:[#allocation4 + $0x168] sm:$0xf] %vm337_vm8, %v1032_v40  ;;  %v3730_v38 = vor.u32 %v4279_v51, %v3729_v33  ;;  %v3761_v40 = vld [vmem:[%s7018_s3 + $0x140] sm:$0xf]  ;;  %v3843_v33 = vld [vmem:[%s7018_s3 + $0x208] sm:$0xf0] }
 0x323   :  { %3018 = vmatpush.bf16.msrb.mxu2 %v4357_v43  ;;  %v3762_v43 = vor.u32 %v4288_v41, %v3761_v40 }
 0x324   :  { %1171 = vrot.lane.b32.xlu0 %v5138_v36, %s4502_s15  ;;  %1175 = vrot.lane.b32.xlu2 %v4789_v4, %s4502_s15 }
 0x325   :  { %1187 = vrot.lane.b32.xlu1 %v4665_v47, %s4525_s13  ;;  %2938 = vmatmul.bf16.gmra.mxu0 %v3730_v38  ;;  %v3849_v38 = vld [vmem:[%s7018_s3 + $0x1e8] sm:$0xf] }
 0x326   :  { %v1000_v46 = vpop.permute.xlu0 %999  ;;  %v1046_v48 = vpop.permute.xlu2 %1045  ;;  %2845 = vmatmul.bf16.gmra.mxu2 %v3762_v43  ;;  %v4364_v17 = vld [vmem:[#allocation4 + $0x148] sm:$0xff] }
 0x327   :  { %1009 = vst.msk [vmem:[#allocation4 + $0x158] sm:$0xf] %vm337_vm8, %v1000_v46  ;;  %v1016_v52 = vpop.permute.xlu1 %1015  ;;  %3019 = vmatpush.bf16.msrb.mxu2 %v4356_v53  ;;  %v3763_v46 = vld [vmem:[%s7018_s3 + $0x168] sm:$0xf0] }
 0x328   :  { %1025 = vst.msk [vmem:[#allocation4 + $0x158] sm:$0xf] %vm358_vm9, %v1016_v52  ;;  %v3766_v52 = vor.u32 %v4283_v45, %v3763_v46  ;;  %v4263_v45 = vld [vmem:[%s7018_s3 + $0xa4] sm:$0xf]  ;;  %v3683_v46 = vld [vmem:[%s7018_s3 + $0xc8] sm:$0xf0] }
 0x32b   :  { %3020 = vmatpush.bf16.msrb.mxu2 %v4355_v55 }
 0x32c   :  { %1177 = vrot.lane.b32.xlu0 %v4854_v26, %s4502_s15  ;;  %1189 = vrot.lane.b32.xlu2 %v4672_v49, %s4525_s13  ;;  %s4532_s15 = smov 90  }
 0x32d   :  { %1193 = vrot.lane.b32.xlu1 %v4699_v54, %s4525_s13  ;;  %2894 = vmatmul.bf16.gmra.mxu3 %v3766_v52  ;;  %v4318_v52 = vld [vmem:[%s7018_s3 + $0x254] sm:$0xf0] }
 0x32e   :  { %v1014_v56 = vpop.permute.xlu0 %1013  ;;  %v1060_v59 = vpop.permute.xlu2 %1059 }
 0x32f   :  { %1024 = vst.msk [vmem:[#allocation4 + $0x154] sm:$0xf] %vm358_vm9, %v1014_v56  ;;  %v1030_v60 = vpop.permute.xlu1 %1029  ;;  %v4366_v2 = vld [vmem:[#allocation4 + $0x158] sm:$0xff] }
 0x330   :  { %1040 = vst.msk [vmem:[#allocation4 + $0x164] sm:$0xf] %vm337_vm8, %v1030_v60  ;;  %v4289_v60 = vld [vmem:[%s7018_s3 + $0x16c] sm:$0xf0] }
 0x331   :  { %1056 = vst.msk [vmem:[#allocation4 + $0x164] sm:$0xf] %vm358_vm9, %v1046_v48 }
 0x332   :  { %1071 = vst.msk [vmem:[#allocation4 + $0x170] sm:$0xf] %vm337_vm8, %v1060_v59  ;;  %v3769_v59 = vld [vmem:[%s7018_s3 + $0x148] sm:$0xf] }
 0x334   :  { %1191 = vrot.lane.b32.xlu0 %v4717_v57, %s4525_s13  ;;  %1203 = vrot.lane.b32.xlu2 %v5138_v36, %s4506_s19 }
 0x335   :  { %1207 = vrot.lane.b32.xlu1 %v4789_v4, %s4506_s19 }
 0x336   :  { %v1028_v63 = vpop.permute.xlu0 %1027  ;;  %v1066_v1 = vpop.permute.xlu2 %1065 }
 0x337   :  { %1039 = vst.msk [vmem:[#allocation4 + $0x160] sm:$0xf] %vm337_vm8, %v1028_v63  ;;  %v1044_v3 = vpop.permute.xlu1 %1043  ;;  %v3770_v63 = vor.u32 %v4289_v60, %v3769_v59 }
 0x338   :  { %1055 = vst.msk [vmem:[#allocation4 + $0x160] sm:$0xf] %vm358_vm9, %v1044_v3  ;;  %v4243_v3 = vld [vmem:[%s7018_s3 + $0x4] sm:$0xf] }
 0x339   :  { %1074 = vst.msk [vmem:[#allocation4 + $0x17c] sm:$0xf] %vm337_vm8, %v1066_v1  ;;  %2943 = vmatmul.bf16.gmra.mxu0 %v3770_v63  ;;  %v3889_v63 = vld [vmem:[%s7018_s3 + $0x238] sm:$0xf] }
 0x33c   :  { %1205 = vrot.lane.b32.xlu0 %v4733_v58, %s4506_s19  ;;  %1209 = vrot.lane.b32.xlu2 %v4854_v26, %s4506_s19 }
 0x33d   :  { %1221 = vrot.lane.b32.xlu1 %v4672_v49, %s4526_s30 }
 0x33e   :  { %v1034_v5 = vpop.permute.xlu0 %1033  ;;  %v1080_v6 = vpop.permute.xlu2 %1079 }
 0x33f   :  { %1042 = vst.msk [vmem:[#allocation4 + $0x16c] sm:$0xf] %vm337_vm8, %v1034_v5  ;;  %v1050_v7 = vpop.permute.xlu1 %1049  ;;  %v4367_v56 = vld [vmem:[#allocation4 + $0x160] sm:$0xff] }
 0x340   :  { %1058 = vst.msk [vmem:[#allocation4 + $0x16c] sm:$0xf] %vm358_vm9, %v1050_v7  ;;  %v3603_v5 = vld [vmem:[%s7018_s3 + $0x28] sm:$0xf0]  ;;  %v3801_v7 = vld [vmem:[%s7018_s3 + $0x190] sm:$0xf] }
 0x341   :  { %v3802_v9 = vor.u32 %v4298_v8, %v3801_v7  ;;  %v4244_v7 = vld [vmem:[%s7018_s3 + $0xc] sm:$0xf]  ;;  %v3611_v8 = vld [vmem:[%s7018_s3 + $0x30] sm:$0xf0] }
 0x343   :  { %2850 = vmatmul.bf16.gmra.mxu2 %v3802_v9  ;;  %v3614_v9 = vor.u32 %v4244_v7, %v3611_v8 }
 0x344   :  { %1219 = vrot.lane.b32.xlu0 %v4665_v47, %s4526_s30  ;;  %1223 = vrot.lane.b32.xlu2 %v4717_v57, %s4526_s30 }
 0x345   :  { %1235 = vrot.lane.b32.xlu1 %v5138_v36, %s4507_s20 }
 0x346   :  { %v1048_v10 = vpop.permute.xlu0 %1047  ;;  %v1094_v11 = vpop.permute.xlu2 %1093 }
 0x347   :  { %1057 = vst.msk [vmem:[#allocation4 + $0x168] sm:$0xf] %vm358_vm9, %v1048_v10  ;;  %v1064_v13 = vpop.permute.xlu1 %1063  ;;  %v4365_v10 = vld [vmem:[#allocation4 + $0x150] sm:$0xff] }
 0x348   :  { %1073 = vst.msk [vmem:[#allocation4 + $0x178] sm:$0xf] %vm337_vm8, %v1064_v13 }
 0x349   :  { %1089 = vst.msk [vmem:[#allocation4 + $0x178] sm:$0xf] %vm358_vm9, %v1080_v6  ;;  %v3606_v6 = vor.u32 %v4243_v3, %v3603_v5 }
 0x34a   :  { %1104 = vst.msk [vmem:[#allocation4 + $0x184] sm:$0xf] %vm337_vm8, %v1094_v11  ;;  %v4293_v11 = vld [vmem:[%s7018_s3 + $0x194] sm:$0xf] }
 0x34b   :  { %2874 = vmatmul.bf16.vlgmr.msrb.gmra.mxu1 %v3606_v6 }
 0x34c   :  { %1225 = vrot.lane.b32.xlu0 %v4699_v54, %s4526_s30  ;;  %1237 = vrot.lane.b32.xlu2 %v4733_v58, %s4507_s20 }
 0x34d   :  { %1241 = vrot.lane.b32.xlu1 %v4854_v26, %s4507_s20 }
 0x34e   :  { %v1062_v14 = vpop.permute.xlu0 %1061  ;;  %v1108_v15 = vpop.permute.xlu2 %1107  ;;  %v4368_v55 = vld [vmem:[#allocation4 + $0x168] sm:$0xff] }
 0x34f   :  { %1072 = vst.msk [vmem:[#allocation4 + $0x174] sm:$0xf] %vm337_vm8, %v1062_v14  ;;  %v1078_v16 = vpop.permute.xlu1 %1077 }
 0x350   :  { %1088 = vst.msk [vmem:[#allocation4 + $0x174] sm:$0xf] %vm358_vm9, %v1078_v16 }
 0x354   :  { %1239 = vrot.lane.b32.xlu0 %v4789_v4, %s4507_s20  ;;  %1251 = vrot.lane.b32.xlu2 %v4665_v47, %s4527_s18 }
 0x355   :  { %1255 = vrot.lane.b32.xlu1 %v4717_v57, %s4527_s18 }
 0x356   :  { %v1076_v19 = vpop.permute.xlu0 %1075  ;;  %v1114_v20 = vpop.permute.xlu2 %1113 }
 0x357   :  { %1087 = vst.msk [vmem:[#allocation4 + $0x170] sm:$0xf] %vm358_vm9, %v1076_v19  ;;  %v1092_v22 = vpop.permute.xlu1 %1091  ;;  %v3809_v19 = vld [vmem:[%s7018_s3 + $0x198] sm:$0xf] }
 0x358   :  { %1103 = vst.msk [vmem:[#allocation4 + $0x180] sm:$0xf] %vm337_vm8, %v1092_v22 }
 0x359   :  { %1119 = vst.msk [vmem:[#allocation4 + $0x180] sm:$0xf] %vm358_vm9, %v1108_v15  ;;  %v3806_v15 = vor.u32 %v4293_v11, %v3803_v12  ;;  %v4250_v11 = vld [vmem:[%s7018_s3 + $0x34] sm:$0xf0] }
 0x35b   :  { %2899 = vmatmul.bf16.gmra.mxu3 %v3806_v15  ;;  %2879 = vmatmul.bf16.gmra.mxu1 %v3646_v28  ;;  %v3657_v28 = vld [vmem:[%s7018_s3 + $0x60] sm:$0xf] }
 0x35c   :  { %1253 = vrot.lane.b32.xlu0 %v4672_v49, %s4527_s18  ;;  %1257 = vrot.lane.b32.xlu2 %v4699_v54, %s4527_s18  ;;  %s4528_s18 = smov 98  }
 0x35d   :  { %1269 = vrot.lane.b32.xlu1 %v4733_v58, %s4509_s22 }
 0x35e   :  { %v1082_v29 = vpop.permute.xlu0 %1081  ;;  %v1128_v30 = vpop.permute.xlu2 %1127  ;;  %v4369_v42 = vld [vmem:[#allocation4 + $0x170] sm:$0xff] }
 0x35f   :  { %1090 = vst.msk [vmem:[#allocation4 + $0x17c] sm:$0xf] %vm358_vm9, %v1082_v29  ;;  %v1098_v32 = vpop.permute.xlu1 %1097  ;;  %v3841_v29 = vld [vmem:[%s7018_s3 + $0x1e0] sm:$0xf] }
 0x360   :  { %1106 = vst.msk [vmem:[#allocation4 + $0x18c] sm:$0xf] %vm337_vm8, %v1098_v32  ;;  %v4303_v32 = vld [vmem:[%s7018_s3 + $0x1e4] sm:$0xf] }
 0x361   :  { %1122 = vst.msk [vmem:[#allocation4 + $0x18c] sm:$0xf] %vm358_vm9, %v1114_v20  ;;  %v4299_v20 = vld [vmem:[%s7018_s3 + $0x1bc] sm:$0xf0] }
 0x362   :  { %1137 = vst.msk [vmem:[#allocation4 + $0x198] sm:$0xf] %vm337_vm8, %v1128_v30  ;;  %v3810_v23 = vor.u32 %v4299_v20, %v3809_v19  ;;  %v4308_v30 = vld [vmem:[%s7018_s3 + $0x204] sm:$0xf0] }
 0x363   :  { %v3842_v31 = vor.u32 %v4308_v30, %v3841_v29  ;;  %v4260_v29 = vld [vmem:[%s7018_s3 + $0x84] sm:$0xf0] }
 0x364   :  { %1267 = vrot.lane.b32.xlu0 %v5138_v36, %s4509_s22  ;;  %1271 = vrot.lane.b32.xlu2 %v4789_v4, %s4509_s22 }
 0x365   :  { %1283 = vrot.lane.b32.xlu1 %v4665_v47, %s4528_s18  ;;  %2948 = vmatmul.bf16.gmra.mxu0 %v3810_v23 }
 0x366   :  { %v1096_v34 = vpop.permute.xlu0 %1095  ;;  %v1142_v35 = vpop.permute.xlu2 %1141  ;;  %v4370_v37 = vld [vmem:[#allocation4 + $0x178] sm:$0xff]  ;;  %2855 = vmatmul.bf16.gmra.mxu2 %v3842_v31  ;;  %v3658_v31 = vor.u32 %v4260_v29, %v3657_v28 }
 0x367   :  { %1105 = vst.msk [vmem:[#allocation4 + $0x188] sm:$0xf] %vm337_vm8, %v1096_v34  ;;  %v1112_v39 = vpop.permute.xlu1 %1111  ;;  %3062 = vmatpush.bf16.msrb.mxu3 %v4370_v37 }
 0x368   :  { %1121 = vst.msk [vmem:[#allocation4 + $0x188] sm:$0xf] %vm358_vm9, %v1112_v39  ;;  %v4309_v39 = vld [vmem:[%s7018_s3 + $0x20c] sm:$0xf0] }
 0x36b   :  { %3063 = vmatpush.bf16.msrb.mxu3 %v4369_v42  ;;  %v3850_v42 = vor.u32 %v4309_v39, %v3849_v38  ;;  %v5595_v39 = vpop.f32.mrf.mxu0 }
 0x36c   :  { %1273 = vrot.lane.b32.xlu0 %v4854_v26, %s4509_s22  ;;  %1285 = vrot.lane.b32.xlu2 %v4672_v49, %s4528_s18  ;;  %s4533_s22 = smov 95  }
 0x36d   :  { %1577 = vrot.lane.b32.xlu1 %v5384_v44, %s4489_s25 }
 0x36e   :  { %v1110_v48 = vpop.permute.xlu0 %1109  ;;  %v1156_v50 = vpop.permute.xlu2 %1155 }
 0x36f   :  { %1120 = vst.msk [vmem:[#allocation4 + $0x184] sm:$0xf] %vm358_vm9, %v1110_v48  ;;  %v1126_v53 = vpop.permute.xlu1 %1125  ;;  %3064 = vmatpush.bf16.msrb.mxu3 %v4368_v55  ;;  %v3686_v48 = vor.u32 %v4263_v45, %v3683_v46  ;;  %v4313_v55 = vld [vmem:[%s7018_s3 + $0x234] sm:$0xf]  ;;  %v4264_v46 = vld [vmem:[%s7018_s3 + $0xac] sm:$0xf] }
 0x370   :  { %1136 = vst.msk [vmem:[#allocation4 + $0x194] sm:$0xf] %vm337_vm8, %v1126_v53 }
 0x371   :  { %1152 = vst.msk [vmem:[#allocation4 + $0x194] sm:$0xf] %vm358_vm9, %v1142_v35  ;;  %v3846_v35 = vor.u32 %v4303_v32, %v3843_v33  ;;  %2884 = vmatmul.bf16.gmra.mxu1 %v3686_v48  ;;  %v4255_v32 = vld [vmem:[%s7018_s3 + $0x64] sm:$0xf]  ;;  %v3659_v33 = vld [vmem:[%s7018_s3 + $0x88] sm:$0xf0] }
 0x372   :  { %1167 = vst.msk [vmem:[#allocation4 + $0x1a0] sm:$0xf] %vm337_vm8, %v1156_v50  ;;  %v3881_v50 = vld [vmem:[%s7018_s3 + $0x230] sm:$0xf]  ;;  %v3691_v48 = vld [vmem:[%s7018_s3 + $0xd0] sm:$0xf0] }
 0x373   :  { %3065 = vmatpush.bf16.msrb.mxu3 %v4367_v56  ;;  %v3882_v53 = vor.u32 %v4318_v52, %v3881_v50  ;;  %v3883_v56 = vld [vmem:[%s7018_s3 + $0x258] sm:$0xf0]  ;;  %v3694_v50 = vor.u32 %v4264_v46, %v3691_v48  ;;  %v4372_v52 = vld [vmem:[#allocation4 + $0x188] sm:$0xff]  ;;  %v3705_v48 = vld [vmem:[%s7018_s3 + $0xb8] sm:$0xf] }
 0x374   :  { %1573 = vrot.lane.b32.xlu0 %v5384_v44, %s4484_s1  ;;  %1287 = vrot.lane.b32.xlu2 %v4717_v57, %s4528_s18 }
 0x375   :  { %1299 = vrot.lane.b32.xlu1 %v5138_v36, %s4511_s27  ;;  %2904 = vmatmul.bf16.gmra.mxu3 %v3846_v35 }
 0x376   :  { %v1124_v61 = vpop.permute.xlu0 %1123  ;;  %v1162_v62 = vpop.permute.xlu2 %1161  ;;  %2953 = vmatmul.bf16.gmra.mxu0 %v3850_v42  ;;  %2860 = vmatmul.bf16.gmra.mxu2 %v3882_v53 }
 0x377   :  { %1135 = vst.msk [vmem:[#allocation4 + $0x190] sm:$0xf] %vm337_vm8, %v1124_v61  ;;  %v1140_v1 = vpop.permute.xlu1 %1139  ;;  %3066 = vmatpush.bf16.msrb.mxu3 %v4366_v2  ;;  %v3886_v61 = vor.u32 %v4313_v55, %v3883_v56  ;;  %v5611_v53 = vpop.f32.mrf.mxu0  ;;  %v3625_v55 = vld [vmem:[%s7018_s3 + $0x18] sm:$0xf]  ;;  %v4251_v56 = vld [vmem:[%s7018_s3 + $0x3c] sm:$0xf0] }
 0x378   :  { %1151 = vst.msk [vmem:[#allocation4 + $0x190] sm:$0xf] %vm358_vm9, %v1140_v1  ;;  %v4319_v1 = vld [vmem:[%s7018_s3 + $0x25c] sm:$0xf0]  ;;  %v3626_v7 = vor.u32 %v4251_v56, %v3625_v55  ;;  %v4285_v55 = vld [vmem:[%s7018_s3 + $0x154] sm:$0xf] }
 0x379   :  { %1170 = vst.msk [vmem:[#allocation4 + $0x1ac] sm:$0xf] %vm337_vm8, %v1162_v62  ;;  %v3890_v5 = vor.u32 %v4319_v1, %v3889_v63  ;;  %v3699_v63 = vld [vmem:[%s7018_s3 + $0xd8] sm:$0xf0] }
 0x37a   :  { %v3779_v56 = vld [vmem:[%s7018_s3 + $0x178] sm:$0xf0] }
 0x37b   :  { %3067 = vmatpush.bf16.msrb.mxu3 %v4365_v10  ;;  %v3617_v10 = vld [vmem:[%s7018_s3 + $0x10] sm:$0xf] }
 0x37c   :  { %1289 = vrot.lane.b32.xlu0 %v4699_v54, %s4528_s18  ;;  %1301 = vrot.lane.b32.xlu2 %v4733_v58, %s4511_s27  ;;  %s4529_s18 = smov 97   ;;  %v3618_v12 = vor.u32 %v4250_v11, %v3617_v10 }
 0x37d   :  { %1305 = vrot.lane.b32.xlu1 %v4854_v26, %s4511_s27 }
 0x37e   :  { %v1130_v13 = vpop.permute.xlu0 %1129  ;;  %v1176_v14 = vpop.permute.xlu2 %1175 }
 0x37f   :  { %1138 = vst.msk [vmem:[#allocation4 + $0x19c] sm:$0xf] %vm337_vm8, %v1130_v13  ;;  %v1146_v16 = vpop.permute.xlu1 %1145  ;;  %3068 = vmatpush.bf16.msrb.mxu3 %v4364_v17  ;;  %v4245_v13 = vld [vmem:[%s7018_s3 + $0x14] sm:$0xf]  ;;  %v5640_v8 = vpop.f32.mrf.mxu0 }
 0x380   :  { %1154 = vst.msk [vmem:[#allocation4 + $0x19c] sm:$0xf] %vm358_vm9, %v1146_v16 }
 0x381   :  { %2972 = vmatmul.bf16.vlgmr.msra.gmra.mxu1 %v3614_v9 }
 0x383   :  { %3069 = vmatpush.bf16.msrb.mxu3 %v4363_v18 }
 0x384   :  { %1303 = vrot.lane.b32.xlu0 %v4789_v4, %s4511_s27  ;;  %1315 = vrot.lane.b32.xlu2 %v4665_v47, %s4529_s18  ;;  %s4536_s27 = smov 92  }
 0x385   :  { %1319 = vrot.lane.b32.xlu1 %v4717_v57, %s4529_s18  ;;  %2909 = vmatmul.bf16.gmra.mxu3 %v3886_v61 }
 0x386   :  { %v1144_v21 = vpop.permute.xlu0 %1143  ;;  %v1190_v22 = vpop.permute.xlu2 %1189  ;;  %2958 = vmatmul.bf16.gmra.mxu0 %v3890_v5  ;;  %3021 = vmatmul.bf16.vlgmr.msrb.gmra.mxu2 %v3618_v12  ;;  %v4274_v12 = vld [vmem:[%s7018_s3 + $0xfc] sm:$0xf] }
 0x387   :  { %1153 = vst.msk [vmem:[#allocation4 + $0x198] sm:$0xf] %vm358_vm9, %v1144_v21  ;;  %v1160_v24 = vpop.permute.xlu1 %1159 }
 0x388   :  { %1169 = vst.msk [vmem:[#allocation4 + $0x1a8] sm:$0xf] %vm337_vm8, %v1160_v24  ;;  %v4254_v24 = vld [vmem:[%s7018_s3 + $0x5c] sm:$0xf] }
 0x389   :  { %1185 = vst.msk [vmem:[#allocation4 + $0x1a8] sm:$0xf] %vm358_vm9, %v1176_v14  ;;  %v3619_v14 = vld [vmem:[%s7018_s3 + $0x38] sm:$0xf0]  ;;  %v3654_v27 = vor.u32 %v4254_v24, %v3651_v25  ;;  %v5675_v25 = vpop.f32.mrf.mxu0 }
 0x38a   :  { %1200 = vst.msk [vmem:[#allocation4 + $0x1b4] sm:$0xf] %vm337_vm8, %v1190_v22  ;;  %v3622_v17 = vor.u32 %v4245_v13, %v3619_v14  ;;  %v3731_v13 = vld [vmem:[%s7018_s3 + $0x120] sm:$0xf0] }
 0x38b   :  { %v3734_v14 = vor.u32 %v4274_v12, %v3731_v13  ;;  %v3817_v13 = vld [vmem:[%s7018_s3 + $0x1a0] sm:$0xf] }
 0x38c   :  { %1317 = vrot.lane.b32.xlu0 %v4672_v49, %s4529_s18  ;;  %1321 = vrot.lane.b32.xlu2 %v4699_v54, %s4529_s18  ;;  %s4530_s18 = smov 93  }
 0x38d   :  { %1333 = vrot.lane.b32.xlu1 %v4733_v58, %s4513_s29 }
 0x38e   :  { %v1158_v51 = vpop.permute.xlu0 %1157  ;;  %v1204_v34 = vpop.permute.xlu2 %1203 }
 0x38f   :  { %1168 = vst.msk [vmem:[#allocation4 + $0x1a4] sm:$0xf] %vm337_vm8, %v1158_v51  ;;  %v1174_v37 = vpop.permute.xlu1 %1173 }
 0x390   :  { %1184 = vst.msk [vmem:[#allocation4 + $0x1a4] sm:$0xf] %vm358_vm9, %v1174_v37  ;;  %v3662_v37 = vor.u32 %v4255_v32, %v3659_v33 }
 0x391   :  { %2977 = vmatmul.bf16.gmra.mxu1 %v3654_v27 }
 0x394   :  { %1331 = vrot.lane.b32.xlu0 %v5138_v36, %s4513_s29  ;;  %1447 = vrot.lane.b32.xlu2 %v4717_v57, %s4530_s18  ;;  %v5679_v29 = vpop.f32.mrf.mxu2 }
 0x395   :  { %1463 = vrot.lane.b32.xlu1 %v4789_v4, %s4517_s12  ;;  %3070 = vmatmul.bf16.vlgmr.msrb.gmra.mxu3 %v3622_v17  ;;  %7025 = vst [vmem:[#allocation5_spill] sm:$0xff] %v5679_v29 }
 0x396   :  { %v1172_v40 = vpop.permute.xlu0 %1171  ;;  %v1210_v41 = vpop.permute.xlu2 %1209  ;;  %3026 = vmatmul.bf16.gmra.mxu2 %v3658_v31 }
 0x397   :  { %1183 = vst.msk [vmem:[#allocation4 + $0x1a0] sm:$0xf] %vm358_vm9, %v1172_v40  ;;  %v1188_v43 = vpop.permute.xlu1 %1187  ;;  %v4374_v40 = vld [vmem:[#allocation4 + $0x198] sm:$0xff] }
 0x398   :  { %1199 = vst.msk [vmem:[#allocation4 + $0x1b0] sm:$0xf] %vm337_vm8, %v1188_v43  ;;  %v4373_v43 = vld [vmem:[#allocation4 + $0x190] sm:$0xff] }
 0x399   :  { %1215 = vst.msk [vmem:[#allocation4 + $0x1b0] sm:$0xf] %vm358_vm9, %v1204_v34 }
 0x39c   :  { %1449 = vrot.lane.b32.xlu0 %v4699_v54, %s4530_s18  ;;  %1465 = vrot.lane.b32.xlu2 %v4854_v26, %s4517_s12 }
 0x39d   :  { %1445 = vrot.lane.b32.xlu1 %v4672_v49, %s4530_s18 }
 0x39e   :  { %v1178_v59 = vpop.permute.xlu0 %1177  ;;  %v1224_v60 = vpop.permute.xlu2 %1223  ;;  %v4375_v35 = vld [vmem:[#allocation4 + $0x1a0] sm:$0xff] }
 0x39f   :  { %1186 = vst.msk [vmem:[#allocation4 + $0x1ac] sm:$0xf] %vm358_vm9, %v1178_v59  ;;  %v1194_v62 = vpop.permute.xlu1 %1193  ;;  %v3697_v59 = vld [vmem:[%s7018_s3 + $0xb0] sm:$0xf] }
 0x3a0   :  { %1202 = vst.msk [vmem:[#allocation4 + $0x1bc] sm:$0xf] %vm337_vm8, %v1194_v62  ;;  %v4265_v62 = vld [vmem:[%s7018_s3 + $0xb4] sm:$0xf] }
 0x3a1   :  { %1218 = vst.msk [vmem:[#allocation4 + $0x1bc] sm:$0xf] %vm358_vm9, %v1210_v41  ;;  %2982 = vmatmul.bf16.gmra.mxu1 %v3694_v50  ;;  %v3702_v5 = vor.u32 %v4265_v62, %v3699_v63  ;;  %v4271_v50 = vld [vmem:[%s7018_s3 + $0xdc] sm:$0xf0] }
 0x3a2   :  { %1233 = vst.msk [vmem:[#allocation4 + $0x1c8] sm:$0xf] %vm337_vm8, %v1224_v60  ;;  %v4270_v60 = vld [vmem:[%s7018_s3 + $0xd4] sm:$0xf0]  ;;  %v3706_v63 = vor.u32 %v4271_v50, %v3705_v48  ;;  %v3857_v48 = vld [vmem:[%s7018_s3 + $0x1f0] sm:$0xf] }
 0x3a3   :  { %v3698_v61 = vor.u32 %v4270_v60, %v3697_v59  ;;  %v4310_v50 = vld [vmem:[%s7018_s3 + $0x214] sm:$0xf0] }
 0x3a4   :  { %1443 = vrot.lane.b32.xlu0 %v4665_v47, %s4530_s18  ;;  %1335 = vrot.lane.b32.xlu2 %v4789_v4, %s4513_s29 }
 0x3a5   :  { %1459 = vrot.lane.b32.xlu1 %v5138_v36, %s4517_s12  ;;  %3075 = vmatmul.bf16.gmra.mxu3 %v3662_v37  ;;  %v3771_v37 = vld [vmem:[%s7018_s3 + $0x170] sm:$0xf0] }
 0x3a6   :  { %v1192_v2 = vpop.permute.xlu0 %1191  ;;  %v1238_v3 = vpop.permute.xlu2 %1237  ;;  %v4376_v30 = vld [vmem:[#allocation4 + $0x1a8] sm:$0xff]  ;;  %3031 = vmatmul.bf16.gmra.mxu2 %v3698_v61  ;;  %v3782_v61 = vor.u32 %v4285_v55, %v3779_v56  ;;  %v3858_v56 = vor.u32 %v4310_v50, %v3857_v48 }
 0x3a7   :  { %1201 = vst.msk [vmem:[#allocation4 + $0x1b8] sm:$0xf] %vm337_vm8, %v1192_v2  ;;  %v1208_v6 = vpop.permute.xlu1 %1207 }
 0x3a8   :  { %1217 = vst.msk [vmem:[#allocation4 + $0x1b8] sm:$0xf] %vm358_vm9, %v1208_v6 }
 0x3ac   :  { %1337 = vrot.lane.b32.xlu0 %v4854_v26, %s4513_s29  ;;  %1461 = vrot.lane.b32.xlu2 %v4733_v58, %s4517_s12 }
 0x3ad   :  { %1415 = vrot.lane.b32.xlu1 %v4717_v57, %s4531_s9 }
 0x3ae   :  { %v1206_v15 = vpop.permute.xlu0 %1205  ;;  %v1252_v16 = vpop.permute.xlu2 %1251 }
 0x3af   :  { %1216 = vst.msk [vmem:[#allocation4 + $0x1b4] sm:$0xf] %vm358_vm9, %v1206_v15  ;;  %v1222_v18 = vpop.permute.xlu1 %1221  ;;  %v4378_v19 = vld [vmem:[#allocation4 + $0x1b8] sm:$0xff] }
 0x3b0   :  { %1232 = vst.msk [vmem:[#allocation4 + $0x1c4] sm:$0xf] %vm337_vm8, %v1222_v18  ;;  %3111 = vmatpush.bf16.msrb.mxu0 %v4378_v19  ;;  %v3737_v15 = vld [vmem:[%s7018_s3 + $0x100] sm:$0xf]  ;;  %v3665_v18 = vld [vmem:[%s7018_s3 + $0x68] sm:$0xf] }
 0x3b1   :  { %1248 = vst.msk [vmem:[#allocation4 + $0x1c4] sm:$0xf] %vm358_vm9, %v1238_v3  ;;  %v4371_v3 = vld [vmem:[#allocation4 + $0x180] sm:$0xff]  ;;  %2987 = vmatmul.bf16.gmra.mxu1 %v3734_v14  ;;  %v4261_v19 = vld [vmem:[%s7018_s3 + $0x8c] sm:$0xf0] }
 0x3b2   :  { %1263 = vst.msk [vmem:[#allocation4 + $0x1d0] sm:$0xf] %vm337_vm8, %v1252_v16  ;;  %v4280_v16 = vld [vmem:[%s7018_s3 + $0x124] sm:$0xf0]  ;;  %v3666_v28 = vor.u32 %v4261_v19, %v3665_v18  ;;  %v4281_v19 = vld [vmem:[%s7018_s3 + $0x12c] sm:$0xf0] }
 0x3b3   :  { %v3738_v17 = vor.u32 %v4280_v16, %v3737_v15  ;;  %v4300_v14 = vld [vmem:[%s7018_s3 + $0x1c4] sm:$0xf0] }
 0x3b4   :  { %1417 = vrot.lane.b32.xlu2 %v4699_v54, %s4531_s9  ;;  %v3745_v18 = vld [vmem:[%s7018_s3 + $0x108] sm:$0xf] }
 0x3b5   :  { %1433 = vrot.lane.b32.xlu1 %v4854_v26, %s4516_s0  ;;  %3080 = vmatmul.bf16.gmra.mxu3 %v3702_v5 }
 0x3b6   :  { %v1220_v20 = vpop.permute.xlu0 %1219  ;;  %v1258_v21 = vpop.permute.xlu2 %1257  ;;  %v4377_v22 = vld [vmem:[#allocation4 + $0x1b0] sm:$0xff]  ;;  %3036 = vmatmul.bf16.gmra.mxu2 %v3738_v17  ;;  %v3818_v17 = vor.u32 %v4300_v14, %v3817_v13 }
 0x3b7   :  { %1231 = vst.msk [vmem:[#allocation4 + $0x1c0] sm:$0xf] %vm337_vm8, %v1220_v20  ;;  %v1236_v23 = vpop.permute.xlu1 %1235  ;;  %3112 = vmatpush.bf16.msrb.mxu0 %v4377_v22  ;;  %v4275_v20 = vld [vmem:[%s7018_s3 + $0x104] sm:$0xf] }
 0x3b8   :  { %1247 = vst.msk [vmem:[#allocation4 + $0x1c0] sm:$0xf] %vm358_vm9, %v1236_v23 }
 0x3b9   :  { %1266 = vst.msk [vmem:[#allocation4 + $0x1dc] sm:$0xf] %vm337_vm8, %v1258_v21  ;;  %v3739_v21 = vld [vmem:[%s7018_s3 + $0x128] sm:$0xf0] }
 0x3ba   :  { %v3742_v24 = vor.u32 %v4275_v20, %v3739_v21  ;;  %v4295_v21 = vld [vmem:[%s7018_s3 + $0x1a4] sm:$0xf] }
 0x3bb   :  { %3113 = vmatpush.bf16.msrb.mxu0 %v4376_v30  ;;  %v5681_v30 = vpop.f32.mrf.mxu3 }
 0x3bc   :  { %1543 = vrot.lane.b32.xlu2 %v4717_v57, %s4532_s15  ;;  %7026 = vst [vmem:[#allocation6_spill] sm:$0xff] %v5681_v30 }
 0x3bd   :  { %1559 = vrot.lane.b32.xlu1 %v4789_v4, %s4520_s26 }
 0x3be   :  { %v1226_v51 = vpop.permute.xlu0 %1225  ;;  %v1272_v34 = vpop.permute.xlu2 %1271 }
 0x3bf   :  { %1234 = vst.msk [vmem:[#allocation4 + $0x1cc] sm:$0xf] %vm337_vm8, %v1226_v51  ;;  %v1242_v38 = vpop.permute.xlu1 %1241  ;;  %3114 = vmatpush.bf16.msrb.mxu0 %v4375_v35  ;;  %v4284_v35 = vld [vmem:[%s7018_s3 + $0x14c] sm:$0xf] }
 0x3c0   :  { %1250 = vst.msk [vmem:[#allocation4 + $0x1cc] sm:$0xf] %vm358_vm9, %v1242_v38  ;;  %v5698_v38 = vpop.f32.mrf.mxu0 }
 0x3c3   :  { %3115 = vmatpush.bf16.msrb.mxu0 %v4374_v40 }
 0x3c4   :  { %1561 = vrot.lane.b32.xlu2 %v4854_v26, %s4520_s26 }
 0x3c5   :  { %1413 = vrot.lane.b32.xlu1 %v4672_v49, %s4531_s9  ;;  %3085 = vmatmul.bf16.gmra.mxu3 %v3742_v24 }
 0x3c6   :  { %v1240_v41 = vpop.permute.xlu0 %1239  ;;  %v1286_v42 = vpop.permute.xlu2 %1285 }
 0x3c7   :  { %1249 = vst.msk [vmem:[#allocation4 + $0x1c8] sm:$0xf] %vm358_vm9, %v1240_v41  ;;  %v1256_v45 = vpop.permute.xlu1 %1255  ;;  %3116 = vmatpush.bf16.msrb.mxu0 %v4373_v43  ;;  %v3774_v41 = vor.u32 %v4284_v35, %v3771_v37 }
 0x3c8   :  { %1265 = vst.msk [vmem:[#allocation4 + $0x1d8] sm:$0xf] %vm337_vm8, %v1256_v45  ;;  %v5706_v45 = vpop.f32.mrf.mxu3 }
 0x3c9   :  { %1281 = vst.msk [vmem:[#allocation4 + $0x1d8] sm:$0xf] %vm358_vm9, %v1272_v34  ;;  %v5690_v34 = vpop.f32.mrf.mxu2  ;;  %2992 = vmatmul.bf16.gmra.mxu1 %v3774_v41 }
 0x3ca   :  { %1296 = vst.msk [vmem:[#allocation4 + $0x1e4] sm:$0xf] %vm337_vm8, %v1286_v42  ;;  %v4290_v42 = vld [vmem:[%s7018_s3 + $0x174] sm:$0xf0] }
 0x3cb   :  { %3117 = vmatpush.bf16.msrb.mxu0 %v4372_v52  ;;  %7027 = vst [vmem:[#allocation7_spill] sm:$0xff] %v5690_v34 }
 0x3cc   :  { %1427 = vrot.lane.b32.xlu2 %v5138_v36, %s4516_s0  ;;  %7028 = vst [vmem:[#allocation8_spill] sm:$0xff] %v5706_v45 }
 0x3cd   :  { %1539 = vrot.lane.b32.xlu1 %v4665_v47, %s4532_s15 }
 0x3ce   :  { %v1254_v1 = vpop.permute.xlu0 %1253  ;;  %v1288_v2 = vpop.permute.xlu2 %1287 }
 0x3cf   :  { %1264 = vst.msk [vmem:[#allocation4 + $0x1d4] sm:$0xf] %vm337_vm8, %v1254_v1  ;;  %v1270_v6 = vpop.permute.xlu1 %1269  ;;  %3118 = vmatpush.bf16.msrb.mxu0 %v4371_v3 }
 0x3d0   :  { %1280 = vst.msk [vmem:[#allocation4 + $0x1d4] sm:$0xf] %vm358_vm9, %v1270_v6  ;;  %v5732_v3 = vpop.f32.mrf.mxu3 }
 0x3d1   :  { %1297 = vst.msk [vmem:[#allocation4 + $0x1e8] sm:$0xf] %vm337_vm8, %v1288_v2  ;;  %v5728_v1 = vpop.f32.mrf.mxu2  ;;  %v5730_v2 = vpop.f32.mrf.mxu0 }
 0x3d2   :  { %3119 = vmatmul.bf16.vlgmr.msrb.gmra.mxu0 %v3626_v7  ;;  %7029 = vst [vmem:[#allocation9_spill] sm:$0xff] %v5728_v1 }
 0x3d3   :  { %7030 = vst [vmem:[#allocation10_spill] sm:$0xff] %v5732_v3 }
 0x3d4   :  { %1541 = vrot.lane.b32.xlu2 %v4672_v49, %s4532_s15 }
 0x3d5   :  { %1557 = vrot.lane.b32.xlu1 %v4733_v58, %s4520_s26  ;;  %3090 = vmatmul.bf16.gmra.mxu3 %v3782_v61  ;;  %v4305_v61 = vld [vmem:[%s7018_s3 + $0x1f4] sm:$0xf] }
 0x3d6   :  { %v1268_v9 = vpop.permute.xlu0 %1267  ;;  %v1302_v10 = vpop.permute.xlu2 %1301 }
 0x3d7   :  { %1279 = vst.msk [vmem:[#allocation4 + $0x1d0] sm:$0xf] %vm358_vm9, %v1268_v9  ;;  %v1284_v11 = vpop.permute.xlu1 %1283  ;;  %v5744_v9 = vpop.f32.mrf.mxu1 }
 0x3d8   :  { %1295 = vst.msk [vmem:[#allocation4 + $0x1e0] sm:$0xf] %vm337_vm8, %v1284_v11  ;;  %v3811_v11 = vld [vmem:[%s7018_s3 + $0x1c0] sm:$0xf0]  ;;  %v5760_v16 = vpop.f32.mrf.mxu3 }
 0x3d9   :  { %1312 = vst.msk [vmem:[#allocation4 + $0x1e4] sm:$0xf] %vm358_vm9, %v1302_v10  ;;  %v4294_v10 = vld [vmem:[%s7018_s3 + $0x19c] sm:$0xf]  ;;  %v5758_v15 = vpop.f32.mrf.mxu2  ;;  %v5770_v20 = vpop.f32.mrf.mxu0 }
 0x3da   :  { %v3814_v12 = vor.u32 %v4294_v10, %v3811_v11 }
 0x3dc   :  { %1383 = vrot.lane.b32.xlu2 %v4717_v57, %s4533_s22  ;;  %2997 = vmatmul.bf16.gmra.mxu1 %v3814_v12 }
 0x3dd   :  { %1399 = vrot.lane.b32.xlu1 %v4789_v4, %s4515_s11 }
 0x3de   :  { %v1274_v22 = vpop.permute.xlu0 %1273  ;;  %v1316_v23 = vpop.permute.xlu2 %1315 }
 0x3df   :  { %1282 = vst.msk [vmem:[#allocation4 + $0x1dc] sm:$0xf] %vm358_vm9, %v1274_v22  ;;  %v1578_v27 = vpop.permute.xlu1 %1577  ;;  %v3819_v22 = vld [vmem:[%s7018_s3 + $0x1c8] sm:$0xf0] }
 0x3e0   :  { %1327 = vst.msk [vmem:[#allocation4 + $0x1f0] sm:$0xf] %vm337_vm8, %v1316_v23 }
 0x3e2   :  { %3124 = vmatmul.bf16.gmra.mxu0 %v3666_v28 }
 0x3e4   :  { %1401 = vrot.lane.b32.xlu2 %v4854_v26, %s4515_s11 }
 0x3e5   :  { %1513 = vrot.lane.b32.xlu1 %v4699_v54, %s4534_s8 }
 0x3e6   :  { %v1574_v31 = vpop.permute.xlu0 %1573  ;;  %v1322_v32 = vpop.permute.xlu2 %1321 }
 0x3e7   :  { %v1576_v33 = vmax.f32 %v5384_v44, %v1574_v31  ;;  %v1300_v51 = vpop.permute.xlu1 %1299  ;;  %1330 = vst.msk [vmem:[#allocation4 + $0x1fc] sm:$0xf] %vm337_vm8, %v1322_v32  ;;  %v3777_v44 = vld [vmem:[%s7018_s3 + $0x150] sm:$0xf]  ;;  %v3746_v31 = vor.u32 %v4281_v19, %v3745_v18  ;;  %v5784_v32 = vpop.f32.mrf.mxu1 }
 0x3e8   :  { %1311 = vst.msk [vmem:[#allocation4 + $0x1e0] sm:$0xf] %vm358_vm9, %v1300_v51  ;;  %v3778_v46 = vor.u32 %v4290_v42, %v3777_v44  ;;  %v5789_v51 = vpop.f32.mrf.mxu3  ;;  %v4304_v44 = vld [vmem:[%s7018_s3 + $0x1ec] sm:$0xf]  ;;  %v3851_v42 = vld [vmem:[%s7018_s3 + $0x210] sm:$0xf0] }
 0x3e9   :  { %v1580_v40 = vmax.f32 %v1576_v33, %v1578_v27  ;;  %v3822_v27 = vor.u32 %v4295_v21, %v3819_v22  ;;  %v5787_v33 = vpop.f32.mrf.mxu2  ;;  %v4314_v22 = vld [vmem:[%s7018_s3 + $0x23c] sm:$0xf] }
 0x3ea   :  { %3041 = vmatmul.bf16.gmra.mxu2 %v3778_v46  ;;  %v3854_v46 = vor.u32 %v4304_v44, %v3851_v42 }
 0x3eb   :  { %v1581_v43 = vpack.c.bf16 %v1580_v40, %v1580_v40  ;;  %3095 = vmatmul.bf16.gmra.mxu3 %v3822_v27  ;;  %v5795_v40 = vpop.f32.mrf.mxu0 }
 0x3ec   :  { %1527 = vrot.lane.b32.xlu2 %v4789_v4, %s4519_s24  ;;  %3002 = vmatmul.bf16.gmra.mxu1 %v3854_v46 }
 0x3ed   :  { %v3598_v52 = vrot.slane %v1581_v43, 10  ;;  %1379 = vrot.lane.b32.xlu1 %v4665_v47, %s4533_s22  ;;  %1583 = vst.msk [vmem:[#allocation4 + $0x270] sm:$0x3] %vm1582_vm10, %v1581_v43 }
 0x3ee   :  { %v1290_v59 = vpop.permute.xlu0 %1289  ;;  %v1448_v60 = vpop.permute.xlu2 %1447 }
 0x3ef   :  { %1298 = vst.msk [vmem:[#allocation4 + $0x1ec] sm:$0xf] %vm337_vm8, %v1290_v59  ;;  %v1306_v62 = vpop.permute.xlu1 %1305  ;;  %1587 = vrot.lane.b32.xlu0 %v3598_v52, %s4485_s21  ;;  %s4535_s21 = smov 96   ;;  %v5807_v43 = vpop.f32.mrf.mxu1  ;;  %v3785_v59 = vld [vmem:[%s7018_s3 + $0x158] sm:$0xf] }
 0x3f0   :  { %1314 = vst.msk [vmem:[#allocation4 + $0x1ec] sm:$0xf] %vm358_vm9, %v1306_v62  ;;  %v5817_v55 = vpop.f32.mrf.mxu3  ;;  %v3859_v62 = vld [vmem:[%s7018_s3 + $0x218] sm:$0xf0] }
 0x3f1   :  { %1457 = vst.msk [vmem:[#allocation4 + $0x238] sm:$0xf] %vm337_vm8, %v1448_v60  ;;  %v5815_v52 = vpop.f32.mrf.mxu2  ;;  %v4291_v60 = vld [vmem:[%s7018_s3 + $0x17c] sm:$0xf0] }
 0x3f2   :  { %3129 = vmatmul.bf16.gmra.mxu0 %v3706_v63  ;;  %7031 = vst [vmem:[#allocation11_spill] sm:$0xff] %v5815_v52  ;;  %v3786_v11 = vor.u32 %v4291_v60, %v3785_v59  ;;  %v4320_v59 = vld [vmem:[%s7018_s3 + $0x264] sm:$0xf0] }
 0x3f3   :  { %7032 = vst [vmem:[#allocation12_spill] sm:$0xff] %v5817_v55  ;;  %v5840_v12 = vpop.f32.mrf.mxu0 }
 0x3f4   :  { %1381 = vrot.lane.b32.xlu2 %v4672_v49, %s4533_s22 }
 0x3f5   :  { %1397 = vrot.lane.b32.xlu1 %v4733_v58, %s4515_s11 }
 0x3f6   :  { %v1304_v5 = vpop.permute.xlu0 %1303  ;;  %v5738_v6 = vpop.permute.xlu2 %1465 }
 0x3f7   :  { %1313 = vst.msk [vmem:[#allocation4 + $0x1e8] sm:$0xf] %vm358_vm9, %v1304_v5  ;;  %v1320_v7 = vpop.permute.xlu1 %1319  ;;  %1431 = vrot.lane.b32.xlu0 %v4789_v4, %s4516_s0  ;;  %v5847_v14 = vpop.f32.mrf.mxu1 }
 0x3f8   :  { %1329 = vst.msk [vmem:[#allocation4 + $0x1f8] sm:$0xf] %vm337_vm8, %v1320_v7  ;;  %v3862_v7 = vor.u32 %v4305_v61, %v3859_v62 }
 0x3f9   :  { %v5844_v13 = vpop.f32.mrf.mxu2 }
 0x3fa   :  { %3046 = vmatmul.bf16.gmra.mxu2 %v3818_v17  ;;  %v5849_v17 = vpop.f32.mrf.mxu3 }
 0x3fb   :  { %3100 = vmatmul.bf16.gmra.mxu3 %v3862_v7 }
 0x3fc   :  { %1507 = vrot.lane.b32.xlu2 %v4665_v47, %s4534_s8 }
 0x3fd   :  { %1523 = vrot.lane.b32.xlu1 %v5138_v36, %s4519_s24 }
 0x3fe   :  { %v1318_v23 = vpop.permute.xlu0 %1317  ;;  %v1336_v24 = vpop.permute.xlu2 %1335 }
 0x3ff   :  { %1328 = vst.msk [vmem:[#allocation4 + $0x1f4] sm:$0xf] %vm337_vm8, %v1318_v23  ;;  %v1334_v28 = vpop.permute.xlu1 %1333  ;;  %1545 = vrot.lane.b32.xlu0 %v4699_v54, %s4532_s15  ;;  %v3891_v23 = vld [vmem:[%s7018_s3 + $0x260] sm:$0xf0] }
 0x400   :  { %1344 = vst.msk [vmem:[#allocation4 + $0x1f4] sm:$0xf] %vm358_vm9, %v1334_v28  ;;  %v5868_v28 = vpop.f32.mrf.mxu0 }
 0x401   :  { %1345 = vst.msk [vmem:[#allocation4 + $0x1f8] sm:$0xf] %vm358_vm9, %v1336_v24  ;;  %v3894_v24 = vor.u32 %v4314_v22, %v3891_v23  ;;  %v5866_v27 = vpop.f32.mrf.mxu2 }
 0x402   :  { %3134 = vmatmul.bf16.gmra.mxu0 %v3746_v31  ;;  %v5870_v31 = vpop.f32.mrf.mxu3 }
 0x403   :  { %3007 = vmatmul.bf16.gmra.mxu1 %v3894_v24  ;;  %v3865_v24 = vld [vmem:[%s7018_s3 + $0x1f8] sm:$0xf] }
 0x404   :  { %1525 = vrot.lane.b32.xlu2 %v4733_v58, %s4519_s24 }
 0x405   :  { %1353 = vrot.lane.b32.xlu1 %v4699_v54, %s4535_s21 }
 0x406   :  { %v1332_v35 = vpop.permute.xlu0 %1331  ;;  %v1462_v37 = vpop.permute.xlu2 %1461 }
 0x407   :  { %1343 = vst.msk [vmem:[#allocation4 + $0x1f0] sm:$0xf] %vm358_vm9, %v1332_v35  ;;  %v1464_v41 = vpop.permute.xlu1 %1463  ;;  %1411 = vrot.lane.b32.xlu0 %v4665_v47, %s4531_s9  ;;  %v3825_v35 = vld [vmem:[%s7018_s3 + $0x1a8] sm:$0xf] }
 0x408   :  { %1473 = vst.msk [vmem:[#allocation4 + $0x238] sm:$0xf] %vm358_vm9, %v1464_v41  ;;  %v5882_v41 = vpop.f32.mrf.mxu1 }
 0x409   :  { %v5896_v61 = vpop.f32.mrf.mxu2 }
 0x40a   :  { %3051 = vmatmul.bf16.gmra.mxu2 %v3858_v56  ;;  %v3897_v56 = vld [vmem:[%s7018_s3 + $0x240] sm:$0xf]  ;;  %7033 = vst [vmem:[#allocation13_spill] sm:$0xff] %v5896_v61  ;;  %v5898_v62 = vpop.f32.mrf.mxu3 }
 0x40b   :  { %v3898_v60 = vor.u32 %v4320_v59, %v3897_v56  ;;  %7034 = vst [vmem:[#allocation14_spill] sm:$0xff] %v5898_v62  ;;  %v1831_v56 = vld [vmem:[%s7019_s4 + $0x8] sm:$0xff] }
 0x40c   :  { %1367 = vrot.lane.b32.xlu2 %v4789_v4, %s4514_s10 }
 0x40d   :  { %1479 = vrot.lane.b32.xlu1 %v4717_v57, %s4536_s27 }
 0x40e   :  { %v1450_v63 = vpop.permute.xlu0 %1449  ;;  %v1418_v5 = vpop.permute.xlu2 %1417 }
 0x40f   :  { %1458 = vst.msk [vmem:[#allocation4 + $0x23c] sm:$0xf] %vm337_vm8, %v1450_v63  ;;  %v1446_v10 = vpop.permute.xlu1 %1445  ;;  %1429 = vrot.lane.b32.xlu0 %v4733_v58, %s4516_s0  ;;  %v4315_v63 = vld [vmem:[%s7018_s3 + $0x244] sm:$0xf] }
 0x410   :  { %1474 = vst.msk [vmem:[#allocation4 + $0x23c] sm:$0xf] %vm358_vm9, %v5738_v6 }
 0x411   :  { %1456 = vst.msk [vmem:[#allocation4 + $0x234] sm:$0xf] %vm337_vm8, %v1446_v10  ;;  %v5922_v22 = vpop.f32.mrf.mxu2 }
 0x412   :  { %1472 = vst.msk [vmem:[#allocation4 + $0x234] sm:$0xf] %vm358_vm9, %v1462_v37  ;;  %3139 = vmatmul.bf16.gmra.mxu0 %v3786_v11  ;;  %v4301_v37 = vld [vmem:[%s7018_s3 + $0x1cc] sm:$0xf0]  ;;  %v5924_v23 = vpop.f32.mrf.mxu3 }
 0x413   :  { %1426 = vst.msk [vmem:[#allocation4 + $0x22c] sm:$0xf] %vm337_vm8, %v1418_v5  ;;  %v3826_v50 = vor.u32 %v4301_v37, %v3825_v35  ;;  %v3899_v5 = vld [vmem:[%s7018_s3 + $0x268] sm:$0xf0]  ;;  %v4311_v35 = vld [vmem:[%s7018_s3 + $0x21c] sm:$0xf0] }
 0x414   :  { %1481 = vrot.lane.b32.xlu2 %v4699_v54, %s4536_s27  ;;  %v3902_v11 = vor.u32 %v4315_v63, %v3899_v5  ;;  %7037 = vst [vmem:[#allocation17_spill] sm:$0xff] %v5922_v22  ;;  %v4383_v63 = vld [vmem:[#allocation4 + $0x1e0] sm:$0xff]  ;;  %v7042_v22 = vmov 0  }
 0x415   :  { %1497 = vrot.lane.b32.xlu1 %v4854_v26, %s4518_s16  ;;  %7038 = vst [vmem:[#allocation18_spill] sm:$0xff] %v5924_v23 }
 0x416   :  { %v1444_v6 = vpop.permute.xlu0 %1443  ;;  %v1544_v18 = vpop.permute.xlu2 %1543  ;;  %3105 = vmatmul.bf16.gmra.mxu3 %v3902_v11  ;;  %119 = vst.msk [vmem:[#allocation4 + $0x270] sm:$0xc] %vm118_vm11, %v7042_v22 }
 0x417   :  { %1455 = vst.msk [vmem:[#allocation4 + $0x230] sm:$0xf] %vm337_vm8, %v1444_v6  ;;  %v1460_v19 = vpop.permute.xlu1 %1459  ;;  %1555 = vrot.lane.b32.xlu0 %v5138_v36, %s4520_s26  ;;  %v4394_v21 = vld [vmem:[#allocation4 + $0x238] sm:$0xff] }
 0x418   :  { %1471 = vst.msk [vmem:[#allocation4 + $0x230] sm:$0xf] %vm358_vm9, %v1460_v19  ;;  %3209 = vmatpush.bf16.msra.mxu2 %v4394_v21  ;;  %v1830_v19 = vld [vmem:[%s7019_s4] sm:$0xff]  ;;  %v4385_v21 = vld [vmem:[#allocation4 + $0x1f0] sm:$0xff] }
 0x419   :  { %1553 = vst.msk [vmem:[#allocation4 + $0x268] sm:$0xf] %vm337_vm8, %v1544_v18  ;;  %v5916_v18 = vpop.f32.mrf.mxu1  ;;  %v5948_v5 = vpop.f32.mrf.mxu2 }
 0x41a   :  { %3056 = vmatmul.bf16.gmra.mxu2 %v3898_v60  ;;  %7036 = vst [vmem:[#allocation16_spill] sm:$0xff] %v5916_v18  ;;  %v1833_v60 = vld [vmem:[%s7019_s4 + $0x18] sm:$0xff] }
 0x41b   :  { %121 = vst.msk [vmem:[#allocation4 + $0x274] sm:$0xf] %vm120_vm12, %v7042_v22  ;;  %v4256_v22 = vld [vmem:[%s7018_s3 + $0x6c] sm:$0xf] }
 0x41c   :  { %1347 = vrot.lane.b32.xlu2 %v4665_v47, %s4535_s21 }
 0x41d   :  { %1363 = vrot.lane.b32.xlu1 %v5138_v36, %s4514_s10 }
 0x41e   :  { %v1338_v44 = vpop.permute.xlu0 %1337  ;;  %v5884_v42 = vpop.permute.xlu2 %1561 }
 0x41f   :  { %1346 = vst.msk [vmem:[#allocation4 + $0x1fc] sm:$0xf] %vm358_vm9, %v1338_v44  ;;  %v1416_v46 = vpop.permute.xlu1 %1415  ;;  %1385 = vrot.lane.b32.xlu0 %v4699_v54, %s4533_s22  ;;  %v4393_v48 = vld [vmem:[#allocation4 + $0x230] sm:$0xff]  ;;  %v5902_v54 = vpop.f32.mrf.mxu0  ;;  %v4384_v44 = vld [vmem:[#allocation4 + $0x1e8] sm:$0xff] }
 0x420   :  { %1425 = vst.msk [vmem:[#allocation4 + $0x228] sm:$0xf] %vm337_vm8, %v1416_v46  ;;  %3210 = vmatpush.bf16.msra.mxu2 %v4393_v48 }
 0x421   :  { %7035 = vst [vmem:[#allocation15_spill] sm:$0xff] %v5902_v54  ;;  %v5943_v59 = vpop.f32.mrf.mxu1 }
 0x422   :  { %3144 = vmatmul.bf16.gmra.mxu0 %v3826_v50  ;;  %v3866_v50 = vor.u32 %v4311_v35, %v3865_v24  ;;  %v1834_v24 = vld [vmem:[%s7019_s4 + $0x20] sm:$0xff]  ;;  %v1836_v35 = vld [vmem:[%s7019_s4 + $0x30] sm:$0xff] }
 0x424   :  { %1365 = vrot.lane.b32.xlu2 %v4733_v58, %s4514_s10 }
 0x425   :  { %1477 = vrot.lane.b32.xlu1 %v4672_v49, %s4536_s27 }
 0x426   :  { %v5912_v7 = vpop.permute.xlu2 %1427  ;;  %v4386_v10 = vld [vmem:[#allocation4 + $0x1f8] sm:$0xff] }
 0x427   :  { %v1434_v6 = vpop.permute.xlu1 %1433  ;;  %1511 = vrot.lane.b32.xlu0 %v4717_v57, %s4534_s8  ;;  %3160 = vmatpush.bf16.msrb.mxu1 %v4386_v10  ;;  %v5934_v46 = vpop.f32.mrf.mxu0 }
 0x428   :  { %1442 = vst.msk [vmem:[#allocation4 + $0x22c] sm:$0xf] %vm358_vm9, %v1434_v6  ;;  %v5950_v10 = vpop.f32.mrf.mxu3  ;;  %v4382_v6 = vld [vmem:[#allocation4 + $0x1d8] sm:$0xff] }
 0x429   :  { %7039 = vst [vmem:[#allocation19_spill] sm:$0xff] %v5934_v46 }
 0x42b   :  { %3161 = vmatpush.bf16.msrb.mxu1 %v4385_v21 }
 0x42c   :  { %1491 = vrot.lane.b32.xlu2 %v5138_v36, %s4518_s16 }
 0x42d   :  { %1848 = vperm.xlu1 %4477, %v1830_v19  }
 0x42e   :  { %v1542_v37 = vpop.permute.xlu2 %1541 }
 0x42f   :  { %v1560_v48 = vpop.permute.xlu1 %1559  ;;  %1552 = vst.msk [vmem:[#allocation4 + $0x264] sm:$0xf] %vm337_vm8, %v1542_v37  ;;  %1529 = vrot.lane.b32.xlu0 %v4854_v26, %s4519_s24  ;;  %3162 = vmatpush.bf16.msrb.mxu1 %v4384_v44  ;;  %v5956_v21 = vpop.f32.mrf.mxu0  ;;  %v4381_v37 = vld [vmem:[#allocation4 + $0x1d0] sm:$0xff] }
 0x430   :  { %1569 = vst.msk [vmem:[#allocation4 + $0x268] sm:$0xf] %vm358_vm9, %v1560_v48  ;;  %v5964_v44 = vpop.f32.mrf.mxu1  ;;  %v4321_v48 = vld [vmem:[%s7018_s3 + $0x26c] sm:$0xf0] }
 0x431   :  { %7040 = vst [vmem:[#allocation20_spill] sm:$0xff] %v5956_v21 }
 0x432   :  { %3149 = vmatmul.bf16.gmra.mxu0 %v3866_v50  ;;  %v5972_v50 = vpop.f32.mrf.mxu2 }
 0x433   :  { %3163 = vmatpush.bf16.msrb.mxu1 %v4383_v63  ;;  %v5976_v63 = vpop.f32.mrf.mxu3 }
 0x434   :  { %1853 = vperm.xlu2 %4478, %v1831_v56  }
 0x435   :  { %1863 = vperm.xlu1 %4477, %v1833_v60   ;;  %v4380_v60 = vld [vmem:[#allocation4 + $0x1c8] sm:$0xff] }
 0x436   :  { %v1384_v11 = vpop.permute.xlu2 %1383 }
 0x437   :  { %v1414_v19 = vpop.permute.xlu1 %1413  ;;  %1393 = vst.msk [vmem:[#allocation4 + $0x218] sm:$0xf] %vm337_vm8, %v1384_v11  ;;  %1395 = vrot.lane.b32.xlu0 %v5138_v36, %s4515_s11  ;;  %3164 = vmatpush.bf16.msrb.mxu1 %v4382_v6  ;;  %v3905_v36 = vld [vmem:[%s7018_s3 + $0x248] sm:$0xf] }
 0x438   :  { %1424 = vst.msk [vmem:[#allocation4 + $0x224] sm:$0xf] %vm337_vm8, %v1414_v19  ;;  %v3906_v6 = vor.u32 %v4321_v48, %v3905_v36  ;;  %v4246_v19 = vld [vmem:[%s7018_s3 + $0x1c] sm:$0xf]  ;;  %v4379_v36 = vld [vmem:[#allocation4 + $0x1c0] sm:$0xff]  ;;  %v5993_v48 = vpop.f32.mrf.mxu0 }
 0x439   :  { %7041 = vst [vmem:[#allocation21_spill] sm:$0xff] %v5993_v48 }
 0x43a   :  { %v5999_v23 = vpop.f32.mrf.mxu2 }
 0x43b   :  { %3165 = vmatpush.bf16.msrb.mxu1 %v4381_v37  ;;  %v1839_v37 = vld [vmem:[%s7019_s4 + $0x48] sm:$0xff] }
 0x43c   :  { %1868 = vperm.xlu2 %4478, %v1834_v24   ;;  %v3627_v24 = vld [vmem:[%s7018_s3 + $0x40] sm:$0xf0] }
 0x43d   :  { %1878 = vperm.xlu1 %4477, %v1836_v35   ;;  %v1837_v35 = vld [vmem:[%s7019_s4 + $0x38] sm:$0xff] }
 0x43e   :  { %v5974_v56 = vpop.permute.xlu2 %1401 }
 0x43f   :  { %v1540_v11 = vpop.permute.xlu1 %1539  ;;  %1509 = vrot.lane.b32.xlu0 %v4672_v49, %s4534_s8  ;;  %3166 = vmatpush.bf16.msrb.mxu1 %v4380_v60  ;;  %v3630_v60 = vor.u32 %v4246_v19, %v3627_v24  ;;  %v1840_v19 = vld [vmem:[%s7019_s4 + $0x50] sm:$0xff]  ;;  %v1842_v24 = vld [vmem:[%s7019_s4 + $0x60] sm:$0xff] }
 0x440   :  { %1551 = vst.msk [vmem:[#allocation4 + $0x260] sm:$0xf] %vm337_vm8, %v1540_v11  ;;  %v5995_v11 = vpop.f32.mrf.mxu1 }
 0x442   :  { %3154 = vmatmul.bf16.gmra.mxu0 %v3906_v6  ;;  %v6007_v6 = vpop.f32.mrf.mxu3 }
 0x443   :  { %3167 = vmatpush.bf16.msrb.mxu1 %v4379_v36  ;;  %v6027_v36 = vpop.f32.mrf.mxu2 }
 0x444   :  { %1883 = vperm.xlu2 %4478, %v1837_v35   ;;  %7043 = vst [vmem:[#allocation22_spill] sm:$0xff] %v6027_v36 }
 0x445   :  { %1893 = vperm.xlu1 %4477, %v1839_v37   ;;  %v3667_v37 = vld [vmem:[%s7018_s3 + $0x90] sm:$0xf0] }
 0x446   :  { %v5997_v0 = vpop.permute.xlu2 %1527  ;;  %3168 = vmatmul.bf16.vlgmr.msrb.gmra.mxu1 %v3630_v60  ;;  %v1843_v60 = vld [vmem:[%s7019_s4 + $0x68] sm:$0xff] }
 0x447   :  { %v1558_v62 = vpop.permute.xlu1 %1557  ;;  %1351 = vrot.lane.b32.xlu0 %v4717_v57, %s4535_s21 }
 0x448   :  { %1568 = vst.msk [vmem:[#allocation4 + $0x264] sm:$0xf] %vm358_vm9, %v1558_v62  ;;  %v6018_v62 = vpop.f32.mrf.mxu1 }
 0x44b   :  { %v6043_v55 = vpop.f32.mrf.mxu2 }
 0x44c   :  { %1898 = vperm.xlu2 %4478, %v1840_v19   ;;  %v6035_v19 = vpop.f32.mrf.mxu3  ;;  %7046 = vst [vmem:[#allocation25_spill] sm:$0xff] %v6043_v55 }
 0x44d   :  { %1908 = vperm.xlu1 %4477, %v1842_v24   ;;  %7044 = vst [vmem:[#allocation23_spill] sm:$0xff] %v6035_v19  ;;  %v3670_v24 = vor.u32 %v4256_v22, %v3667_v37  ;;  %v3707_v37 = vld [vmem:[%s7018_s3 + $0xe0] sm:$0xf0] }
 0x44e   :  { %v1382_v35 = vpop.permute.xlu2 %1381 }
 0x44f   :  { %v1400_v57 = vpop.permute.xlu1 %1399  ;;  %1392 = vst.msk [vmem:[#allocation4 + $0x214] sm:$0xf] %vm337_vm8, %v1382_v35  ;;  %1369 = vrot.lane.b32.xlu0 %v4854_v26, %s4514_s10  ;;  %v1845_v26 = vld [vmem:[%s7019_s4 + $0x78] sm:$0xff] }
 0x450   :  { %1409 = vst.msk [vmem:[#allocation4 + $0x218] sm:$0xf] %vm358_vm9, %v1400_v57  ;;  %v6041_v61 = vpop.f32.mrf.mxu1 }
 0x451   :  { %7045 = vst [vmem:[#allocation24_spill] sm:$0xff] %v6041_v61 }
 0x454   :  { %1913 = vperm.xlu2 %4478, %v1843_v60   ;;  %v6045_v52 = vpop.f32.mrf.mxu3 }
 0x455   :  { %1923 = vperm.xlu1 %4477, %v1845_v26   ;;  %7047 = vst [vmem:[#allocation26_spill] sm:$0xff] %v6045_v52 }
 0x456   :  { %v1508_v35 = vpop.permute.xlu2 %1507  ;;  %3173 = vmatmul.bf16.gmra.mxu1 %v3670_v24 }
 0x457   :  { %v1514_v57 = vpop.permute.xlu1 %1513  ;;  %1519 = vst.msk [vmem:[#allocation4 + $0x250] sm:$0xf] %vm337_vm8, %v1508_v35  ;;  %1495 = vrot.lane.b32.xlu0 %v4789_v4, %s4518_s16  ;;  %v4266_v4 = vld [vmem:[%s7018_s3 + $0xbc] sm:$0xf]  ;;  %v6060_v35 = vpop.f32.mrf.mxu2 }
 0x458   :  { %1522 = vst.msk [vmem:[#allocation4 + $0x25c] sm:$0xf] %vm337_vm8, %v1514_v57  ;;  %v3710_v26 = vor.u32 %v4266_v4, %v3707_v37  ;;  %v6058_v24 = vpop.f32.mrf.mxu1 }
 0x459   :  { %7048 = vst [vmem:[#allocation27_spill] sm:$0xff] %v6058_v24 }
 0x45a   :  { %7049 = vst [vmem:[#allocation28_spill] sm:$0xff] %v6060_v35 }
 0x45e   :  { %v6047_v3 = vpop.permute.xlu2 %1525 }
 0x45f   :  { %v1380_v22 = vpop.permute.xlu1 %1379  ;;  %1349 = vrot.lane.b32.xlu0 %v4672_v49, %s4535_s21  ;;  %v6064_v49 = vpop.f32.mrf.mxu3 }
 0x460   :  { %1391 = vst.msk [vmem:[#allocation4 + $0x210] sm:$0xf] %vm337_vm8, %v1380_v22  ;;  %v6070_v4 = vpop.f32.mrf.mxu1 }
 0x461   :  { %v1588_v60 = vpop.permute.xlu0 %1587  ;;  %7050 = vst [vmem:[#allocation29_spill] sm:$0xff] %v6064_v49 }
 0x462   :  { %1591 = vst.msk [vmem:[#allocation4 + $0x270] sm:$0x3] %vm1590_vm13, %v1588_v60  ;;  %v6072_v60 = vpop.f32.mrf.mxu2 }
 0x463   :  { %7051 = vst [vmem:[#allocation30_spill] sm:$0xff] %v6070_v4 }
 0x464   :  { %7052 = vst [vmem:[#allocation31_spill] sm:$0xff] %v6072_v60 }
 0x466   :  { %v6062_v57 = vpop.permute.xlu2 %1367  ;;  %3178 = vmatmul.bf16.gmra.mxu1 %v3710_v26 }
 0x467   :  { %v1398_v22 = vpop.permute.xlu1 %1397  ;;  %1475 = vrot.lane.b32.xlu0 %v4665_v47, %s4536_s27  ;;  %v4276_v47 = vld [vmem:[%s7018_s3 + $0x10c] sm:$0xf] }
 0x468   :  { %1408 = vst.msk [vmem:[#allocation4 + $0x214] sm:$0xf] %vm358_vm9, %v1398_v22 }
 0x469   :  { %v1432_v48 = vpop.permute.xlu0 %1431  ;;  %v4401_v1 = vld [vmem:[#allocation4 + $0x270] sm:$0xff] }
 0x46a   :  { %1441 = vst.msk [vmem:[#allocation4 + $0x228] sm:$0xf] %vm358_vm9, %v1432_v48  ;;  %3259 = vmatpush.bf16.msra.mxu3 %v4401_v1  ;;  %v3747_v1 = vld [vmem:[%s7018_s3 + $0x130] sm:$0xf0]  ;;  %v6084_v48 = vpop.f32.mrf.mxu3 }
 0x46b   :  { %7053 = vst [vmem:[#allocation32_spill] sm:$0xff] %v6084_v48  ;;  %v6093_v48 = vpop.f32.mrf.mxu1 }
 0x46c   :  { %7054 = vst [vmem:[#allocation33_spill] sm:$0xff] %v6093_v48 }
 0x46e   :  { %v1482_v37 = vpop.permute.xlu2 %1481 }
 0x46f   :  { %v1524_v45 = vpop.permute.xlu1 %1523  ;;  %1490 = vst.msk [vmem:[#allocation4 + $0x24c] sm:$0xf] %vm337_vm8, %v1482_v37  ;;  %1493 = vrot.lane.b32.xlu0 %v4733_v58, %s4518_s16  ;;  %v3750_v58 = vor.u32 %v4276_v47, %v3747_v1  ;;  %v1835_v1 = vld [vmem:[%s7019_s4 + $0x28] sm:$0xff] }
 0x470   :  { %1535 = vst.msk [vmem:[#allocation4 + $0x250] sm:$0xf] %vm358_vm9, %v1524_v45  ;;  %v1832_v45 = vld [vmem:[%s7019_s4 + $0x10] sm:$0xff] }
 0x471   :  { %v1546_v26 = vpop.permute.xlu0 %1545  ;;  %v4392_v22 = vld [vmem:[#allocation4 + $0x228] sm:$0xff] }
 0x472   :  { %1554 = vst.msk [vmem:[#allocation4 + $0x26c] sm:$0xf] %vm337_vm8, %v1546_v26  ;;  %3211 = vmatpush.bf16.msra.mxu2 %v4392_v22  ;;  %v6096_v26 = vpop.f32.mrf.mxu2  ;;  %v6099_v47 = vpop.f32.mrf.mxu3 }
 0x473   :  { %1570 = vst.msk [vmem:[#allocation4 + $0x26c] sm:$0xf] %vm358_vm9, %v5884_v42 }
 0x474   :  { %7055 = vst [vmem:[#allocation34_spill] sm:$0xff] %v6096_v26 }
 0x475   :  { %7056 = vst [vmem:[#allocation35_spill] sm:$0xff] %v6099_v47 }
 0x476   :  { %v1348_v37 = vpop.permute.xlu2 %1347  ;;  %3183 = vmatmul.bf16.gmra.mxu1 %v3750_v58 }
 0x477   :  { %v1354_v60 = vpop.permute.xlu1 %1353  ;;  %1359 = vst.msk [vmem:[#allocation4 + $0x200] sm:$0xf] %vm337_vm8, %v1348_v37  ;;  %1858 = vperm.xlu0 %4476, %v1832_v45   ;;  %v6117_v37 = vpop.f32.mrf.mxu1 }
 0x478   :  { %1362 = vst.msk [vmem:[#allocation4 + $0x20c] sm:$0xf] %vm337_vm8, %v1354_v60  ;;  %v6108_v60 = vpop.f32.mrf.mxu0 }
 0x479   :  { %v1412_v4 = vpop.permute.xlu0 %1411  ;;  %7057 = vst [vmem:[#allocation36_spill] sm:$0xff] %v6108_v60 }
 0x47a   :  { %1423 = vst.msk [vmem:[#allocation4 + $0x220] sm:$0xf] %vm337_vm8, %v1412_v4  ;;  %v4400_v42 = vld [vmem:[#allocation4 + $0x268] sm:$0xff]  ;;  %v4286_v4 = vld [vmem:[%s7018_s3 + $0x15c] sm:$0xf]  ;;  %v6125_v47 = vpop.f32.mrf.mxu3 }
 0x47b   :  { %1439 = vst.msk [vmem:[#allocation4 + $0x220] sm:$0xf] %vm358_vm9, %v5912_v7  ;;  %3260 = vmatpush.bf16.msra.mxu3 %v4400_v42  ;;  %v3787_v7 = vld [vmem:[%s7018_s3 + $0x180] sm:$0xf0]  ;;  %v6120_v42 = vpop.f32.mrf.mxu2 }
 0x47c   :  { %7058 = vst [vmem:[#allocation37_spill] sm:$0xff] %v6117_v37 }
 0x47d   :  { %7059 = vst [vmem:[#allocation38_spill] sm:$0xff] %v6120_v42 }
 0x47e   :  { %v6106_v22 = vpop.permute.xlu2 %1365  ;;  %7060 = vst [vmem:[#allocation39_spill] sm:$0xff] %v6125_v47 }
 0x47f   :  { %v1480_v58 = vpop.permute.xlu1 %1479  ;;  %1873 = vperm.xlu0 %4476, %v1835_v1   ;;  %v3790_v1 = vor.u32 %v4286_v4, %v3787_v7  ;;  %v6133_v4 = vpop.f32.mrf.mxu1  ;;  %v1841_v7 = vld [vmem:[%s7019_s4 + $0x58] sm:$0xff] }
 0x480   :  { %1489 = vst.msk [vmem:[#allocation4 + $0x248] sm:$0xf] %vm337_vm8, %v1480_v58  ;;  %v1838_v58 = vld [vmem:[%s7019_s4 + $0x40] sm:$0xff]  ;;  %v6130_v49 = vpop.f32.mrf.mxu0 }
 0x481   :  { %v1430_v45 = vpop.permute.xlu0 %1429 }
 0x482   :  { %1440 = vst.msk [vmem:[#allocation4 + $0x224] sm:$0xf] %vm358_vm9, %v1430_v45 }
 0x483   :  { %v6138_v45 = vpop.f32.mrf.mxu2 }
 0x486   :  { %v6127_v26 = vpop.permute.xlu2 %1491  ;;  %3188 = vmatmul.bf16.gmra.mxu1 %v3790_v1  ;;  %v6142_v1 = vpop.f32.mrf.mxu3 }
 0x487   :  { %v1498_v60 = vpop.permute.xlu1 %1497  ;;  %1888 = vperm.xlu0 %4476, %v1838_v58   ;;  %v2998_v34 = vpop.f32.mrf.mxu1 }
 0x488   :  { %1506 = vst.msk [vmem:[#allocation4 + $0x24c] sm:$0xf] %vm358_vm9, %v1498_v60 }
 0x489   :  { %v1556_v48 = vpop.permute.xlu0 %1555  ;;  %v4391_v37 = vld [vmem:[#allocation4 + $0x220] sm:$0xff] }
 0x48a   :  { %1567 = vst.msk [vmem:[#allocation4 + $0x260] sm:$0xf] %vm358_vm9, %v1556_v48  ;;  %3212 = vmatpush.bf16.msra.mxu2 %v4391_v37  ;;  %v4296_v48 = vld [vmem:[%s7018_s3 + $0x1ac] sm:$0xf]  ;;  %v3827_v37 = vld [vmem:[%s7018_s3 + $0x1d0] sm:$0xf0] }
 0x48b   :  { %v3830_v21 = vor.u32 %v4296_v48, %v3827_v37  ;;  %v3047_v52 = vpop.f32.mrf.mxu2 }
 0x48e   :  { %v6140_v47 = vpop.permute.xlu2 %1853 }
 0x48f   :  { %v1364_v60 = vpop.permute.xlu1 %1363  ;;  %1903 = vperm.xlu0 %4476, %v1841_v7   ;;  %v2949_v7 = vpop.f32.mrf.mxu0 }
 0x490   :  { %1375 = vst.msk [vmem:[#allocation4 + $0x200] sm:$0xf] %vm358_vm9, %v1364_v60  ;;  %v1844_v60 = vld [vmem:[%s7019_s4 + $0x70] sm:$0xff]  ;;  %v6169_v29 = vpop.f32.mrf.mxu1 }
 0x491   :  { %v1386_v58 = vpop.permute.xlu0 %1385  ;;  %v4399_v42 = vld [vmem:[#allocation4 + $0x260] sm:$0xff]  ;;  %7063 = vst [vmem:[#allocation42_spill] sm:$0xff] %v6169_v29 }
 0x492   :  { %1394 = vst.msk [vmem:[#allocation4 + $0x21c] sm:$0xf] %vm337_vm8, %v1386_v58  ;;  %3261 = vmatpush.bf16.msra.mxu3 %v4399_v42  ;;  %v3096_v58 = vpop.f32.mrf.mxu3 }
 0x493   :  { %1410 = vst.msk [vmem:[#allocation4 + $0x21c] sm:$0xf] %vm358_vm9, %v5974_v56 }
 0x496   :  { %v6157_v35 = vpop.permute.xlu2 %1868  ;;  %3193 = vmatmul.bf16.gmra.mxu1 %v3830_v21  ;;  %v6171_v21 = vpop.f32.mrf.mxu2 }
 0x497   :  { %v1478_v30 = vpop.permute.xlu1 %1477  ;;  %1918 = vperm.xlu0 %4476, %v1844_v60   ;;  %v6163_v42 = vpop.f32.mrf.mxu0  ;;  %7064 = vst [vmem:[#allocation43_spill] sm:$0xff] %v6171_v21 }
 0x498   :  { %1488 = vst.msk [vmem:[#allocation4 + $0x244] sm:$0xf] %vm337_vm8, %v1478_v30  ;;  %v4306_v30 = vld [vmem:[%s7018_s3 + $0x1fc] sm:$0xf]  ;;  %v3003_v61 = vpop.f32.mrf.mxu1 }
 0x499   :  { %v1512_v24 = vpop.permute.xlu0 %1511  ;;  %7061 = vst [vmem:[#allocation40_spill] sm:$0xff] %v6163_v42 }
 0x49a   :  { %1521 = vst.msk [vmem:[#allocation4 + $0x258] sm:$0xf] %vm337_vm8, %v1512_v24  ;;  %v4390_v56 = vld [vmem:[#allocation4 + $0x218] sm:$0xff]  ;;  %v6180_v60 = vpop.f32.mrf.mxu3 }
 0x49b   :  { %1537 = vst.msk [vmem:[#allocation4 + $0x258] sm:$0xf] %vm358_vm9, %v5997_v0  ;;  %3213 = vmatpush.bf16.msra.mxu2 %v4390_v56  ;;  %v3867_v24 = vld [vmem:[%s7018_s3 + $0x220] sm:$0xf0] }
 0x49c   :  { %7065 = vst [vmem:[#allocation44_spill] sm:$0xff] %v6180_v60  ;;  %v3870_v56 = vor.u32 %v4306_v30, %v3867_v24 }
 0x49e   :  { %v6165_v48 = vpop.permute.xlu2 %1883  ;;  %v3052_v18 = vpop.f32.mrf.mxu2 }
 0x49f   :  { %7062 = vst [vmem:[#allocation41_spill] sm:$0xff] %v6165_v48  ;;  %v6167_v37 = vpop.permute.xlu1 %1848  ;;  %v2954_v21 = vpop.f32.mrf.mxu0 }
 0x4a1   :  { %v1530_v0 = vpop.permute.xlu0 %1529 }
 0x4a2   :  { %1538 = vst.msk [vmem:[#allocation4 + $0x25c] sm:$0xf] %vm358_vm9, %v1530_v0  ;;  %v3101_v0 = vpop.f32.mrf.mxu3 }
 0x4a6   :  { %v1899_v42 = vpop.permute.xlu2 %1898  ;;  %3198 = vmatmul.bf16.gmra.mxu1 %v3870_v56 }
 0x4a7   :  { %v6182_v48 = vpop.permute.xlu1 %1863  ;;  %v2852_v29 = vadd.f32 %v5787_v33, %v1899_v42  ;;  %v3054_v42 = vpop.f32.mrf.mxu2 }
 0x4a9   :  { %v2901_v55 = vadd.f32 %v5789_v51, %v2852_v29  ;;  %v1396_v46 = vpop.permute.xlu0 %1395  ;;  %v4398_v19 = vld [vmem:[#allocation4 + $0x258] sm:$0xff]  ;;  %v4316_v29 = vld [vmem:[%s7018_s3 + $0x24c] sm:$0xf]  ;;  %v3907_v51 = vld [vmem:[%s7018_s3 + $0x270] sm:$0xf0] }
 0x4aa   :  { %1407 = vst.msk [vmem:[#allocation4 + $0x210] sm:$0xf] %vm358_vm9, %v1396_v46  ;;  %3262 = vmatpush.bf16.msra.mxu3 %v4398_v19  ;;  %v3103_v56 = vpop.f32.mrf.mxu3 }
 0x4ab   :  { %v2950_v36 = vadd.f32 %v2949_v7, %v2901_v55 }
 0x4ad   :  { %v2999_v60 = vadd.f32 %v2998_v34, %v2950_v36  ;;  %v2956_v34 = vpop.f32.mrf.mxu0  ;;  %v3005_v36 = vpop.f32.mrf.mxu1 }
 0x4ae   :  { %v1914_v30 = vpop.permute.xlu2 %1913 }
 0x4af   :  { %v6187_v24 = vpop.permute.xlu1 %1878  ;;  %v2859_v54 = vadd.f32 %v5866_v27, %v1914_v30  ;;  %v3048_v33 = vadd.f32 %v3047_v52, %v2999_v60  ;;  %v3910_v27 = vor.u32 %v4316_v29, %v3907_v51 }
 0x4b0   :  { %7066 = vst [vmem:[#allocation45_spill] sm:$0xff] %v6187_v24 }
 0x4b1   :  { %v2908_v46 = vadd.f32 %v5870_v31, %v2859_v54  ;;  %v1510_v55 = vpop.permute.xlu0 %1509  ;;  %v4389_v19 = vld [vmem:[#allocation4 + $0x210] sm:$0xff]  ;;  %v6197_v7 = vadd.f32 %v3096_v58, %v3048_v33 }
 0x4b2   :  { %1520 = vst.msk [vmem:[#allocation4 + $0x254] sm:$0xf] %vm337_vm8, %v1510_v55  ;;  %3214 = vmatpush.bf16.msra.mxu2 %v4389_v19 }
 0x4b3   :  { %1536 = vst.msk [vmem:[#allocation4 + $0x254] sm:$0xf] %vm358_vm9, %v6047_v3  ;;  %v2957_v52 = vadd.f32 %v2956_v34, %v2908_v46 }
 0x4b5   :  { %v3006_v60 = vadd.f32 %v3005_v36, %v2957_v52  ;;  %v3635_v36 = vld [vmem:[%s7018_s3 + $0x48] sm:$0xf0] }
 0x4b6   :  { %3203 = vmatmul.bf16.gmra.mxu1 %v3910_v27 }
 0x4b7   :  { %v1894_v30 = vpop.permute.xlu1 %1893  ;;  %v3055_v24 = vadd.f32 %v3054_v42, %v3006_v60  ;;  %v3673_v42 = vld [vmem:[%s7018_s3 + $0x70] sm:$0xf] }
 0x4b8   :  { %v2849_v31 = vadd.f32 %v5758_v15, %v1894_v30 }
 0x4b9   :  { %v6203_v54 = vadd.f32 %v3103_v56, %v3055_v24  ;;  %v1352_v58 = vpop.permute.xlu0 %1351 }
 0x4ba   :  { %v2898_v33 = vadd.f32 %v5760_v16, %v2849_v31  ;;  %1361 = vst.msk [vmem:[#allocation4 + $0x208] sm:$0xf] %vm337_vm8, %v1352_v58  ;;  %v4397_v3 = vld [vmem:[#allocation4 + $0x250] sm:$0xff]  ;;  %v4257_v31 = vld [vmem:[%s7018_s3 + $0x74] sm:$0xf] }
 0x4bb   :  { %1377 = vst.msk [vmem:[#allocation4 + $0x208] sm:$0xf] %vm358_vm9, %v6062_v57  ;;  %3263 = vmatpush.bf16.msra.mxu3 %v4397_v3  ;;  %v3675_v58 = vld [vmem:[%s7018_s3 + $0x98] sm:$0xf0]  ;;  %v4272_v3 = vld [vmem:[%s7018_s3 + $0xe4] sm:$0xf0] }
 0x4bc   :  { %v2947_v29 = vadd.f32 %v6130_v49, %v2898_v33  ;;  %v3713_v33 = vld [vmem:[%s7018_s3 + $0xc0] sm:$0xf] }
 0x4be   :  { %v2996_v51 = vadd.f32 %v6133_v4, %v2947_v29  ;;  %v3678_v29 = vor.u32 %v4257_v31, %v3675_v58 }
 0x4bf   :  { %v1909_v46 = vpop.permute.xlu1 %1908 }
 0x4c0   :  { %v2857_v55 = vadd.f32 %v5844_v13, %v1909_v46  ;;  %v3045_v15 = vadd.f32 %v6138_v45, %v2996_v51  ;;  %v3714_v51 = vor.u32 %v4272_v3, %v3713_v33  ;;  %v4267_v46 = vld [vmem:[%s7018_s3 + $0xc4] sm:$0xf] }
 0x4c1   :  { %v1370_v24 = vpop.permute.xlu0 %1369  ;;  %v4307_v3 = vld [vmem:[%s7018_s3 + $0x204] sm:$0xf] }
 0x4c2   :  { %v2906_v19 = vadd.f32 %v5849_v17, %v2857_v55  ;;  %1378 = vst.msk [vmem:[#allocation4 + $0x20c] sm:$0xf] %vm358_vm9, %v1370_v24  ;;  %v6216_v16 = vadd.f32 %v6142_v1, %v3045_v15  ;;  %v3633_v17 = vld [vmem:[%s7018_s3 + $0x20] sm:$0xf]  ;;  %v3715_v55 = vld [vmem:[%s7018_s3 + $0xe8] sm:$0xf0] }
 0x4c3   :  { %v3753_v15 = vld [vmem:[%s7018_s3 + $0x110] sm:$0xf]  ;;  %v4282_v24 = vld [vmem:[%s7018_s3 + $0x134] sm:$0xf0] }
 0x4c4   :  { %v2955_v34 = vadd.f32 %v2954_v21, %v2906_v19  ;;  %v3718_v19 = vor.u32 %v4267_v46, %v3715_v55  ;;  %v4322_v46 = vld [vmem:[%s7018_s3 + $0x274] sm:$0xf0] }
 0x4c6   :  { %v3004_v57 = vadd.f32 %v3003_v61, %v2955_v34  ;;  %v4252_v61 = vld [vmem:[%s7018_s3 + $0x44] sm:$0xf0]  ;;  %v3754_v34 = vor.u32 %v4282_v24, %v3753_v15 }
 0x4c7   :  { %v3634_v21 = vor.u32 %v4252_v61, %v3633_v17  ;;  %v4287_v17 = vld [vmem:[%s7018_s3 + $0x164] sm:$0xf]  ;;  %v3795_v61 = vld [vmem:[%s7018_s3 + $0x188] sm:$0xf0] }
 0x4c8   :  { %v3053_v52 = vadd.f32 %v3052_v18, %v3004_v57  ;;  %v4277_v57 = vld [vmem:[%s7018_s3 + $0x114] sm:$0xf] }
 0x4c9   :  { %v1496_v49 = vpop.permute.xlu0 %1495  ;;  %v4388_v27 = vld [vmem:[#allocation4 + $0x208] sm:$0xff] }
 0x4ca   :  { %1505 = vst.msk [vmem:[#allocation4 + $0x248] sm:$0xf] %vm358_vm9, %v1496_v49  ;;  %v6219_v4 = vadd.f32 %v3101_v0, %v3053_v52  ;;  %3215 = vmatpush.bf16.msra.mxu2 %v4388_v27  ;;  %v4247_v0 = vld [vmem:[%s7018_s3 + $0x24] sm:$0xf]  ;;  %v3755_v52 = vld [vmem:[%s7018_s3 + $0x138] sm:$0xf0] }
 0x4cb   :  { %v3638_v56 = vor.u32 %v4247_v0, %v3635_v36  ;;  %v3793_v49 = vld [vmem:[%s7018_s3 + $0x160] sm:$0xf]  ;;  %v4292_v27 = vld [vmem:[%s7018_s3 + $0x184] sm:$0xf0]  ;;  %v4297_v0 = vld [vmem:[%s7018_s3 + $0x1b4] sm:$0xf] }
 0x4cc   :  { %v3835_v36 = vld [vmem:[%s7018_s3 + $0x1d8] sm:$0xf0] }
 0x4d1   :  { %v1350_v13 = vpop.permute.xlu0 %1349  ;;  %v4396_v45 = vld [vmem:[#allocation4 + $0x248] sm:$0xff] }
 0x4d2   :  { %1360 = vst.msk [vmem:[#allocation4 + $0x204] sm:$0xf] %vm337_vm8, %v1350_v13  ;;  %3264 = vmatpush.bf16.msra.mxu3 %v4396_v45  ;;  %v3758_v13 = vor.u32 %v4277_v57, %v3755_v52  ;;  %v3794_v45 = vor.u32 %v4292_v27, %v3793_v49  ;;  %v2827_v57 = vadd.f32 %v5595_v39, %v6167_v37  ;;  %v4317_v27 = vld [vmem:[%s7018_s3 + $0x254] sm:$0xf]  ;;  %v6350_v37 = vpop.f32.mrf.mxu3 }
 0x4d3   :  { %1376 = vst.msk [vmem:[#allocation4 + $0x204] sm:$0xf] %vm358_vm9, %v6106_v22 }
 0x4d9   :  { %v1476_v18 = vpop.permute.xlu0 %1475 }
 0x4da   :  { %1487 = vst.msk [vmem:[#allocation4 + $0x240] sm:$0xf] %vm337_vm8, %v1476_v18  ;;  %v4387_v1 = vld [vmem:[#allocation4 + $0x200] sm:$0xff]  ;;  %v3833_v18 = vld [vmem:[%s7018_s3 + $0x1b0] sm:$0xf] }
 0x4db   :  { %1503 = vst.msk [vmem:[#allocation4 + $0x240] sm:$0xf] %vm358_vm9, %v6127_v26  ;;  %3216 = vmatpush.bf16.msra.mxu2 %v4387_v1  ;;  %v4262_v26 = vld [vmem:[%s7018_s3 + $0x94] sm:$0xf0] }
 0x4dc   :  { %v3674_v30 = vor.u32 %v4262_v26, %v3673_v42  ;;  %v4302_v1 = vld [vmem:[%s7018_s3 + $0x1d4] sm:$0xf0]  ;;  %v6305_v42 = vpop.f32.mrf.mxu0  ;;  %v3873_v26 = vld [vmem:[%s7018_s3 + $0x200] sm:$0xf] }
 0x4de   :  { %3217 = vmatmul.bf16.vlgmr.msra.gmra.mxu2 %v3634_v21  ;;  %v3798_v21 = vor.u32 %v4287_v17, %v3795_v61 }
 0x4e1   :  { %v1494_v22 = vpop.permute.xlu0 %1493 }
 0x4e2   :  { %1504 = vst.msk [vmem:[#allocation4 + $0x244] sm:$0xf] %vm358_vm9, %v1494_v22  ;;  %v3834_v22 = vor.u32 %v4302_v1, %v3833_v18  ;;  %v2829_v18 = vadd.f32 %v5611_v53, %v6140_v47 }
 0x4e4   :  { %v6316_v58 = vpop.f32.mrf.mxu0 }
 0x4e9   :  { %v4395_v60 = vld [vmem:[#allocation4 + $0x240] sm:$0xff]  ;;  %v1859_v1 = vpop.permute.xlu0 %1858 }
 0x4ea   :  { %3265 = vmatpush.bf16.msra.mxu3 %v4395_v60  ;;  %v4312_v60 = vld [vmem:[%s7018_s3 + $0x224] sm:$0xf0] }
 0x4eb   :  { %v3874_v31 = vor.u32 %v4312_v60, %v3873_v26 }
 0x4ec   :  { %v3120_v24 = vpop.f32.mrf.mxu0 }
 0x4ed   :  { %4235 = vmatmul.msk.bf16.vlgmr.msra.gmra.mxu3 %vm2792_vm14, %v3638_v56  ;;  %v6313_v56 = vpop.f32.mrf.mxu1 }
 0x4ee   :  { %3222 = vmatmul.bf16.gmra.mxu2 %v3674_v30  ;;  %v3838_v30 = vor.u32 %v4297_v0, %v3835_v36 }
 0x4f4   :  { %v3122_v52 = vpop.f32.mrf.mxu0 }
 0x4f5   :  { %v6318_v33 = vpop.f32.mrf.mxu1 }
 0x4fd   :  { %4236 = vmatmul.msk.bf16.gmra.mxu3 %vm2792_vm14, %v3678_v29  ;;  %v3875_v29 = vld [vmem:[%s7018_s3 + $0x228] sm:$0xf0] }
 0x4fe   :  { %3227 = vmatmul.bf16.gmra.mxu2 %v3714_v51  ;;  %v3913_v51 = vld [vmem:[%s7018_s3 + $0x250] sm:$0xf]  ;;  %v3878_v55 = vor.u32 %v4307_v3, %v3875_v29 }
 0x4ff   :  { %v3914_v15 = vor.u32 %v4322_v46, %v3913_v51 }
 0x50d   :  { %4237 = vmatmul.msk.bf16.gmra.mxu3 %vm2792_vm14, %v3718_v19  ;;  %v3169_v19 = vpop.f32.mrf.mxu1 }
 0x50e   :  { %3232 = vmatmul.bf16.gmra.mxu2 %v3754_v34  ;;  %v6333_v34 = vpop.f32.mrf.mxu2 }
 0x515   :  { %v3171_v49 = vpop.f32.mrf.mxu1 }
 0x516   :  { %v6344_v17 = vpop.f32.mrf.mxu2 }
 0x51d   :  { %4238 = vmatmul.msk.bf16.gmra.mxu3 %vm2792_vm14, %v3758_v13  ;;  %v3915_v13 = vld [vmem:[%s7018_s3 + $0x278] sm:$0xf0]  ;;  %v3174_v36 = vpop.f32.mrf.mxu1 }
 0x51e   :  { %3237 = vmatmul.bf16.gmra.mxu2 %v3794_v45  ;;  %v2876_v45 = vadd.f32 %v5744_v9, %v2827_v57  ;;  %v3918_v61 = vor.u32 %v4317_v27, %v3915_v13  ;;  %v2832_v9 = vadd.f32 %v5640_v8, %v1859_v1  ;;  %v2834_v8 = vadd.f32 %v5675_v25, %v6182_v48  ;;  %v7068_v1 = vld [vmem:[#allocation22_spill] sm:$0xff] }
 0x51f   :  { %v2837_v25 = vadd.f32 %v5698_v38, %v6157_v35 }
 0x520   :  { %v2925_v39 = vadd.f32 %v5770_v20, %v2876_v45  ;;  %v2881_v20 = vadd.f32 %v5807_v43, %v2832_v9 }
 0x522   :  { %v2974_v0 = vadd.f32 %v5943_v59, %v2925_v39 }
 0x524   :  { %v3023_v53 = vadd.f32 %v5948_v5, %v2974_v0  ;;  %v7069_v0 = vld [vmem:[#allocation16_spill] sm:$0xff] }
 0x525   :  { %v3176_v29 = vpop.f32.mrf.mxu1 }
 0x52d   :  { %4239 = vmatmul.msk.bf16.gmra.mxu3 %vm2792_vm14, %v3798_v21  ;;  %v3125_v21 = vpop.f32.mrf.mxu0 }
 0x52e   :  { %3242 = vmatmul.bf16.gmra.mxu2 %v3834_v22  ;;  %v2878_v22 = vadd.f32 %v5784_v32, %v2829_v18  ;;  %v2930_v32 = vadd.f32 %v5840_v12, %v2881_v20  ;;  %v7067_v18 = vld [vmem:[#allocation15_spill] sm:$0xff] }
 0x530   :  { %v2927_v60 = vadd.f32 %v5795_v40, %v2878_v22  ;;  %v2979_v43 = vadd.f32 %v5995_v11, %v2930_v32  ;;  %v3179_v11 = vpop.f32.mrf.mxu1  ;;  %v7072_v32 = vld [vmem:[#allocation19_spill] sm:$0xff] }
 0x532   :  { %v2976_v47 = vadd.f32 %v5964_v44, %v2927_v60  ;;  %v2883_v44 = vadd.f32 %v5847_v14, %v2834_v8  ;;  %v3028_v12 = vadd.f32 %v5999_v23, %v2979_v43  ;;  %v2886_v23 = vadd.f32 %v5882_v41, %v2837_v25  ;;  %v7075_v43 = vld [vmem:[#allocation5_spill] sm:$0xff] }
 0x534   :  { %v3025_v40 = vadd.f32 %v5972_v50, %v2976_v47  ;;  %v2932_v50 = vadd.f32 %v5868_v28, %v2883_v44  ;;  %v3077_v38 = vadd.f32 %v6007_v6, %v3028_v12  ;;  %v1874_v28 = vpop.permute.xlu0 %1873  ;;  %v2935_v39 = vadd.f32 %v7067_v18, %v2886_v23  ;;  %v7082_v18 = vld [vmem:[#allocation20_spill] sm:$0xff] }
 0x535   :  { %v3127_v3 = vpop.f32.mrf.mxu0  ;;  %v2839_v13 = vadd.f32 %v5730_v2, %v1874_v28  ;;  %v7070_v2 = vld [vmem:[#allocation24_spill] sm:$0xff] }
 0x536   :  { %v2981_v35 = vadd.f32 %v6018_v62, %v2932_v50  ;;  %v3126_v45 = vadd.f32 %v3125_v21, %v3077_v38  ;;  %v2984_v21 = vadd.f32 %v7070_v2, %v2935_v39 }
 0x537   :  { %v2888_v9 = vadd.f32 %v7069_v0, %v2839_v13  ;;  %v7081_v13 = vld [vmem:[#allocation7_spill] sm:$0xff] }
 0x538   :  { %v3030_v22 = vadd.f32 %v7068_v1, %v2981_v35  ;;  %v3181_v60 = vpop.f32.mrf.mxu1  ;;  %v7079_v35 = vld [vmem:[#allocation28_spill] sm:$0xff] }
 0x53d   :  { %4240 = vmatmul.msk.bf16.gmra.mxu3 %vm2792_vm14, %v3838_v30  ;;  %v3072_v30 = vadd.f32 %v5950_v10, %v3023_v53  ;;  %v3074_v10 = vadd.f32 %v5976_v63, %v3025_v40  ;;  %v3130_v48 = vpop.f32.mrf.mxu0  ;;  %v7071_v53 = vld [vmem:[#allocation23_spill] sm:$0xff]  ;;  %v7073_v40 = vld [vmem:[#allocation25_spill] sm:$0xff] }
 0x53e   :  { %3247 = vmatmul.bf16.gmra.mxu2 %v3874_v31  ;;  %v6360_v31 = vpop.f32.mrf.mxu3  ;;  %v3079_v20 = vadd.f32 %v7071_v53, %v3030_v22 }
 0x53f   :  { %v3121_v51 = vadd.f32 %v3120_v24, %v3072_v30  ;;  %v3123_v24 = vadd.f32 %v3122_v52, %v3074_v10 }
 0x540   :  { %v3128_v10 = vadd.f32 %v3127_v3, %v3079_v20  ;;  %v3184_v38 = vpop.f32.mrf.mxu1 }
 0x541   :  { %v3170_v5 = vadd.f32 %v3169_v19, %v3121_v51  ;;  %v3172_v19 = vadd.f32 %v3171_v49, %v3123_v24  ;;  %v7077_v24 = vld [vmem:[#allocation6_spill] sm:$0xff] }
 0x542   :  { %v3177_v12 = vadd.f32 %v3176_v29, %v3128_v10 }
 0x545   :  { %v3132_v62 = vpop.f32.mrf.mxu0 }
 0x54d   :  { %4241 = vmatmul.msk.bf16.gmra.mxu3 %vm2792_vm14, %v3878_v55  ;;  %v3135_v50 = vpop.f32.mrf.mxu0 }
 0x54e   :  { %3252 = vmatmul.bf16.gmra.mxu2 %v3914_v15 }
 0x55d   :  { %4242 = vmatmul.msk.bf16.gmra.mxu3 %vm2792_vm14, %v3918_v61 }
 0x561   :  { %v3218_v26 = vpop.f32.mrf.mxu2 }
 0x562   :  { %v3219_v46 = vadd.f32 %v3218_v26, %v3170_v5  ;;  %v3175_v26 = vadd.f32 %v3174_v36, %v3126_v45  ;;  %v3033_v5 = vadd.f32 %v7073_v40, %v2984_v21  ;;  %v7074_v36 = vld [vmem:[#allocation45_spill] sm:$0xff]  ;;  %v7085_v21 = vld [vmem:[#allocation30_spill] sm:$0xff] }
 0x563   :  { %v2842_v44 = vadd.f32 %v7075_v43, %v7074_v36  ;;  %v7087_v36 = vld [vmem:[#allocation21_spill] sm:$0xff] }
 0x569   :  { %v3220_v59 = vpop.f32.mrf.mxu2 }
 0x56a   :  { %v3221_v52 = vadd.f32 %v3220_v59, %v3172_v19  ;;  %v2937_v59 = vadd.f32 %v7072_v32, %v2888_v9  ;;  %v1889_v9 = vpop.permute.xlu0 %1888 }
 0x570   :  { %v3267_v55 = vpop.f32.mrf.mxu3 }
 0x571   :  { %v6369_v15 = vadd.f32 %v3267_v55, %v3219_v46  ;;  %v3223_v57 = vpop.f32.mrf.mxu2 }
 0x572   :  { %v3224_v47 = vadd.f32 %v3223_v57, %v3175_v26  ;;  %v7076_v57 = vld [vmem:[#allocation27_spill] sm:$0xff]  ;;  %v7084_v26 = vld [vmem:[#allocation8_spill] sm:$0xff] }
 0x573   :  { %v3516_v14 = vpack.c.bf16 %v6369_v15, %v6369_v15  ;;  %v3324_v63 = vsel %vm3323_vm15, %v6369_v15, 0.0  ;;  %v2986_v25 = vadd.f32 %v7076_v57, %v2937_v59 }
 0x574   :  { %3325 = vadd.xlane.f32.xlu2 %v3324_v63  ;;  %v7078_v63 = vld [vmem:[#allocation26_spill] sm:$0xff] }
 0x575   :  { %3532 = vst.msk [vmem:[%s7020_s5] sm:$0xf] %vm120_vm12, %v3516_v14  ;;  %v2891_v14 = vadd.f32 %v7077_v24, %v2842_v44  ;;  %v3082_v3 = vadd.f32 %v7078_v63, %v3033_v5  ;;  %v3186_v5 = vpop.f32.mrf.mxu1  ;;  %v7088_v44 = vld [vmem:[#allocation31_spill] sm:$0xff]  ;;  %v7091_v24 = vld [vmem:[#allocation32_spill] sm:$0xff] }
 0x577   :  { %v2940_v39 = vadd.f32 %v7082_v18, %v2891_v14  ;;  %v3131_v1 = vadd.f32 %v3130_v48, %v3082_v3 }
 0x578   :  { %v3269_v27 = vpop.f32.mrf.mxu3 }
 0x579   :  { %v6387_v61 = vadd.f32 %v3269_v27, %v3221_v52  ;;  %v3225_v49 = vpop.f32.mrf.mxu2  ;;  %v3035_v52 = vadd.f32 %v7079_v35, %v2986_v25  ;;  %v7080_v27 = vld [vmem:[#allocation41_spill] sm:$0xff]  ;;  %v2989_v48 = vadd.f32 %v7085_v21, %v2940_v39 }
 0x57a   :  { %v3226_v19 = vadd.f32 %v3225_v49, %v3177_v12  ;;  %v2844_v45 = vadd.f32 %v7081_v13, %v7080_v27  ;;  %v3180_v49 = vadd.f32 %v3179_v11, %v3131_v1 }
 0x57b   :  { %v3517_v6 = vpack.c.bf16 %v6387_v61, %v6387_v61  ;;  %v3327_v41 = vsel %vm3323_vm15, %v6387_v61, 0.0  ;;  %v3038_v10 = vadd.f32 %v7088_v44, %v2989_v48 }
 0x57c   :  { %3328 = vadd.xlane.f32.xlu0 %v3327_v41  ;;  %v7083_v41 = vld [vmem:[#allocation29_spill] sm:$0xff]  ;;  %v2893_v2 = vadd.f32 %v7084_v26, %v2844_v45  ;;  %v7093_v45 = vld [vmem:[#allocation34_spill] sm:$0xff] }
 0x57d   :  { %3533 = vst.msk [vmem:[%s7020_s5 + $0x4] sm:$0xf] %vm120_vm12, %v3517_v6  ;;  %v3084_v0 = vadd.f32 %v7083_v41, %v3035_v52  ;;  %v3087_v14 = vadd.f32 %v7091_v24, %v3038_v10  ;;  %v3189_v1 = vpop.f32.mrf.mxu1 }
 0x57e   :  { %v2942_v43 = vadd.f32 %v7087_v36, %v2893_v2 }
 0x57f   :  { %v3133_v59 = vadd.f32 %v3132_v62, %v3084_v0  ;;  %v7090_v62 = vld [vmem:[#allocation33_spill] sm:$0xff]  ;;  %v3136_v13 = vadd.f32 %v3135_v50, %v3087_v14 }
 0x580   :  { %v3272_v30 = vpop.f32.mrf.mxu3  ;;  %v2991_v25 = vadd.f32 %v7090_v62, %v2942_v43  ;;  %v1904_v43 = vpop.permute.xlu0 %1903 }
 0x581   :  { %v6403_v8 = vadd.f32 %v3272_v30, %v3224_v47  ;;  %v3228_v51 = vpop.f32.mrf.mxu2  ;;  %v3137_v47 = vpop.f32.mrf.mxu0  ;;  %v7086_v30 = vld [vmem:[#allocation9_spill] sm:$0xff]  ;;  %v3182_v57 = vadd.f32 %v3181_v60, %v3133_v59 }
 0x582   :  { %v3229_v53 = vadd.f32 %v3228_v51, %v3180_v49  ;;  %v2847_v32 = vadd.f32 %v7086_v30, %v1889_v9  ;;  %v7089_v51 = vld [vmem:[#allocation10_spill] sm:$0xff]  ;;  %v3040_v60 = vadd.f32 %v7093_v45, %v2991_v25  ;;  %v7095_v49 = vld [vmem:[#allocation35_spill] sm:$0xff]  ;;  %v7099_v25 = vld [vmem:[#allocation12_spill] sm:$0xff] }
 0x583   :  { %v3518_v46 = vpack.c.bf16 %v6403_v8, %v6403_v8  ;;  %v3330_v55 = vsel %vm3323_vm15, %v6403_v8, 0.0  ;;  %v7096_v9 = vld [vmem:[#allocation38_spill] sm:$0xff] }
 0x584   :  { %3331 = vadd.xlane.f32.xlu1 %v3330_v55  ;;  %v2896_v12 = vadd.f32 %v7089_v51, %v2847_v32  ;;  %v3089_v50 = vadd.f32 %v7095_v49, %v3040_v60  ;;  %v7097_v32 = vld [vmem:[#allocation39_spill] sm:$0xff] }
 0x585   :  { %3534 = vst.msk [vmem:[%s7020_s5 + $0x8] sm:$0xf] %vm120_vm12, %v3518_v46 }
 0x586   :  { %v3138_v48 = vadd.f32 %v3137_v47, %v3089_v50 }
 0x588   :  { %v3274_v23 = vpop.f32.mrf.mxu3  ;;  %v3187_v30 = vadd.f32 %v3186_v5, %v3138_v48 }
 0x589   :  { %v6419_v28 = vadd.f32 %v3274_v23, %v3226_v19  ;;  %v3230_v29 = vpop.f32.mrf.mxu2  ;;  %v7092_v19 = vld [vmem:[#allocation36_spill] sm:$0xff]  ;;  %v3140_v27 = vpop.f32.mrf.mxu0 }
 0x58a   :  { %v3231_v63 = vadd.f32 %v3230_v29, %v3182_v57  ;;  %v2945_v23 = vadd.f32 %v7092_v19, %v2896_v12  ;;  %v7094_v29 = vld [vmem:[#allocation37_spill] sm:$0xff] }
 0x58b   :  { %v3519_v22 = vpack.c.bf16 %v6419_v28, %v6419_v28  ;;  %v3333_v6 = vsel %vm3323_vm15, %v6419_v28, 0.0 }
 0x58c   :  { %3334 = vadd.xlane.f32.xlu2 %v3333_v6  ;;  %v2994_v6 = vadd.f32 %v7094_v29, %v2945_v23 }
 0x58d   :  { %3535 = vst.msk [vmem:[%s7020_s5 + $0xc] sm:$0xf] %vm120_vm12, %v3519_v22  ;;  %v3185_v22 = vadd.f32 %v3184_v38, %v3136_v13 }
 0x58e   :  { %v3043_v26 = vadd.f32 %v7096_v9, %v2994_v6 }
 0x590   :  { %v3277_v20 = vpop.f32.mrf.mxu3  ;;  %v3092_v59 = vadd.f32 %v7097_v32, %v3043_v26 }
 0x591   :  { %v6437_v40 = vadd.f32 %v3277_v20, %v3229_v53  ;;  %v3233_v11 = vpop.f32.mrf.mxu2  ;;  %v3142_v20 = vpop.f32.mrf.mxu0 }
 0x592   :  { %v3234_v41 = vadd.f32 %v3233_v11, %v3185_v22  ;;  %v3191_v11 = vpop.f32.mrf.mxu1  ;;  %v3141_v44 = vadd.f32 %v3140_v27, %v3092_v59  ;;  %v3143_v13 = vadd.f32 %v3142_v20, %v6216_v16  ;;  %v7104_v59 = vld [vmem:[#allocation13_spill] sm:$0xff] }
 0x593   :  { %v3520_v46 = vpack.c.bf16 %v6437_v40, %v6437_v40  ;;  %v3336_v55 = vsel %vm3323_vm15, %v6437_v40, 0.0 }
 0x594   :  { %3337 = vadd.xlane.f32.xlu2 %v3336_v55  ;;  %v7098_v55 = vld [vmem:[#allocation11_spill] sm:$0xff]  ;;  %v3190_v57 = vadd.f32 %v3189_v1, %v3141_v44 }
 0x595   :  { %3536 = vst.msk [vmem:[%s7020_s5 + $0x10] sm:$0xf] %vm120_vm12, %v3520_v46  ;;  %v2854_v51 = vadd.f32 %v7098_v55, %v1904_v43  ;;  %v4537_v55 = vmov 0.0  }
 0x596   :  { %64 = vst.msk [vmem:[%s7021_s6] sm:$0xff] %vm63_vm2, %v4537_v55 }
 0x597   :  { %v2903_v24 = vadd.f32 %v7099_v25, %v2854_v51  ;;  %65 = vst.msk [vmem:[%s7021_s6 + $0x8] sm:$0xff] %vm63_vm2, %v4537_v55 }
 0x598   :  { %v3279_v3 = vpop.f32.mrf.mxu3  ;;  %66 = vst.msk [vmem:[%s7021_s6 + $0x10] sm:$0xff] %vm63_vm2, %v4537_v55 }
 0x599   :  { %v6453_v35 = vadd.f32 %v3279_v3, %v3231_v63  ;;  %v3235_v52 = vpop.f32.mrf.mxu2  ;;  %v3145_v62 = vpop.f32.mrf.mxu0  ;;  %67 = vst.msk [vmem:[%s7021_s6 + $0x18] sm:$0xff] %vm63_vm2, %v4537_v55 }
 0x59a   :  { %v3236_v36 = vadd.f32 %v3235_v52, %v3187_v30  ;;  %v3194_v63 = vpop.f32.mrf.mxu1  ;;  %v7100_v52 = vld [vmem:[#allocation40_spill] sm:$0xff]  ;;  %v3146_v50 = vadd.f32 %v3145_v62, %v6197_v7  ;;  %68 = vst.msk [vmem:[%s7021_s6 + $0x20] sm:$0xff] %vm63_vm2, %v4537_v55 }
 0x59b   :  { %v3521_v18 = vpack.c.bf16 %v6453_v35, %v6453_v35  ;;  %v3339_v39 = vsel %vm3323_vm15, %v6453_v35, 0.0  ;;  %v2952_v27 = vadd.f32 %v7100_v52, %v2903_v24  ;;  %69 = vst.msk [vmem:[%s7021_s6 + $0x28] sm:$0xff] %vm63_vm2, %v4537_v55 }
 0x59c   :  { %3340 = vadd.xlane.f32.xlu0 %v3339_v39  ;;  %v7101_v39 = vld [vmem:[#allocation42_spill] sm:$0xff]  ;;  %v3195_v48 = vadd.f32 %v3194_v63, %v3146_v50  ;;  %v7106_v63 = vld [vmem:[#allocation17_spill] sm:$0xff]  ;;  %70 = vst.msk [vmem:[%s7021_s6 + $0x30] sm:$0xff] %vm63_vm2, %v4537_v55 }
 0x59d   :  { %3537 = vst.msk [vmem:[%s7020_s5 + $0x14] sm:$0xf] %vm120_vm12, %v3521_v18  ;;  %v3192_v18 = vadd.f32 %v3191_v11, %v3143_v13  ;;  %v3001_v1 = vadd.f32 %v7101_v39, %v2952_v27 }
 0x59e   :  { %71 = vst.msk [vmem:[%s7021_s6 + $0x38] sm:$0xff] %vm63_vm2, %v4537_v55 }
 0x59f   :  { %72 = vst.msk [vmem:[%s7021_s6 + $0x40] sm:$0xff] %vm63_vm2, %v4537_v55 }
 0x5a0   :  { %v3282_v0 = vpop.f32.mrf.mxu3  ;;  %73 = vst.msk [vmem:[%s7021_s6 + $0x48] sm:$0xff] %vm63_vm2, %v4537_v55 }
 0x5a1   :  { %v6467_v2 = vadd.f32 %v3282_v0, %v3234_v41  ;;  %v3238_v21 = vpop.f32.mrf.mxu2  ;;  %v3147_v16 = vpop.f32.mrf.mxu0  ;;  %v7102_v41 = vld [vmem:[#allocation43_spill] sm:$0xff]  ;;  %74 = vst.msk [vmem:[%s7021_s6 + $0x50] sm:$0xff] %vm63_vm2, %v4537_v55 }
 0x5a2   :  { %v3239_v14 = vadd.f32 %v3238_v21, %v3190_v57  ;;  %v3196_v49 = vpop.f32.mrf.mxu1  ;;  %v3050_v0 = vadd.f32 %v7102_v41, %v3001_v1  ;;  %v7105_v57 = vld [vmem:[#allocation14_spill] sm:$0xff]  ;;  %75 = vst.msk [vmem:[%s7021_s6 + $0x58] sm:$0xff] %vm63_vm2, %v4537_v55 }
 0x5a3   :  { %v3522_v38 = vpack.c.bf16 %v6467_v2, %v6467_v2  ;;  %v3342_v53 = vsel %vm3323_vm15, %v6467_v2, 0.0  ;;  %76 = vst.msk [vmem:[%s7021_s6 + $0x60] sm:$0xff] %vm63_vm2, %v4537_v55 }
 0x5a4   :  { %3343 = vadd.xlane.f32.xlu1 %v3342_v53  ;;  %v7103_v53 = vld [vmem:[#allocation44_spill] sm:$0xff]  ;;  %77 = vst.msk [vmem:[%s7021_s6 + $0x68] sm:$0xff] %vm63_vm2, %v4537_v55 }
 0x5a5   :  { %3538 = vst.msk [vmem:[%s7020_s5 + $0x18] sm:$0xf] %vm120_vm12, %v3522_v38  ;;  %v1919_v38 = vpop.permute.xlu0 %1918  ;;  %v3099_v20 = vadd.f32 %v7103_v53, %v3050_v0 }
 0x5a6   :  { %v2862_v11 = vadd.f32 %v7104_v59, %v1919_v38  ;;  %78 = vst.msk [vmem:[%s7021_s6 + $0x70] sm:$0xff] %vm63_vm2, %v4537_v55 }
 0x5a7   :  { %79 = vst.msk [vmem:[%s7021_s6 + $0x78] sm:$0xff] %vm63_vm2, %v4537_v55 }
 0x5a8   :  { %v3284_v47 = vpop.f32.mrf.mxu3  ;;  %v2911_v62 = vadd.f32 %v7105_v57, %v2862_v11  ;;  %80 = vst.msk [vmem:[%s7022_s7] sm:$0xff] %vm63_vm2, %v4537_v55  ;;  %v3420_v11 = vmul.f32 %v6369_v15, %v6369_v15  ;;  %v3307_v57 = vld [vmem:[%s7021_s6] sm:$0xff] }
 0x5a9   :  { %v6478_v10 = vadd.f32 %v3284_v47, %v3236_v36  ;;  %v3240_v46 = vpop.f32.mrf.mxu2  ;;  %v3148_v36 = vadd.f32 %v3147_v16, %v3099_v20  ;;  %v3150_v44 = vpop.f32.mrf.mxu0  ;;  %81 = vst.msk [vmem:[%s7022_s7 + $0x8] sm:$0xff] %vm63_vm2, %v4537_v55 }
 0x5aa   :  { %v3241_v22 = vadd.f32 %v3240_v46, %v3192_v18  ;;  %v3199_v46 = vpop.f32.mrf.mxu1  ;;  %v3151_v52 = vadd.f32 %v3150_v44, %v6219_v4  ;;  %82 = vst.msk [vmem:[%s7022_s7 + $0x10] sm:$0xff] %vm63_vm2, %v4537_v55 }
 0x5ab   :  { %v3523_v5 = vpack.c.bf16 %v6478_v10, %v6478_v10  ;;  %v3345_v12 = vsel %vm3323_vm15, %v6478_v10, 0.0  ;;  %v3197_v51 = vadd.f32 %v3196_v49, %v3148_v36  ;;  %83 = vst.msk [vmem:[%s7022_s7 + $0x18] sm:$0xff] %vm63_vm2, %v4537_v55 }
 0x5ac   :  { %3346 = vadd.xlane.f32.xlu2 %v3345_v12  ;;  %v1924_v12 = vpop.permute.xlu1 %1923  ;;  %v3200_v4 = vadd.f32 %v3199_v46, %v3151_v52  ;;  %84 = vst.msk [vmem:[%s7022_s7 + $0x20] sm:$0xff] %vm63_vm2, %v4537_v55 }
 0x5ad   :  { %3539 = vst.msk [vmem:[%s7020_s5 + $0x1c] sm:$0xf] %vm120_vm12, %v3523_v5 }
 0x5ae   :  { %85 = vst.msk [vmem:[%s7022_s7 + $0x28] sm:$0xff] %vm63_vm2, %v4537_v55 }
 0x5af   :  { %86 = vst.msk [vmem:[%s7022_s7 + $0x30] sm:$0xff] %vm63_vm2, %v4537_v55 }
 0x5b0   :  { %v3287_v3 = vpop.f32.mrf.mxu3  ;;  %87 = vst.msk [vmem:[%s7022_s7 + $0x38] sm:$0xff] %vm63_vm2, %v4537_v55 }
 0x5b1   :  { %v6490_v19 = vadd.f32 %v3287_v3, %v3239_v14  ;;  %v3243_v23 = vpop.f32.mrf.mxu2  ;;  %v2864_v3 = vadd.f32 %v7106_v63, %v1924_v12  ;;  %88 = vst.msk [vmem:[%s7022_s7 + $0x40] sm:$0xff] %vm63_vm2, %v4537_v55 }
 0x5b2   :  { %v3244_v7 = vadd.f32 %v3243_v23, %v3195_v48  ;;  %v2960_v23 = vadd.f32 %v6305_v42, %v2911_v62  ;;  %v3152_v42 = vpop.f32.mrf.mxu0  ;;  %89 = vst.msk [vmem:[%s7022_s7 + $0x48] sm:$0xff] %vm63_vm2, %v4537_v55 }
 0x5b3   :  { %v3524_v45 = vpack.c.bf16 %v6490_v19, %v6490_v19  ;;  %v3348_v60 = vsel %vm3323_vm15, %v6490_v19, 0.0  ;;  %90 = vst.msk [vmem:[%s7022_s7 + $0x50] sm:$0xff] %vm63_vm2, %v4537_v55 }
 0x5b4   :  { %3349 = vadd.xlane.f32.xlu0 %v3348_v60  ;;  %v7107_v60 = vld [vmem:[#allocation18_spill] sm:$0xff]  ;;  %v3009_v39 = vadd.f32 %v6313_v56, %v2960_v23  ;;  %v3153_v56 = vadd.f32 %v3152_v42, %v6203_v54  ;;  %91 = vst.msk [vmem:[%s7022_s7 + $0x58] sm:$0xff] %vm63_vm2, %v4537_v55  ;;  %v3423_v23 = vmul.f32 %v6419_v28, %v6419_v28 }
 0x5b5   :  { %3540 = vst.msk [vmem:[%s7020_s5 + $0x20] sm:$0xf] %vm120_vm12, %v3524_v45  ;;  %v3201_v45 = vpop.f32.mrf.mxu1  ;;  %v2913_v18 = vadd.f32 %v7107_v60, %v2864_v3  ;;  %v3422_v42 = vmul.f32 %v6403_v8, %v6403_v8 }
 0x5b6   :  { %v3058_v50 = vadd.f32 %v6333_v34, %v3009_v39  ;;  %v3202_v54 = vadd.f32 %v3201_v45, %v3153_v56  ;;  %92 = vst.msk [vmem:[%s7022_s7 + $0x60] sm:$0xff] %vm63_vm2, %v4537_v55  ;;  %v3445_v28 = vsel %vm3323_vm15, %v3423_v23, 0.0  ;;  %v3424_v45 = vmul.f32 %v6437_v40, %v6437_v40  ;;  %v3309_v40 = vld [vmem:[%s7021_s6 + $0x10] sm:$0xff] }
 0x5b7   :  { %v2962_v49 = vadd.f32 %v6316_v58, %v2913_v18  ;;  %93 = vst.msk [vmem:[%s7022_s7 + $0x68] sm:$0xff] %vm63_vm2, %v4537_v55  ;;  %v3426_v18 = vmul.f32 %v6467_v2, %v6467_v2  ;;  %v3442_v39 = vsel %vm3323_vm15, %v3422_v42, 0.0  ;;  %v3425_v2 = vmul.f32 %v6453_v35, %v6453_v35  ;;  %v3404_v42 = vld [vmem:[%s7022_s7] sm:$0xff] }
 0x5b8   :  { %v3289_v29 = vpop.f32.mrf.mxu3  ;;  %94 = vst.msk [vmem:[%s7022_s7 + $0x70] sm:$0xff] %vm63_vm2, %v4537_v55 }
 0x5b9   :  { %v6503_v6 = vadd.f32 %v3289_v29, %v3241_v22  ;;  %v3245_v21 = vpop.f32.mrf.mxu2  ;;  %v3011_v34 = vadd.f32 %v6318_v33, %v2962_v49  ;;  %95 = vst.msk [vmem:[%s7022_s7 + $0x78] sm:$0xff] %vm63_vm2, %v4537_v55  ;;  %v3308_v55 = vld [vmem:[%s7021_s6 + $0x8] sm:$0xff]  ;;  %v3454_v8 = vsel %vm3323_vm15, %v3426_v18, 0.0 }
 0x5ba   :  { %v3246_v25 = vadd.f32 %v3245_v21, %v3197_v51  ;;  %v3155_v58 = vpop.f32.mrf.mxu0  ;;  %v3436_v51 = vsel %vm3323_vm15, %v3420_v11, 0.0  ;;  %v3313_v11 = vld [vmem:[%s7021_s6 + $0x30] sm:$0xff] }
 0x5bb   :  { %v3525_v9 = vpack.c.bf16 %v6503_v6, %v6503_v6  ;;  %v3351_v26 = vsel %vm3323_vm15, %v6503_v6, 0.0  ;;  %v3429_v49 = vmul.f32 %v6503_v6, %v6503_v6  ;;  %v3428_v6 = vmul.f32 %v6490_v19, %v6490_v19 }
 0x5bc   :  { %3352 = vadd.xlane.f32.xlu1 %v3351_v26 }
 0x5bd   :  { %3541 = vst.msk [vmem:[%s7020_s5 + $0x24] sm:$0xf] %vm120_vm12, %v3525_v9  ;;  %v3107_v9 = vadd.f32 %v6350_v37, %v3058_v50  ;;  %v3204_v21 = vpop.f32.mrf.mxu1  ;;  %v3060_v37 = vadd.f32 %v6344_v17, %v3011_v34  ;;  %v3451_v50 = vsel %vm3323_vm15, %v3425_v2, 0.0  ;;  %v3463_v35 = vsel %vm3323_vm15, %v3429_v49, 0.0 }
 0x5bf   :  { %v3156_v53 = vadd.f32 %v3155_v58, %v3107_v9  ;;  %v3460_v9 = vsel %vm3323_vm15, %v3428_v6, 0.0 }
 0x5c0   :  { %v3292_v30 = vpop.f32.mrf.mxu3 }
 0x5c1   :  { %v6516_v32 = vadd.f32 %v3292_v30, %v3244_v7  ;;  %v3248_v5 = vpop.f32.mrf.mxu2  ;;  %v3205_v17 = vadd.f32 %v3204_v21, %v3156_v53  ;;  %v3109_v30 = vadd.f32 %v6360_v31, %v3060_v37 }
 0x5c2   :  { %v3249_v1 = vadd.f32 %v3248_v5, %v3200_v4  ;;  %v3157_v36 = vpop.f32.mrf.mxu0 }
 0x5c3   :  { %v3526_v43 = vpack.c.bf16 %v6516_v32, %v6516_v32  ;;  %v3354_v47 = vsel %vm3323_vm15, %v6516_v32, 0.0  ;;  %v3158_v15 = vadd.f32 %v3157_v36, %v3109_v30 }
 0x5c4   :  { %3355 = vadd.xlane.f32.xlu2 %v3354_v47 }
 0x5c5   :  { %3542 = vst.msk [vmem:[%s7020_s5 + $0x28] sm:$0xf] %vm120_vm12, %v3526_v43  ;;  %v3206_v31 = vpop.f32.mrf.mxu1 }
 0x5c6   :  { %v3207_v12 = vadd.f32 %v3206_v31, %v3158_v15 }
 0x5c8   :  { %v3294_v24 = vpop.f32.mrf.mxu3 }
 0x5c9   :  { %v6548_v14 = vadd.f32 %v3294_v24, %v3246_v25  ;;  %v3250_v22 = vpop.f32.mrf.mxu2  ;;  %v3421_v24 = vmul.f32 %v6387_v61, %v6387_v61 }
 0x5ca   :  { %v3251_v26 = vadd.f32 %v3250_v22, %v3202_v54  ;;  %v3430_v54 = vmul.f32 %v6516_v32, %v6516_v32  ;;  %v3311_v32 = vld [vmem:[%s7021_s6 + $0x20] sm:$0xff] }
 0x5cb   :  { %v3527_v27 = vpack.c.bf16 %v6548_v14, %v6548_v14  ;;  %v3357_v13 = vsel %vm3323_vm15, %v6548_v14, 0.0 }
 0x5cc   :  { %3358 = vadd.xlane.f32.xlu0 %v3357_v13  ;;  %v3439_v13 = vsel %vm3323_vm15, %v3421_v24, 0.0 }
 0x5cd   :  { %3543 = vst.msk [vmem:[%s7020_s5 + $0x2c] sm:$0xf] %vm120_vm12, %v3527_v27 }
 0x5d0   :  { %v3297_v29 = vpop.f32.mrf.mxu3 }
 0x5d1   :  { %v6598_v16 = vadd.f32 %v3297_v29, %v3249_v1  ;;  %v3253_v33 = vpop.f32.mrf.mxu2  ;;  %v3448_v1 = vsel %vm3323_vm15, %v3424_v45, 0.0  ;;  %v3427_v29 = vmul.f32 %v6478_v10, %v6478_v10  ;;  %v3310_v10 = vld [vmem:[%s7021_s6 + $0x18] sm:$0xff] }
 0x5d2   :  { %v3254_v59 = vadd.f32 %v3253_v33, %v3205_v17 }
 0x5d3   :  { %v3528_v41 = vpack.c.bf16 %v6598_v16, %v6598_v16  ;;  %v3360_v0 = vsel %vm3323_vm15, %v6598_v16, 0.0  ;;  %v3432_v34 = vmul.f32 %v6598_v16, %v6598_v16  ;;  %v3431_v16 = vmul.f32 %v6548_v14, %v6548_v14  ;;  %v3312_v14 = vld [vmem:[%s7021_s6 + $0x28] sm:$0xff] }
 0x5d4   :  { %3361 = vadd.xlane.f32.xlu1 %v3360_v0 }
 0x5d5   :  { %3544 = vst.msk [vmem:[%s7020_s5 + $0x30] sm:$0xf] %vm120_vm12, %v3528_v41  ;;  %v3457_v41 = vsel %vm3323_vm15, %v3427_v29, 0.0  ;;  %v3472_v19 = vsel %vm3323_vm15, %v3432_v34, 0.0  ;;  %v3469_v53 = vsel %vm3323_vm15, %v3431_v16, 0.0 }
 0x5d8   :  { %v3299_v48 = vpop.f32.mrf.mxu3 }
 0x5d9   :  { %v6648_v38 = vadd.f32 %v3299_v48, %v3251_v26  ;;  %v3255_v5 = vpop.f32.mrf.mxu2  ;;  %v3466_v26 = vsel %vm3323_vm15, %v3430_v54, 0.0 }
 0x5da   :  { %v3256_v62 = vadd.f32 %v3255_v5, %v3207_v12  ;;  %v3316_v5 = vld [vmem:[%s7021_s6 + $0x48] sm:$0xff] }
 0x5db   :  { %v3529_v20 = vpack.c.bf16 %v6648_v38, %v6648_v38  ;;  %v3363_v7 = vsel %vm3323_vm15, %v6648_v38, 0.0  ;;  %v3433_v48 = vmul.f32 %v6648_v38, %v6648_v38 }
 0x5dc   :  { %3364 = vadd.xlane.f32.xlu2 %v3363_v7 }
 0x5dd   :  { %3545 = vst.msk [vmem:[%s7020_s5 + $0x34] sm:$0xf] %vm120_vm12, %v3529_v20  ;;  %v3475_v20 = vsel %vm3323_vm15, %v3433_v48, 0.0 }
 0x5e0   :  { %v3302_v43 = vpop.f32.mrf.mxu3 }
 0x5e1   :  { %v6697_v47 = vadd.f32 %v3302_v43, %v3254_v59 }
 0x5e3   :  { %v3530_v44 = vpack.c.bf16 %v6697_v47, %v6697_v47  ;;  %v3366_v46 = vsel %vm3323_vm15, %v6697_v47, 0.0  ;;  %v3434_v17 = vmul.f32 %v6697_v47, %v6697_v47  ;;  %v3314_v47 = vld [vmem:[%s7021_s6 + $0x38] sm:$0xff] }
 0x5e4   :  { %3367 = vadd.xlane.f32.xlu0 %v3366_v46  ;;  %3437 = vadd.xlane.f32.xlu2 %v3436_v51 }
 0x5e5   :  { %3546 = vst.msk [vmem:[%s7020_s5 + $0x38] sm:$0xf] %vm120_vm12, %v3530_v44  ;;  %v3478_v59 = vsel %vm3323_vm15, %v3434_v17, 0.0  ;;  %v3315_v44 = vld [vmem:[%s7021_s6 + $0x40] sm:$0xff] }
 0x5e7   :  { %v3326_v25 = vpop.xlane.xlu2 %3325 }
 0x5e8   :  { %v3372_v63 = vadd.f32 %v3326_v25, %v3307_v57  ;;  %v3304_v3 = vpop.f32.mrf.mxu3 }
 0x5e9   :  { %v3305_v52 = vadd.f32 %v3304_v3, %v3256_v62  ;;  %v3317_v62 = vld [vmem:[%s7021_s6 + $0x50] sm:$0xff] }
 0x5ea   :  { %3388 = vst.msk [vmem:[%s7021_s6] sm:$0xff] %vm63_vm2, %v3372_v63  ;;  %v3318_v63 = vld [vmem:[%s7021_s6 + $0x58] sm:$0xff] }
 0x5eb   :  { %v3531_v61 = vpack.c.bf16 %v3305_v52, %v3305_v52  ;;  %v3369_v27 = vsel %vm3323_vm15, %v3305_v52, 0.0  ;;  %v3435_v37 = vmul.f32 %v3305_v52, %v3305_v52  ;;  %v3319_v52 = vld [vmem:[%s7021_s6 + $0x60] sm:$0xff] }
 0x5ec   :  { %3370 = vadd.xlane.f32.xlu1 %v3369_v27  ;;  %3440 = vadd.xlane.f32.xlu0 %v3439_v13  ;;  %v3320_v13 = vld [vmem:[%s7021_s6 + $0x68] sm:$0xff] }
 0x5ed   :  { %3547 = vst.msk [vmem:[%s7020_s5 + $0x3c] sm:$0xf] %vm120_vm12, %v3531_v61  ;;  %3446 = vadd.xlane.f32.xlu2 %v3445_v28  ;;  %v3481_v7 = vsel %vm3323_vm15, %v3435_v37, 0.0 }
 0x5ef   :  { %v3329_v4 = vpop.xlane.xlu0 %3328 }
 0x5f0   :  { %v3373_v60 = vadd.f32 %v3329_v4, %v3308_v55  ;;  %v3321_v4 = vld [vmem:[%s7021_s6 + $0x70] sm:$0xff] }
 0x5f2   :  { %3389 = vst.msk [vmem:[%s7021_s6 + $0x8] sm:$0xff] %vm63_vm2, %v3373_v60 }
 0x5f4   :  { %3443 = vadd.xlane.f32.xlu1 %v3442_v39  ;;  %3449 = vadd.xlane.f32.xlu0 %v3448_v1  ;;  %v3322_v1 = vld [vmem:[%s7021_s6 + $0x78] sm:$0xff] }
 0x5f5   :  { %3455 = vadd.xlane.f32.xlu2 %v3454_v8  ;;  %v3405_v8 = vld [vmem:[%s7022_s7 + $0x8] sm:$0xff] }
 0x5f7   :  { %v3332_v22 = vpop.xlane.xlu1 %3331 }
 0x5f8   :  { %v3374_v56 = vadd.f32 %v3332_v22, %v3309_v40  ;;  %v3407_v40 = vld [vmem:[%s7022_s7 + $0x18] sm:$0xff] }
 0x5fa   :  { %3390 = vst.msk [vmem:[%s7021_s6 + $0x10] sm:$0xff] %vm63_vm2, %v3374_v56 }
 0x5fc   :  { %3452 = vadd.xlane.f32.xlu1 %v3451_v50  ;;  %3458 = vadd.xlane.f32.xlu0 %v3457_v41  ;;  %v3406_v41 = vld [vmem:[%s7022_s7 + $0x10] sm:$0xff] }
 0x5fd   :  { %3464 = vadd.xlane.f32.xlu2 %v3463_v35  ;;  %v3408_v35 = vld [vmem:[%s7022_s7 + $0x20] sm:$0xff] }
 0x5ff   :  { %v3335_v0 = vpop.xlane.xlu2 %3334 }
 0x600   :  { %v3375_v58 = vadd.f32 %v3335_v0, %v3310_v10  ;;  %v3410_v10 = vld [vmem:[%s7022_s7 + $0x30] sm:$0xff] }
 0x602   :  { %3391 = vst.msk [vmem:[%s7021_s6 + $0x18] sm:$0xff] %vm63_vm2, %v3375_v58 }
 0x604   :  { %3461 = vadd.xlane.f32.xlu1 %v3460_v9  ;;  %3467 = vadd.xlane.f32.xlu0 %v3466_v26  ;;  %v3409_v26 = vld [vmem:[%s7022_s7 + $0x28] sm:$0xff] }
 0x605   :  { %3473 = vadd.xlane.f32.xlu2 %v3472_v19  ;;  %v3411_v19 = vld [vmem:[%s7022_s7 + $0x38] sm:$0xff] }
 0x607   :  { %v3338_v21 = vpop.xlane.xlu2 %3337 }
 0x608   :  { %v3376_v33 = vadd.f32 %v3338_v21, %v3311_v32  ;;  %v3413_v32 = vld [vmem:[%s7022_s7 + $0x48] sm:$0xff] }
 0x60a   :  { %3392 = vst.msk [vmem:[%s7021_s6 + $0x20] sm:$0xff] %vm63_vm2, %v3376_v33 }
 0x60c   :  { %3470 = vadd.xlane.f32.xlu1 %v3469_v53  ;;  %3476 = vadd.xlane.f32.xlu0 %v3475_v20  ;;  %v3412_v20 = vld [vmem:[%s7022_s7 + $0x40] sm:$0xff] }
 0x60d   :  { %3482 = vadd.xlane.f32.xlu2 %v3481_v7  ;;  %v3414_v7 = vld [vmem:[%s7022_s7 + $0x50] sm:$0xff] }
 0x60f   :  { %v3341_v38 = vpop.xlane.xlu0 %3340 }
 0x610   :  { %v3377_v30 = vadd.f32 %v3341_v38, %v3312_v14  ;;  %v3416_v14 = vld [vmem:[%s7022_s7 + $0x60] sm:$0xff] }
 0x612   :  { %3393 = vst.msk [vmem:[%s7021_s6 + $0x28] sm:$0xff] %vm63_vm2, %v3377_v30 }
 0x614   :  { %3479 = vadd.xlane.f32.xlu1 %v3478_v59 }
 0x617   :  { %v3344_v36 = vpop.xlane.xlu1 %3343 }
 0x618   :  { %v3378_v43 = vadd.f32 %v3344_v36, %v3313_v11 }
 0x61a   :  { %3394 = vst.msk [vmem:[%s7021_s6 + $0x30] sm:$0xff] %vm63_vm2, %v3378_v43  ;;  %v3415_v43 = vld [vmem:[%s7022_s7 + $0x58] sm:$0xff] }
 0x61f   :  { %v3347_v31 = vpop.xlane.xlu2 %3346 }
 0x620   :  { %v3379_v15 = vadd.f32 %v3347_v31, %v3314_v47  ;;  %v3417_v47 = vld [vmem:[%s7022_s7 + $0x68] sm:$0xff]  ;;  %v3419_v31 = vld [vmem:[%s7022_s7 + $0x78] sm:$0xff] }
 0x622   :  { %3395 = vst.msk [vmem:[%s7021_s6 + $0x38] sm:$0xff] %vm63_vm2, %v3379_v15 }
 0x627   :  { %v3350_v46 = vpop.xlane.xlu0 %3349 }
 0x628   :  { %v3380_v51 = vadd.f32 %v3350_v46, %v3315_v44 }
 0x62a   :  { %3396 = vst.msk [vmem:[%s7021_s6 + $0x40] sm:$0xff] %vm63_vm2, %v3380_v51 }
 0x62f   :  { %v3353_v12 = vpop.xlane.xlu1 %3352 }
 0x630   :  { %v3381_v57 = vadd.f32 %v3353_v12, %v3316_v5 }
 0x632   :  { %3397 = vst.msk [vmem:[%s7021_s6 + $0x48] sm:$0xff] %vm63_vm2, %v3381_v57  ;;  %v3418_v57 = vld [vmem:[%s7022_s7 + $0x70] sm:$0xff] }
 0x637   :  { %v3356_v25 = vpop.xlane.xlu2 %3355 }
 0x638   :  { %v3382_v24 = vadd.f32 %v3356_v25, %v3317_v62 }
 0x63a   :  { %3398 = vst.msk [vmem:[%s7021_s6 + $0x50] sm:$0xff] %vm63_vm2, %v3382_v24 }
 0x63f   :  { %v3359_v3 = vpop.xlane.xlu0 %3358 }
 0x640   :  { %v3383_v23 = vadd.f32 %v3359_v3, %v3318_v63 }
 0x642   :  { %3399 = vst.msk [vmem:[%s7021_s6 + $0x58] sm:$0xff] %vm63_vm2, %v3383_v23 }
 0x647   :  { %v3362_v61 = vpop.xlane.xlu1 %3361 }
 0x648   :  { %v3384_v27 = vadd.f32 %v3362_v61, %v3319_v52 }
 0x64a   :  { %3400 = vst.msk [vmem:[%s7021_s6 + $0x60] sm:$0xff] %vm63_vm2, %v3384_v27 }
 0x64f   :  { %v3365_v28 = vpop.xlane.xlu2 %3364 }
 0x650   :  { %v3385_v55 = vadd.f32 %v3365_v28, %v3320_v13 }
 0x652   :  { %3401 = vst.msk [vmem:[%s7021_s6 + $0x68] sm:$0xff] %vm63_vm2, %v3385_v55 }
 0x657   :  { %v3368_v45 = vpop.xlane.xlu0 %3367  ;;  %v3438_v60 = vpop.xlane.xlu2 %3437 }
 0x658   :  { %v3386_v18 = vadd.f32 %v3368_v45, %v3321_v4  ;;  %v3484_v39 = vadd.f32 %v3438_v60, %v3404_v42 }
 0x65a   :  { %3402 = vst.msk [vmem:[%s7021_s6 + $0x70] sm:$0xff] %vm63_vm2, %v3386_v18 }
 0x65b   :  { %3500 = vst.msk [vmem:[%s7022_s7] sm:$0xff] %vm63_vm2, %v3484_v39 }
 0x65f   :  { %v3371_v22 = vpop.xlane.xlu1 %3370  ;;  %v3441_v2 = vpop.xlane.xlu0 %3440 }
 0x660   :  { %v3387_v29 = vadd.f32 %v3371_v22, %v3322_v1  ;;  %v3485_v56 = vadd.f32 %v3441_v2, %v3405_v8  ;;  %v3447_v49 = vpop.xlane.xlu2 %3446 }
 0x661   :  { %v3487_v50 = vadd.f32 %v3447_v49, %v3407_v40 }
 0x662   :  { %3403 = vst.msk [vmem:[%s7021_s6 + $0x78] sm:$0xff] %vm63_vm2, %v3387_v29 }
 0x663   :  { %3501 = vst.msk [vmem:[%s7022_s7 + $0x8] sm:$0xff] %vm63_vm2, %v3485_v56 }
 0x664   :  { %3503 = vst.msk [vmem:[%s7022_s7 + $0x18] sm:$0xff] %vm63_vm2, %v3487_v50 }
 0x667   :  { %v3444_v0 = vpop.xlane.xlu1 %3443  ;;  %v3450_v6 = vpop.xlane.xlu0 %3449 }
 0x668   :  { %v3486_v54 = vadd.f32 %v3444_v0, %v3406_v41  ;;  %v3488_v58 = vadd.f32 %v3450_v6, %v3408_v35  ;;  %v3456_v34 = vpop.xlane.xlu2 %3455 }
 0x669   :  { %v3490_v9 = vadd.f32 %v3456_v34, %v3410_v10 }
 0x66a   :  { %3502 = vst.msk [vmem:[%s7022_s7 + $0x10] sm:$0xff] %vm63_vm2, %v3486_v54 }
 0x66b   :  { %3504 = vst.msk [vmem:[%s7022_s7 + $0x20] sm:$0xff] %vm63_vm2, %v3488_v58 }
 0x66c   :  { %3506 = vst.msk [vmem:[%s7022_s7 + $0x30] sm:$0xff] %vm63_vm2, %v3490_v9 }
 0x66f   :  { %v3453_v21 = vpop.xlane.xlu1 %3452  ;;  %v3459_v16 = vpop.xlane.xlu0 %3458 }
 0x670   :  { %v3489_v48 = vadd.f32 %v3453_v21, %v3409_v26  ;;  %v3491_v33 = vadd.f32 %v3459_v16, %v3411_v19  ;;  %v3465_v37 = vpop.xlane.xlu2 %3464 }
 0x671   :  { %v3493_v53 = vadd.f32 %v3465_v37, %v3413_v32 }
 0x672   :  { %3505 = vst.msk [vmem:[%s7022_s7 + $0x28] sm:$0xff] %vm63_vm2, %v3489_v48 }
 0x673   :  { %3507 = vst.msk [vmem:[%s7022_s7 + $0x38] sm:$0xff] %vm63_vm2, %v3491_v33 }
 0x674   :  { %3509 = vst.msk [vmem:[%s7022_s7 + $0x48] sm:$0xff] %vm63_vm2, %v3493_v53 }
 0x677   :  { %v3462_v38 = vpop.xlane.xlu1 %3461  ;;  %v3468_v17 = vpop.xlane.xlu0 %3467 }
 0x678   :  { %v3492_v30 = vadd.f32 %v3462_v38, %v3412_v20  ;;  %v3494_v59 = vadd.f32 %v3468_v17, %v3414_v7  ;;  %v3474_v11 = vpop.xlane.xlu2 %3473 }
 0x679   :  { %v3496_v36 = vadd.f32 %v3474_v11, %v3416_v14 }
 0x67a   :  { %3508 = vst.msk [vmem:[%s7022_s7 + $0x40] sm:$0xff] %vm63_vm2, %v3492_v30 }
 0x67b   :  { %3510 = vst.msk [vmem:[%s7022_s7 + $0x50] sm:$0xff] %vm63_vm2, %v3494_v59 }
 0x67c   :  { %3512 = vst.msk [vmem:[%s7022_s7 + $0x60] sm:$0xff] %vm63_vm2, %v3496_v36 }
 0x67f   :  { %v3471_v15 = vpop.xlane.xlu1 %3470  ;;  %v3477_v44 = vpop.xlane.xlu0 %3476 }
 0x680   :  { %v3495_v46 = vadd.f32 %v3471_v15, %v3415_v43  ;;  %v3497_v51 = vadd.f32 %v3477_v44, %v3417_v47  ;;  %v3483_v5 = vpop.xlane.xlu2 %3482 }
 0x681   :  { %v3499_v12 = vadd.f32 %v3483_v5, %v3419_v31 }
 0x682   :  { %3511 = vst.msk [vmem:[%s7022_s7 + $0x58] sm:$0xff] %vm63_vm2, %v3495_v46 }
 0x683   :  { %3513 = vst.msk [vmem:[%s7022_s7 + $0x68] sm:$0xff] %vm63_vm2, %v3497_v51 }
 0x684   :  { %3515 = vst.msk [vmem:[%s7022_s7 + $0x78] sm:$0xff] %vm63_vm2, %v3499_v12 }
 0x687   :  { %v3480_v62 = vpop.xlane.xlu1 %3479 }
 0x688   :  { %v3498_v25 = vadd.f32 %v3480_v62, %v3418_v57 }
 0x68a   :  { %3514 = vst.msk [vmem:[%s7022_s7 + $0x70] sm:$0xff] %vm63_vm2, %v3498_v25 }

</bundles_post_ra>
